<compile_context>
chip_gen: v6e
topology: v6e:2x2x1
jax: 0.10.0
libtpu: 0.0.40
codegen_flags: <defaults>
</compile_context>

<pallas_src>
import functools

import jax
import jax.numpy as jnp
from jax.experimental import pallas as pl
from jax.experimental.pallas import tpu as pltpu

# ----------------------------- configuration --------------------------------
B, S = 2, 8                      # batch, sequence length
MAX_CHARS = 16                   # CharEmbedder.MAX
CHAR_EMB = 8                     # char_embedding_dim
CHAR_KERNELS = (3, 5)            # char_kerners
CHAR_CHANNELS = (16, 16)         # char_channels
CHAR_FEAT = sum(CHAR_CHANNELS)   # CNNLayer.output_dim
WORD_EMB = 32                    # word embedding dim
D_IN = WORD_EMB + CHAR_FEAT      # LSTM input dim
LSTM_SIZE = 32                   # total LSTM output dim (bidirectional concat)
H_DIR = LSTM_SIZE // 2           # hidden per direction
N_CLASSES = 8
N_PAD = 128                      # lane-dense padded class dim
VOCAB_SIZE = 50
ALPHABET_SIZE = 30


# --------------------------- fused NER kernel -------------------------------
def fused_ner_kernel(char_ref, word_ref, mask_ref,
                     w3_ref, b3_ref, w5_ref, b5_ref,
                     wih_ref, bih_ref, whhf_ref, whhb_ref,
                     wclf_f_ref, wclf_b_ref, bclf_ref,
                     o_ref,
                     gx_sc, hf_sc, hb_sc):
    slen, bsz, _ = word_ref.shape        # time-major
    n_tok = slen * bsz
    hd = whhf_ref.shape[0]               # hidden per direction
    max_chars = char_ref.shape[1]

    # ---------------- char CNN: im2col -> one matmul per kernel size --------
    xc = char_ref[...]                   # [n_tok, MAX_CHARS, CHAR_EMB], row = t*B+b

    def conv_relu_max(w, b, k):
        t_out = max_chars - k + 1
        # im2col window slab: [n_tok, t_out, k*CHAR_EMB]
        cols = jnp.concatenate([xc[:, kc:kc + t_out, :] for kc in range(k)],
                               axis=-1)
        acc = jax.lax.dot_general(
            cols, w, dimension_numbers=(((2,), (0,)), ((), ())),
            preferred_element_type=jnp.float32)          # [n_tok, t_out, Cout]
        acc = jnp.maximum(acc + b, 0.0)                  # bias + ReLU
        return jnp.max(acc, axis=1)                      # max-pool over positions

    f3 = conv_relu_max(w3_ref[...], b3_ref[...], CHAR_KERNELS[0])   # [n_tok, 16]
    f5 = conv_relu_max(w5_ref[...], b5_ref[...], CHAR_KERNELS[1])   # [n_tok, 16]

    # -------- word/char feats + hoisted LSTM input projection (both dirs) ---
    word_flat = word_ref[...].reshape(n_tok, -1)                    # row = t*B+b
    feats = jnp.concatenate([word_flat, f3, f5], axis=-1)           # [n_tok, D_IN]
    gates_x = (jnp.dot(feats, wih_ref[...],
                       preferred_element_type=jnp.float32)
               + bih_ref[...])                                      # [n_tok, 8*hd]
    gx_sc[...] = gates_x.reshape(slen, bsz, 8 * hd)                 # fwd | bwd

    mask = mask_ref[...]                                            # [S, B, 1]
    whh_f = whhf_ref[...]
    whh_b = whhb_ref[...]

    def cell(gx, h, c, whh, m):
        gates = gx + jnp.dot(h, whh, preferred_element_type=jnp.float32)
        i_g = jax.nn.sigmoid(gates[:, 0 * hd:1 * hd])
        f_g = jax.nn.sigmoid(gates[:, 1 * hd:2 * hd])
        g_g = jnp.tanh(gates[:, 2 * hd:3 * hd])
        o_g = jax.nn.sigmoid(gates[:, 3 * hd:4 * hd])
        c_new = f_g * c + i_g * g_g
        h_new = o_g * jnp.tanh(c_new)
        keep = m > 0.0                     # pack_padded_sequence semantics:
        return (jnp.where(keep, h_new, h),      # padded steps keep state
                jnp.where(keep, c_new, c),
                jnp.where(keep, h_new, 0.0))    # padded outputs are zero

    h_f = jnp.zeros((bsz, hd), jnp.float32)
    c_f = jnp.zeros((bsz, hd), jnp.float32)
    h_b = jnp.zeros((bsz, hd), jnp.float32)
    c_b = jnp.zeros((bsz, hd), jnp.float32)

    # Fused fwd/bwd recurrence; fully unrolled (slen static & tiny),
    # equivalent to lax.fori_loop(..., unroll=True).
    for t in range(slen):
        tb = slen - 1 - t
        gx_f = gx_sc[t][:, 0:4 * hd]          # forward gates x-part at time t
        gx_b = gx_sc[tb][:, 4 * hd:8 * hd]    # backward gates x-part at time tb
        h_f, c_f, out_f = cell(gx_f, h_f, c_f, whh_f, mask[t])
        h_b, c_b, out_b = cell(gx_b, h_b, c_b, whh_b, mask[tb])
        hf_sc[t] = out_f
        hb_sc[tb] = out_b

    # ------------- classifier: lane-dense (padded-to-128) logits ------------
    hf = hf_sc[...].reshape(n_tok, hd)
    hb = hb_sc[...].reshape(n_tok, hd)
    o_ref[...] = (jnp.dot(hf, wclf_f_ref[...], preferred_element_type=jnp.float32)
                  + jnp.dot(hb, wclf_b_ref[...], preferred_element_type=jnp.float32)
                  + bclf_ref[...])


def ner_fused_call(char_e, word_e, mask_sb1, w3, b3, w5, b5,
                   wih_cat, bih_cat, whh_f, whh_b, wclf_f, wclf_b, bclf_pad):
    slen, bsz, _ = word_e.shape
    n_tok = slen * bsz
    hd = whh_f.shape[0]
    n_pad = wclf_f.shape[1]
    args = (char_e, word_e, mask_sb1, w3, b3, w5, b5,
            wih_cat, bih_cat, whh_f, whh_b, wclf_f, wclf_b, bclf_pad)

    def full_spec(arr):
        nd = arr.ndim
        return pl.BlockSpec(arr.shape, lambda i, _nd=nd: (0,) * _nd)

    return pl.pallas_call(
        fused_ner_kernel,
        out_shape=jax.ShapeDtypeStruct((n_tok, n_pad), jnp.float32),
        grid=(1,),
        in_specs=[full_spec(a) for a in args],
        out_specs=pl.BlockSpec((n_tok, n_pad), lambda i: (0, 0)),
        scratch_shapes=[
            pltpu.VMEM((slen, bsz, 8 * hd), jnp.float32),   # hoisted x-gates
            pltpu.VMEM((slen, bsz, hd), jnp.float32),       # fwd outputs
            pltpu.VMEM((slen, bsz, hd), jnp.float32),       # bwd outputs
        ],
        compiler_params=pltpu.CompilerParams(
            dimension_semantics=("arbitrary",)),
    )(*args)


# ----------------------------- full forward ---------------------------------
def ner_forward(params, word_ids, char_ids):
    bsz, slen = word_ids.shape
    mask_bs = (word_ids != 0).astype(jnp.float32)                 # [B,S]

    # Transpose only the tiny int32 id arrays to time-major, then gather so the
    # embedded activations are born in the kernel's layout (no f32 transposes).
    word_ids_t = word_ids.T                                       # [S,B]
    char_ids_t = jnp.transpose(char_ids, (1, 0, 2))               # [S,B,MAX]
    word_e = params["word_table"][word_ids_t]                     # [S,B,WORD_EMB]
    char_e = params["char_table"][char_ids_t].reshape(
        slen * bsz, MAX_CHARS, CHAR_EMB)                          # row = t*B+b
    mask_sb1 = jnp.transpose(mask_bs, (1, 0))[:, :, None]         # [S,B,1]

    # Fold / pad weights once (trivial under jit): im2col weights, concatenated
    # per-direction input projections, lane-padded classifier.
    w3 = params["w3"].reshape(CHAR_KERNELS[0] * CHAR_EMB, CHAR_CHANNELS[0])
    w5 = params["w5"].reshape(CHAR_KERNELS[1] * CHAR_EMB, CHAR_CHANNELS[1])
    wih_cat = jnp.concatenate([params["wih_f"], params["wih_b"]], axis=1)  # [D_IN,128]
    bih_cat = jnp.concatenate([params["b_f"], params["b_b"]], axis=1)      # [1,128]
    wclf_pad = jnp.zeros((LSTM_SIZE, N_PAD), jnp.float32
                         ).at[:, :N_CLASSES].set(params["w_clf"])
    bclf_pad = jnp.zeros((1, N_PAD), jnp.float32
                         ).at[:, :N_CLASSES].set(params["b_clf"])
    wclf_f = wclf_pad[:H_DIR]
    wclf_b = wclf_pad[H_DIR:]

    logits_pad = ner_fused_call(char_e, word_e, mask_sb1, w3, params["b3"],
                                w5, params["b5"], wih_cat, bih_cat,
                                params["whh_f"], params["whh_b"],
                                wclf_f, wclf_b, bclf_pad)          # [S*B, 128]
    logits = jnp.transpose(logits_pad.reshape(slen, bsz, N_PAD),
                           (1, 0, 2))[:, :, :N_CLASSES]            # [B,S,C]
    return logits, mask_bs


# ----------------------------- pure-JAX reference ---------------------------
def ner_reference(params, word_ids, char_ids):
    bsz, slen = word_ids.shape
    mask = (word_ids != 0).astype(jnp.float32)
    word_e = params["word_table"][word_ids]                        # [B,S,WE]
    xc = params["char_table"][char_ids].reshape(
        bsz * slen, MAX_CHARS, CHAR_EMB)

    def conv_feat(w, b, k):
        t_out = MAX_CHARS - k + 1
        acc = jnp.zeros((bsz * slen, t_out, w.shape[-1]), jnp.float32)
        for kc in range(k):
            acc = acc + jnp.einsum("ntc,co->nto", xc[:, kc:kc + t_out, :], w[kc])
        return jnp.max(jnp.maximum(acc + b, 0.0), axis=1)

    f3 = conv_feat(params["w3"], params["b3"], CHAR_KERNELS[0])
    f5 = conv_feat(params["w5"], params["b5"], CHAR_KERNELS[1])
    char_f = jnp.concatenate([f3, f5], axis=-1).reshape(bsz, slen, CHAR_FEAT)
    feats = jnp.concatenate([word_e, char_f], axis=-1)

    def run_dir(wih, whh, bias, reverse):
        h = jnp.zeros((bsz, H_DIR), jnp.float32)
        c = jnp.zeros((bsz, H_DIR), jnp.float32)
        outs = [None] * slen
        order = range(slen - 1, -1, -1) if reverse else range(slen)
        for t in order:
            g = feats[:, t, :] @ wih + h @ whh + bias
            i_g = jax.nn.sigmoid(g[:, 0 * H_DIR:1 * H_DIR])
            f_g = jax.nn.sigmoid(g[:, 1 * H_DIR:2 * H_DIR])
            g_g = jnp.tanh(g[:, 2 * H_DIR:3 * H_DIR])
            o_g = jax.nn.sigmoid(g[:, 3 * H_DIR:4 * H_DIR])
            c_new = f_g * c + i_g * g_g
            h_new = o_g * jnp.tanh(c_new)
            keep = mask[:, t][:, None] > 0.0
            c = jnp.where(keep, c_new, c)
            h = jnp.where(keep, h_new, h)
            outs[t] = jnp.where(keep, h_new, 0.0)
        return jnp.stack(outs, axis=1)

    hf = run_dir(params["wih_f"], params["whh_f"], params["b_f"], False)
    hb = run_dir(params["wih_b"], params["whh_b"], params["b_b"], True)
    lstm_out = jnp.concatenate([hf, hb], axis=-1)
    logits = lstm_out @ params["w_clf"] + params["b_clf"]
    return logits, mask


# ----------------------------- parameters & inputs --------------------------
def init_params():
    key = jax.random.PRNGKey(0)
    ks = jax.random.split(key, 12)
    nrm = lambda k, shape: (0.1 * jax.random.normal(k, shape)).astype(jnp.float32)
    word_table = nrm(ks[0], (VOCAB_SIZE, WORD_EMB)).at[0].set(0.0)   # pad idx 0
    char_table = nrm(ks[1], (ALPHABET_SIZE, CHAR_EMB)).at[0].set(0.0)
    params = dict(
        word_table=word_table,
        char_table=char_table,
        w3=nrm(ks[2], (CHAR_KERNELS[0], CHAR_EMB, CHAR_CHANNELS[0])),
        b3=nrm(ks[3], (1, CHAR_CHANNELS[0])),
        w5=nrm(ks[4], (CHAR_KERNELS[1], CHAR_EMB, CHAR_CHANNELS[1])),
        b5=nrm(ks[5], (1, CHAR_CHANNELS[1])),
        wih_f=nrm(ks[6], (D_IN, 4 * H_DIR)),
        whh_f=nrm(ks[7], (H_DIR, 4 * H_DIR)),
        b_f=nrm(ks[8], (1, 4 * H_DIR)),
        wih_b=nrm(ks[9], (D_IN, 4 * H_DIR)),
        whh_b=nrm(ks[10], (H_DIR, 4 * H_DIR)),
        b_b=nrm(ks[11], (1, 4 * H_DIR)),
    )
    k2 = jax.random.split(jax.random.PRNGKey(1), 2)
    params["w_clf"] = (0.1 * jax.random.normal(k2[0], (LSTM_SIZE, N_CLASSES))
                       ).astype(jnp.float32)
    params["b_clf"] = (0.1 * jax.random.normal(k2[1], (1, N_CLASSES))
                       ).astype(jnp.float32)
    return params


if __name__ == "__main__":
    params = init_params()

    key = jax.random.PRNGKey(0)
    kw, kc = jax.random.split(key)
    word_ids = jax.random.randint(kw, (B, S), 1, VOCAB_SIZE, dtype=jnp.int32)
    # make the tail of sequence 1 padding to exercise the mask path
    word_ids = word_ids.at[1, S - 2:].set(0)
    char_ids = jax.random.randint(kc, (B, S, MAX_CHARS), 0, ALPHABET_SIZE,
                                  dtype=jnp.int32)

    fwd = jax.jit(functools.partial(ner_forward, params))
    logits, mask = fwd(word_ids, char_ids)
    jax.block_until_ready(logits)

    assert logits.shape == (B, S, N_CLASSES)
    assert bool(jnp.all(jnp.isfinite(logits)))

    # correctness check against a pure-JAX reference of the same module
    ref_logits, _ = jax.jit(functools.partial(ner_reference, params))(
        word_ids, char_ids)
    max_err = float(jnp.max(jnp.abs(logits - ref_logits)))
    assert max_err < 2e-3, f"mismatch vs reference: {max_err}"

    print("KERNEL_OK")
</pallas_src>

<mosaic_0001>
module attributes {stable_mosaic.version = 11 : i64} {
  func.func @fused_ner_kernel(%arg0: i32, %arg1: memref<16x16x8xf32, #tpu.memory_space<vmem>>, %arg2: memref<8x2x32xf32, #tpu.memory_space<vmem>>, %arg3: memref<8x2x1xf32, #tpu.memory_space<vmem>>, %arg4: memref<24x16xf32, #tpu.memory_space<vmem>>, %arg5: memref<1x16xf32, #tpu.memory_space<vmem>>, %arg6: memref<40x16xf32, #tpu.memory_space<vmem>>, %arg7: memref<1x16xf32, #tpu.memory_space<vmem>>, %arg8: memref<64x128xf32, #tpu.memory_space<vmem>>, %arg9: memref<1x128xf32, #tpu.memory_space<vmem>>, %arg10: memref<16x64xf32, #tpu.memory_space<vmem>>, %arg11: memref<16x64xf32, #tpu.memory_space<vmem>>, %arg12: memref<16x128xf32, #tpu.memory_space<vmem>>, %arg13: memref<16x128xf32, #tpu.memory_space<vmem>>, %arg14: memref<1x128xf32, #tpu.memory_space<vmem>>, %arg15: memref<16x128xf32, #tpu.memory_space<vmem>>, %arg16: memref<8x2x128xf32, #tpu.memory_space<vmem>>, %arg17: memref<8x2x16xf32, #tpu.memory_space<vmem>>, %arg18: memref<8x2x16xf32, #tpu.memory_space<vmem>>) attributes {dimension_semantics = [#tpu.dimension_semantics<arbitrary>], iteration_bounds = array<i64: 1>, scalar_prefetch = 0 : i64, scratch_operands = 3 : i64, tpu.core_type = #tpu.core_type<tc>, window_params = [{pipeline_mode = #tpu.pipeline_mode<synchronous>, transform_indices = @transform_0, window_bounds = array<i64: 16, 16, 8>}, {pipeline_mode = #tpu.pipeline_mode<synchronous>, transform_indices = @transform_1, window_bounds = array<i64: 8, 2, 32>}, {pipeline_mode = #tpu.pipeline_mode<synchronous>, transform_indices = @transform_2, window_bounds = array<i64: 8, 2, 1>}, {pipeline_mode = #tpu.pipeline_mode<synchronous>, transform_indices = @transform_3, window_bounds = array<i64: 24, 16>}, {pipeline_mode = #tpu.pipeline_mode<synchronous>, transform_indices = @transform_4, window_bounds = array<i64: 1, 16>}, {pipeline_mode = #tpu.pipeline_mode<synchronous>, transform_indices = @transform_5, window_bounds = array<i64: 40, 16>}, {pipeline_mode = #tpu.pipeline_mode<synchronous>, transform_indices = @transform_6, window_bounds = array<i64: 1, 16>}, {pipeline_mode = #tpu.pipeline_mode<synchronous>, transform_indices = @transform_7, window_bounds = array<i64: 64, 128>}, {pipeline_mode = #tpu.pipeline_mode<synchronous>, transform_indices = @transform_8, window_bounds = array<i64: 1, 128>}, {pipeline_mode = #tpu.pipeline_mode<synchronous>, transform_indices = @transform_9, window_bounds = array<i64: 16, 64>}, {pipeline_mode = #tpu.pipeline_mode<synchronous>, transform_indices = @transform_10, window_bounds = array<i64: 16, 64>}, {pipeline_mode = #tpu.pipeline_mode<synchronous>, transform_indices = @transform_11, window_bounds = array<i64: 16, 128>}, {pipeline_mode = #tpu.pipeline_mode<synchronous>, transform_indices = @transform_12, window_bounds = array<i64: 16, 128>}, {pipeline_mode = #tpu.pipeline_mode<synchronous>, transform_indices = @transform_13, window_bounds = array<i64: 1, 128>}, {pipeline_mode = #tpu.pipeline_mode<synchronous>, transform_indices = @transform_14, window_bounds = array<i64: 16, 128>}]} {
    %c0 = arith.constant 0 : index
    %c0_0 = arith.constant 0 : index
    %c0_1 = arith.constant 0 : index
    %0 = vector.load %arg1[%c0, %c0_0, %c0_1] : memref<16x16x8xf32, #tpu.memory_space<vmem>>, vector<16x16x8xf32>
    %c0_2 = arith.constant 0 : index
    %c0_3 = arith.constant 0 : index
    %1 = vector.load %arg4[%c0_2, %c0_3] : memref<24x16xf32, #tpu.memory_space<vmem>>, vector<24x16xf32>
    %c0_4 = arith.constant 0 : index
    %c0_5 = arith.constant 0 : index
    %2 = vector.load %arg5[%c0_4, %c0_5] : memref<1x16xf32, #tpu.memory_space<vmem>>, vector<1x16xf32>
    %3 = vector.extract_strided_slice %0 {offsets = [0, 0, 0], sizes = [16, 14, 8], strides = [1, 1, 1]} : vector<16x16x8xf32> to vector<16x14x8xf32>
    %4 = vector.extract_strided_slice %0 {offsets = [0, 1, 0], sizes = [16, 14, 8], strides = [1, 1, 1]} : vector<16x16x8xf32> to vector<16x14x8xf32>
    %5 = vector.extract_strided_slice %0 {offsets = [0, 2, 0], sizes = [16, 14, 8], strides = [1, 1, 1]} : vector<16x16x8xf32> to vector<16x14x8xf32>
    %6 = tpu.concatenate %3, %4, %5 in 2 : vector<16x14x8xf32>, vector<16x14x8xf32>, vector<16x14x8xf32> -> vector<16x14x24xf32>
    %cst = arith.constant dense<0.000000e+00> : vector<16x14x16xf32>
    %7 = tpu.matmul %6, %1, %cst {dimension_numbers = #tpu.dot_dimension_numbers<[2], [0], [0, 1], [1], [0, 0, 0, 1, 1, 1], [], []>} : vector<16x14x24xf32>, vector<24x16xf32>, vector<16x14x16xf32> -> vector<16x14x16xf32>
    %8 = vector.shape_cast %2 : vector<1x16xf32> to vector<1x1x16xf32>
    %9 = vector.broadcast %8 : vector<1x1x16xf32> to vector<16x14x16xf32>
    %10 = arith.addf %7, %9 : vector<16x14x16xf32>
    %cst_6 = arith.constant 0.000000e+00 : f32
    %11 = vector.broadcast %cst_6 : f32 to vector<16x14x16xf32>
    %12 = arith.maximumf %10, %11 : vector<16x14x16xf32>
    %cst_7 = arith.constant dense<0xFF800000> : vector<16x16xf32>
    %13 = vector.multi_reduction <maximumf>, %12, %cst_7 [1] : vector<16x14x16xf32> to vector<16x16xf32>
    %c0_8 = arith.constant 0 : index
    %c0_9 = arith.constant 0 : index
    %14 = vector.load %arg6[%c0_8, %c0_9] : memref<40x16xf32, #tpu.memory_space<vmem>>, vector<40x16xf32>
    %c0_10 = arith.constant 0 : index
    %c0_11 = arith.constant 0 : index
    %15 = vector.load %arg7[%c0_10, %c0_11] : memref<1x16xf32, #tpu.memory_space<vmem>>, vector<1x16xf32>
    %16 = vector.extract_strided_slice %0 {offsets = [0, 0, 0], sizes = [16, 12, 8], strides = [1, 1, 1]} : vector<16x16x8xf32> to vector<16x12x8xf32>
    %17 = vector.extract_strided_slice %0 {offsets = [0, 1, 0], sizes = [16, 12, 8], strides = [1, 1, 1]} : vector<16x16x8xf32> to vector<16x12x8xf32>
    %18 = vector.extract_strided_slice %0 {offsets = [0, 2, 0], sizes = [16, 12, 8], strides = [1, 1, 1]} : vector<16x16x8xf32> to vector<16x12x8xf32>
    %19 = vector.extract_strided_slice %0 {offsets = [0, 3, 0], sizes = [16, 12, 8], strides = [1, 1, 1]} : vector<16x16x8xf32> to vector<16x12x8xf32>
    %20 = vector.extract_strided_slice %0 {offsets = [0, 4, 0], sizes = [16, 12, 8], strides = [1, 1, 1]} : vector<16x16x8xf32> to vector<16x12x8xf32>
    %21 = tpu.concatenate %16, %17, %18, %19, %20 in 2 : vector<16x12x8xf32>, vector<16x12x8xf32>, vector<16x12x8xf32>, vector<16x12x8xf32>, vector<16x12x8xf32> -> vector<16x12x40xf32>
    %cst_12 = arith.constant dense<0.000000e+00> : vector<16x12x16xf32>
    %22 = tpu.matmul %21, %14, %cst_12 {dimension_numbers = #tpu.dot_dimension_numbers<[2], [0], [0, 1], [1], [0, 0, 0, 1, 1, 1], [], []>} : vector<16x12x40xf32>, vector<40x16xf32>, vector<16x12x16xf32> -> vector<16x12x16xf32>
    %23 = vector.shape_cast %15 : vector<1x16xf32> to vector<1x1x16xf32>
    %24 = vector.broadcast %23 : vector<1x1x16xf32> to vector<16x12x16xf32>
    %25 = arith.addf %22, %24 : vector<16x12x16xf32>
    %cst_13 = arith.constant 0.000000e+00 : f32
    %26 = vector.broadcast %cst_13 : f32 to vector<16x12x16xf32>
    %27 = arith.maximumf %25, %26 : vector<16x12x16xf32>
    %cst_14 = arith.constant dense<0xFF800000> : vector<16x16xf32>
    %28 = vector.multi_reduction <maximumf>, %27, %cst_14 [1] : vector<16x12x16xf32> to vector<16x16xf32>
    %c0_15 = arith.constant 0 : index
    %c0_16 = arith.constant 0 : index
    %c0_17 = arith.constant 0 : index
    %29 = vector.load %arg2[%c0_15, %c0_16, %c0_17] : memref<8x2x32xf32, #tpu.memory_space<vmem>>, vector<8x2x32xf32>
    %30 = vector.shape_cast %29 : vector<8x2x32xf32> to vector<16x32xf32>
    %31 = tpu.concatenate %30, %13, %28 in 1 : vector<16x32xf32>, vector<16x16xf32>, vector<16x16xf32> -> vector<16x64xf32>
    %c0_18 = arith.constant 0 : index
    %c0_19 = arith.constant 0 : index
    %32 = vector.load %arg8[%c0_18, %c0_19] : memref<64x128xf32, #tpu.memory_space<vmem>>, vector<64x128xf32>
    %cst_20 = arith.constant dense<0.000000e+00> : vector<16x128xf32>
    %33 = tpu.matmul %31, %32, %cst_20 {dimension_numbers = #tpu.dot_dimension_numbers<[1], [0], [0], [1], [0, 0, 1, 1], [], []>} : vector<16x64xf32>, vector<64x128xf32>, vector<16x128xf32> -> vector<16x128xf32>
    %c0_21 = arith.constant 0 : index
    %c0_22 = arith.constant 0 : index
    %34 = vector.load %arg9[%c0_21, %c0_22] : memref<1x128xf32, #tpu.memory_space<vmem>>, vector<1x128xf32>
    %35 = vector.broadcast %34 : vector<1x128xf32> to vector<16x128xf32>
    %36 = arith.addf %33, %35 : vector<16x128xf32>
    %37 = vector.shape_cast %36 : vector<16x128xf32> to vector<8x2x128xf32>
    %c0_23 = arith.constant 0 : index
    %c0_24 = arith.constant 0 : index
    %c0_25 = arith.constant 0 : index
    %38 = vector.load %arg16[%c0_23, %c0_24, %c0_25] : memref<8x2x128xf32, #tpu.memory_space<vmem>>, vector<8x2x128xf32>
    tpu.vector_store %arg16[%c0_23, %c0_24, %c0_25], %37 {strides = array<i32>} : memref<8x2x128xf32, #tpu.memory_space<vmem>>, vector<8x2x128xf32>,
    %c0_26 = arith.constant 0 : index
    %c0_27 = arith.constant 0 : index
    %c0_28 = arith.constant 0 : index
    %39 = vector.load %arg3[%c0_26, %c0_27, %c0_28] : memref<8x2x1xf32, #tpu.memory_space<vmem>>, vector<8x2x1xf32>
    %c0_29 = arith.constant 0 : index
    %c0_30 = arith.constant 0 : index
    %40 = vector.load %arg10[%c0_29, %c0_30] : memref<16x64xf32, #tpu.memory_space<vmem>>, vector<16x64xf32>
    %c0_31 = arith.constant 0 : index
    %c0_32 = arith.constant 0 : index
    %41 = vector.load %arg11[%c0_31, %c0_32] : memref<16x64xf32, #tpu.memory_space<vmem>>, vector<16x64xf32>
    %cst_33 = arith.constant 0.000000e+00 : f32
    %42 = vector.broadcast %cst_33 : f32 to vector<2x16xf32>
    %cst_34 = arith.constant 0.000000e+00 : f32
    %43 = vector.broadcast %cst_34 : f32 to vector<2x16xf32>
    %cst_35 = arith.constant 0.000000e+00 : f32
    %44 = vector.broadcast %cst_35 : f32 to vector<2x16xf32>
    %cst_36 = arith.constant 0.000000e+00 : f32
    %45 = vector.broadcast %cst_36 : f32 to vector<2x16xf32>
    %c0_37 = arith.constant 0 : index
    %c0_38 = arith.constant 0 : index
    %c0_39 = arith.constant 0 : index
    %46 = vector.load %arg16[%c0_37, %c0_38, %c0_39] : memref<8x2x128xf32, #tpu.memory_space<vmem>>, vector<1x2x128xf32>
    %47 = vector.shape_cast %46 : vector<1x2x128xf32> to vector<2x128xf32>
    %48 = vector.extract_strided_slice %47 {offsets = [0, 0], sizes = [2, 64], strides = [1, 1]} : vector<2x128xf32> to vector<2x64xf32>
    %c7 = arith.constant 7 : index
    %c0_40 = arith.constant 0 : index
    %c0_41 = arith.constant 0 : index
    %49 = vector.load %arg16[%c7, %c0_40, %c0_41] : memref<8x2x128xf32, #tpu.memory_space<vmem>>, vector<1x2x128xf32>
    %50 = vector.shape_cast %49 : vector<1x2x128xf32> to vector<2x128xf32>
    %51 = vector.extract_strided_slice %50 {offsets = [0, 64], sizes = [2, 64], strides = [1, 1]} : vector<2x128xf32> to vector<2x64xf32>
    %52 = vector.extract_strided_slice %39 {offsets = [0, 0, 0], sizes = [1, 2, 1], strides = [1, 1, 1]} : vector<8x2x1xf32> to vector<1x2x1xf32>
    %53 = vector.shape_cast %52 : vector<1x2x1xf32> to vector<2x1xf32>
    %cst_42 = arith.constant dense<0.000000e+00> : vector<2x64xf32>
    %54 = tpu.matmul %42, %40, %cst_42 {dimension_numbers = #tpu.dot_dimension_numbers<[1], [0], [0], [1], [0, 0, 1, 1], [], []>} : vector<2x16xf32>, vector<16x64xf32>, vector<2x64xf32> -> vector<2x64xf32>
    %55 = arith.addf %48, %54 : vector<2x64xf32>
    %56 = vector.extract_strided_slice %55 {offsets = [0, 0], sizes = [2, 16], strides = [1, 1]} : vector<2x64xf32> to vector<2x16xf32>
    %57 = arith.negf %56 : vector<2x16xf32>
    %58 = math.exp %57 : vector<2x16xf32>
    %cst_43 = arith.constant 1.000000e+00 : f32
    %59 = vector.broadcast %cst_43 : f32 to vector<2x16xf32>
    %60 = arith.addf %59, %58 : vector<2x16xf32>
    %61 = arith.divf %59, %60 : vector<2x16xf32>
    %62 = vector.extract_strided_slice %55 {offsets = [0, 16], sizes = [2, 16], strides = [1, 1]} : vector<2x64xf32> to vector<2x16xf32>
    %63 = arith.negf %62 : vector<2x16xf32>
    %64 = math.exp %63 : vector<2x16xf32>
    %cst_44 = arith.constant 1.000000e+00 : f32
    %65 = vector.broadcast %cst_44 : f32 to vector<2x16xf32>
    %66 = arith.addf %65, %64 : vector<2x16xf32>
    %67 = arith.divf %65, %66 : vector<2x16xf32>
    %68 = vector.extract_strided_slice %55 {offsets = [0, 32], sizes = [2, 16], strides = [1, 1]} : vector<2x64xf32> to vector<2x16xf32>
    %69 = math.tanh %68 : vector<2x16xf32>
    %70 = vector.extract_strided_slice %55 {offsets = [0, 48], sizes = [2, 16], strides = [1, 1]} : vector<2x64xf32> to vector<2x16xf32>
    %71 = arith.negf %70 : vector<2x16xf32>
    %72 = math.exp %71 : vector<2x16xf32>
    %cst_45 = arith.constant 1.000000e+00 : f32
    %73 = vector.broadcast %cst_45 : f32 to vector<2x16xf32>
    %74 = arith.addf %73, %72 : vector<2x16xf32>
    %75 = arith.divf %73, %74 : vector<2x16xf32>
    %76 = arith.mulf %67, %43 : vector<2x16xf32>
    %77 = arith.mulf %61, %69 : vector<2x16xf32>
    %78 = arith.addf %76, %77 : vector<2x16xf32>
    %79 = math.tanh %78 : vector<2x16xf32>
    %80 = arith.mulf %75, %79 : vector<2x16xf32>
    %cst_46 = arith.constant 0.000000e+00 : f32
    %81 = vector.broadcast %cst_46 : f32 to vector<2x1xf32>
    %82 = arith.cmpf ogt, %53, %81 : vector<2x1xf32>
    %83 = vector.shape_cast %82 : vector<2x1xi1> to vector<2x1xi1>
    %84 = vector.broadcast %83 : vector<2x1xi1> to vector<2x16xi1>
    %85 = arith.select %84, %80, %42 : vector<2x16xi1>, vector<2x16xf32>
    %86 = vector.shape_cast %82 : vector<2x1xi1> to vector<2x1xi1>
    %87 = vector.broadcast %86 : vector<2x1xi1> to vector<2x16xi1>
    %88 = arith.select %87, %78, %43 : vector<2x16xi1>, vector<2x16xf32>
    %cst_47 = arith.constant 0.000000e+00 : f32
    %89 = vector.shape_cast %82 : vector<2x1xi1> to vector<2x1xi1>
    %90 = vector.broadcast %89 : vector<2x1xi1> to vector<2x16xi1>
    %91 = vector.broadcast %cst_47 : f32 to vector<2x16xf32>
    %92 = arith.select %90, %80, %91 : vector<2x16xi1>, vector<2x16xf32>
    %93 = vector.extract_strided_slice %39 {offsets = [7, 0, 0], sizes = [1, 2, 1], strides = [1, 1, 1]} : vector<8x2x1xf32> to vector<1x2x1xf32>
    %94 = vector.shape_cast %93 : vector<1x2x1xf32> to vector<2x1xf32>
    %cst_48 = arith.constant dense<0.000000e+00> : vector<2x64xf32>
    %95 = tpu.matmul %44, %41, %cst_48 {dimension_numbers = #tpu.dot_dimension_numbers<[1], [0], [0], [1], [0, 0, 1, 1], [], []>} : vector<2x16xf32>, vector<16x64xf32>, vector<2x64xf32> -> vector<2x64xf32>
    %96 = arith.addf %51, %95 : vector<2x64xf32>
    %97 = vector.extract_strided_slice %96 {offsets = [0, 0], sizes = [2, 16], strides = [1, 1]} : vector<2x64xf32> to vector<2x16xf32>
    %98 = arith.negf %97 : vector<2x16xf32>
    %99 = math.exp %98 : vector<2x16xf32>
    %cst_49 = arith.constant 1.000000e+00 : f32
    %100 = vector.broadcast %cst_49 : f32 to vector<2x16xf32>
    %101 = arith.addf %100, %99 : vector<2x16xf32>
    %102 = arith.divf %100, %101 : vector<2x16xf32>
    %103 = vector.extract_strided_slice %96 {offsets = [0, 16], sizes = [2, 16], strides = [1, 1]} : vector<2x64xf32> to vector<2x16xf32>
    %104 = arith.negf %103 : vector<2x16xf32>
    %105 = math.exp %104 : vector<2x16xf32>
    %cst_50 = arith.constant 1.000000e+00 : f32
    %106 = vector.broadcast %cst_50 : f32 to vector<2x16xf32>
    %107 = arith.addf %106, %105 : vector<2x16xf32>
    %108 = arith.divf %106, %107 : vector<2x16xf32>
    %109 = vector.extract_strided_slice %96 {offsets = [0, 32], sizes = [2, 16], strides = [1, 1]} : vector<2x64xf32> to vector<2x16xf32>
    %110 = math.tanh %109 : vector<2x16xf32>
    %111 = vector.extract_strided_slice %96 {offsets = [0, 48], sizes = [2, 16], strides = [1, 1]} : vector<2x64xf32> to vector<2x16xf32>
    %112 = arith.negf %111 : vector<2x16xf32>
    %113 = math.exp %112 : vector<2x16xf32>
    %cst_51 = arith.constant 1.000000e+00 : f32
    %114 = vector.broadcast %cst_51 : f32 to vector<2x16xf32>
    %115 = arith.addf %114, %113 : vector<2x16xf32>
    %116 = arith.divf %114, %115 : vector<2x16xf32>
    %117 = arith.mulf %108, %45 : vector<2x16xf32>
    %118 = arith.mulf %102, %110 : vector<2x16xf32>
    %119 = arith.addf %117, %118 : vector<2x16xf32>
    %120 = math.tanh %119 : vector<2x16xf32>
    %121 = arith.mulf %116, %120 : vector<2x16xf32>
    %cst_52 = arith.constant 0.000000e+00 : f32
    %122 = vector.broadcast %cst_52 : f32 to vector<2x1xf32>
    %123 = arith.cmpf ogt, %94, %122 : vector<2x1xf32>
    %124 = vector.shape_cast %123 : vector<2x1xi1> to vector<2x1xi1>
    %125 = vector.broadcast %124 : vector<2x1xi1> to vector<2x16xi1>
    %126 = arith.select %125, %121, %44 : vector<2x16xi1>, vector<2x16xf32>
    %127 = vector.shape_cast %123 : vector<2x1xi1> to vector<2x1xi1>
    %128 = vector.broadcast %127 : vector<2x1xi1> to vector<2x16xi1>
    %129 = arith.select %128, %119, %45 : vector<2x16xi1>, vector<2x16xf32>
    %cst_53 = arith.constant 0.000000e+00 : f32
    %130 = vector.shape_cast %123 : vector<2x1xi1> to vector<2x1xi1>
    %131 = vector.broadcast %130 : vector<2x1xi1> to vector<2x16xi1>
    %132 = vector.broadcast %cst_53 : f32 to vector<2x16xf32>
    %133 = arith.select %131, %121, %132 : vector<2x16xi1>, vector<2x16xf32>
    %c0_54 = arith.constant 0 : index
    %c0_55 = arith.constant 0 : index
    %c0_56 = arith.constant 0 : index
    %134 = vector.load %arg17[%c0_54, %c0_55, %c0_56] : memref<8x2x16xf32, #tpu.memory_space<vmem>>, vector<1x2x16xf32>
    %135 = vector.shape_cast %134 : vector<1x2x16xf32> to vector<2x16xf32>
    %136 = vector.shape_cast %92 : vector<2x16xf32> to vector<1x2x16xf32>
    tpu.vector_store %arg17[%c0_54, %c0_55, %c0_56], %136 {strides = array<i32>} : memref<8x2x16xf32, #tpu.memory_space<vmem>>, vector<1x2x16xf32>,
    %c7_57 = arith.constant 7 : index
    %c0_58 = arith.constant 0 : index
    %c0_59 = arith.constant 0 : index
    %137 = vector.load %arg18[%c7_57, %c0_58, %c0_59] : memref<8x2x16xf32, #tpu.memory_space<vmem>>, vector<1x2x16xf32>
    %138 = vector.shape_cast %137 : vector<1x2x16xf32> to vector<2x16xf32>
    %139 = vector.shape_cast %133 : vector<2x16xf32> to vector<1x2x16xf32>
    tpu.vector_store %arg18[%c7_57, %c0_58, %c0_59], %139 {strides = array<i32>} : memref<8x2x16xf32, #tpu.memory_space<vmem>>, vector<1x2x16xf32>,
    %c1 = arith.constant 1 : index
    %c0_60 = arith.constant 0 : index
    %c0_61 = arith.constant 0 : index
    %140 = vector.load %arg16[%c1, %c0_60, %c0_61] : memref<8x2x128xf32, #tpu.memory_space<vmem>>, vector<1x2x128xf32>
    %141 = vector.shape_cast %140 : vector<1x2x128xf32> to vector<2x128xf32>
    %142 = vector.extract_strided_slice %141 {offsets = [0, 0], sizes = [2, 64], strides = [1, 1]} : vector<2x128xf32> to vector<2x64xf32>
    %c6 = arith.constant 6 : index
    %c0_62 = arith.constant 0 : index
    %c0_63 = arith.constant 0 : index
    %143 = vector.load %arg16[%c6, %c0_62, %c0_63] : memref<8x2x128xf32, #tpu.memory_space<vmem>>, vector<1x2x128xf32>
    %144 = vector.shape_cast %143 : vector<1x2x128xf32> to vector<2x128xf32>
    %145 = vector.extract_strided_slice %144 {offsets = [0, 64], sizes = [2, 64], strides = [1, 1]} : vector<2x128xf32> to vector<2x64xf32>
    %146 = vector.extract_strided_slice %39 {offsets = [1, 0, 0], sizes = [1, 2, 1], strides = [1, 1, 1]} : vector<8x2x1xf32> to vector<1x2x1xf32>
    %147 = vector.shape_cast %146 : vector<1x2x1xf32> to vector<2x1xf32>
    %cst_64 = arith.constant dense<0.000000e+00> : vector<2x64xf32>
    %148 = tpu.matmul %85, %40, %cst_64 {dimension_numbers = #tpu.dot_dimension_numbers<[1], [0], [0], [1], [0, 0, 1, 1], [], []>} : vector<2x16xf32>, vector<16x64xf32>, vector<2x64xf32> -> vector<2x64xf32>
    %149 = arith.addf %142, %148 : vector<2x64xf32>
    %150 = vector.extract_strided_slice %149 {offsets = [0, 0], sizes = [2, 16], strides = [1, 1]} : vector<2x64xf32> to vector<2x16xf32>
    %151 = arith.negf %150 : vector<2x16xf32>
    %152 = math.exp %151 : vector<2x16xf32>
    %cst_65 = arith.constant 1.000000e+00 : f32
    %153 = vector.broadcast %cst_65 : f32 to vector<2x16xf32>
    %154 = arith.addf %153, %152 : vector<2x16xf32>
    %155 = arith.divf %153, %154 : vector<2x16xf32>
    %156 = vector.extract_strided_slice %149 {offsets = [0, 16], sizes = [2, 16], strides = [1, 1]} : vector<2x64xf32> to vector<2x16xf32>
    %157 = arith.negf %156 : vector<2x16xf32>
    %158 = math.exp %157 : vector<2x16xf32>
    %cst_66 = arith.constant 1.000000e+00 : f32
    %159 = vector.broadcast %cst_66 : f32 to vector<2x16xf32>
    %160 = arith.addf %159, %158 : vector<2x16xf32>
    %161 = arith.divf %159, %160 : vector<2x16xf32>
    %162 = vector.extract_strided_slice %149 {offsets = [0, 32], sizes = [2, 16], strides = [1, 1]} : vector<2x64xf32> to vector<2x16xf32>
    %163 = math.tanh %162 : vector<2x16xf32>
    %164 = vector.extract_strided_slice %149 {offsets = [0, 48], sizes = [2, 16], strides = [1, 1]} : vector<2x64xf32> to vector<2x16xf32>
    %165 = arith.negf %164 : vector<2x16xf32>
    %166 = math.exp %165 : vector<2x16xf32>
    %cst_67 = arith.constant 1.000000e+00 : f32
    %167 = vector.broadcast %cst_67 : f32 to vector<2x16xf32>
    %168 = arith.addf %167, %166 : vector<2x16xf32>
    %169 = arith.divf %167, %168 : vector<2x16xf32>
    %170 = arith.mulf %161, %88 : vector<2x16xf32>
    %171 = arith.mulf %155, %163 : vector<2x16xf32>
    %172 = arith.addf %170, %171 : vector<2x16xf32>
    %173 = math.tanh %172 : vector<2x16xf32>
    %174 = arith.mulf %169, %173 : vector<2x16xf32>
    %cst_68 = arith.constant 0.000000e+00 : f32
    %175 = vector.broadcast %cst_68 : f32 to vector<2x1xf32>
    %176 = arith.cmpf ogt, %147, %175 : vector<2x1xf32>
    %177 = vector.shape_cast %176 : vector<2x1xi1> to vector<2x1xi1>
    %178 = vector.broadcast %177 : vector<2x1xi1> to vector<2x16xi1>
    %179 = arith.select %178, %174, %85 : vector<2x16xi1>, vector<2x16xf32>
    %180 = vector.shape_cast %176 : vector<2x1xi1> to vector<2x1xi1>
    %181 = vector.broadcast %180 : vector<2x1xi1> to vector<2x16xi1>
    %182 = arith.select %181, %172, %88 : vector<2x16xi1>, vector<2x16xf32>
    %cst_69 = arith.constant 0.000000e+00 : f32
    %183 = vector.shape_cast %176 : vector<2x1xi1> to vector<2x1xi1>
    %184 = vector.broadcast %183 : vector<2x1xi1> to vector<2x16xi1>
    %185 = vector.broadcast %cst_69 : f32 to vector<2x16xf32>
    %186 = arith.select %184, %174, %185 : vector<2x16xi1>, vector<2x16xf32>
    %187 = vector.extract_strided_slice %39 {offsets = [6, 0, 0], sizes = [1, 2, 1], strides = [1, 1, 1]} : vector<8x2x1xf32> to vector<1x2x1xf32>
    %188 = vector.shape_cast %187 : vector<1x2x1xf32> to vector<2x1xf32>
    %cst_70 = arith.constant dense<0.000000e+00> : vector<2x64xf32>
    %189 = tpu.matmul %126, %41, %cst_70 {dimension_numbers = #tpu.dot_dimension_numbers<[1], [0], [0], [1], [0, 0, 1, 1], [], []>} : vector<2x16xf32>, vector<16x64xf32>, vector<2x64xf32> -> vector<2x64xf32>
    %190 = arith.addf %145, %189 : vector<2x64xf32>
    %191 = vector.extract_strided_slice %190 {offsets = [0, 0], sizes = [2, 16], strides = [1, 1]} : vector<2x64xf32> to vector<2x16xf32>
    %192 = arith.negf %191 : vector<2x16xf32>
    %193 = math.exp %192 : vector<2x16xf32>
    %cst_71 = arith.constant 1.000000e+00 : f32
    %194 = vector.broadcast %cst_71 : f32 to vector<2x16xf32>
    %195 = arith.addf %194, %193 : vector<2x16xf32>
    %196 = arith.divf %194, %195 : vector<2x16xf32>
    %197 = vector.extract_strided_slice %190 {offsets = [0, 16], sizes = [2, 16], strides = [1, 1]} : vector<2x64xf32> to vector<2x16xf32>
    %198 = arith.negf %197 : vector<2x16xf32>
    %199 = math.exp %198 : vector<2x16xf32>
    %cst_72 = arith.constant 1.000000e+00 : f32
    %200 = vector.broadcast %cst_72 : f32 to vector<2x16xf32>
    %201 = arith.addf %200, %199 : vector<2x16xf32>
    %202 = arith.divf %200, %201 : vector<2x16xf32>
    %203 = vector.extract_strided_slice %190 {offsets = [0, 32], sizes = [2, 16], strides = [1, 1]} : vector<2x64xf32> to vector<2x16xf32>
    %204 = math.tanh %203 : vector<2x16xf32>
    %205 = vector.extract_strided_slice %190 {offsets = [0, 48], sizes = [2, 16], strides = [1, 1]} : vector<2x64xf32> to vector<2x16xf32>
    %206 = arith.negf %205 : vector<2x16xf32>
    %207 = math.exp %206 : vector<2x16xf32>
    %cst_73 = arith.constant 1.000000e+00 : f32
    %208 = vector.broadcast %cst_73 : f32 to vector<2x16xf32>
    %209 = arith.addf %208, %207 : vector<2x16xf32>
    %210 = arith.divf %208, %209 : vector<2x16xf32>
    %211 = arith.mulf %202, %129 : vector<2x16xf32>
    %212 = arith.mulf %196, %204 : vector<2x16xf32>
    %213 = arith.addf %211, %212 : vector<2x16xf32>
    %214 = math.tanh %213 : vector<2x16xf32>
    %215 = arith.mulf %210, %214 : vector<2x16xf32>
    %cst_74 = arith.constant 0.000000e+00 : f32
    %216 = vector.broadcast %cst_74 : f32 to vector<2x1xf32>
    %217 = arith.cmpf ogt, %188, %216 : vector<2x1xf32>
    %218 = vector.shape_cast %217 : vector<2x1xi1> to vector<2x1xi1>
    %219 = vector.broadcast %218 : vector<2x1xi1> to vector<2x16xi1>
    %220 = arith.select %219, %215, %126 : vector<2x16xi1>, vector<2x16xf32>
    %221 = vector.shape_cast %217 : vector<2x1xi1> to vector<2x1xi1>
    %222 = vector.broadcast %221 : vector<2x1xi1> to vector<2x16xi1>
    %223 = arith.select %222, %213, %129 : vector<2x16xi1>, vector<2x16xf32>
    %cst_75 = arith.constant 0.000000e+00 : f32
    %224 = vector.shape_cast %217 : vector<2x1xi1> to vector<2x1xi1>
    %225 = vector.broadcast %224 : vector<2x1xi1> to vector<2x16xi1>
    %226 = vector.broadcast %cst_75 : f32 to vector<2x16xf32>
    %227 = arith.select %225, %215, %226 : vector<2x16xi1>, vector<2x16xf32>
    %c1_76 = arith.constant 1 : index
    %c0_77 = arith.constant 0 : index
    %c0_78 = arith.constant 0 : index
    %228 = vector.load %arg17[%c1_76, %c0_77, %c0_78] : memref<8x2x16xf32, #tpu.memory_space<vmem>>, vector<1x2x16xf32>
    %229 = vector.shape_cast %228 : vector<1x2x16xf32> to vector<2x16xf32>
    %230 = vector.shape_cast %186 : vector<2x16xf32> to vector<1x2x16xf32>
    tpu.vector_store %arg17[%c1_76, %c0_77, %c0_78], %230 {strides = array<i32>} : memref<8x2x16xf32, #tpu.memory_space<vmem>>, vector<1x2x16xf32>,
    %c6_79 = arith.constant 6 : index
    %c0_80 = arith.constant 0 : index
    %c0_81 = arith.constant 0 : index
    %231 = vector.load %arg18[%c6_79, %c0_80, %c0_81] : memref<8x2x16xf32, #tpu.memory_space<vmem>>, vector<1x2x16xf32>
    %232 = vector.shape_cast %231 : vector<1x2x16xf32> to vector<2x16xf32>
    %233 = vector.shape_cast %227 : vector<2x16xf32> to vector<1x2x16xf32>
    tpu.vector_store %arg18[%c6_79, %c0_80, %c0_81], %233 {strides = array<i32>} : memref<8x2x16xf32, #tpu.memory_space<vmem>>, vector<1x2x16xf32>,
    %c2 = arith.constant 2 : index
    %c0_82 = arith.constant 0 : index
    %c0_83 = arith.constant 0 : index
    %234 = vector.load %arg16[%c2, %c0_82, %c0_83] : memref<8x2x128xf32, #tpu.memory_space<vmem>>, vector<1x2x128xf32>
    %235 = vector.shape_cast %234 : vector<1x2x128xf32> to vector<2x128xf32>
    %236 = vector.extract_strided_slice %235 {offsets = [0, 0], sizes = [2, 64], strides = [1, 1]} : vector<2x128xf32> to vector<2x64xf32>
    %c5 = arith.constant 5 : index
    %c0_84 = arith.constant 0 : index
    %c0_85 = arith.constant 0 : index
    %237 = vector.load %arg16[%c5, %c0_84, %c0_85] : memref<8x2x128xf32, #tpu.memory_space<vmem>>, vector<1x2x128xf32>
    %238 = vector.shape_cast %237 : vector<1x2x128xf32> to vector<2x128xf32>
    %239 = vector.extract_strided_slice %238 {offsets = [0, 64], sizes = [2, 64], strides = [1, 1]} : vector<2x128xf32> to vector<2x64xf32>
    %240 = vector.extract_strided_slice %39 {offsets = [2, 0, 0], sizes = [1, 2, 1], strides = [1, 1, 1]} : vector<8x2x1xf32> to vector<1x2x1xf32>
    %241 = vector.shape_cast %240 : vector<1x2x1xf32> to vector<2x1xf32>
    %cst_86 = arith.constant dense<0.000000e+00> : vector<2x64xf32>
    %242 = tpu.matmul %179, %40, %cst_86 {dimension_numbers = #tpu.dot_dimension_numbers<[1], [0], [0], [1], [0, 0, 1, 1], [], []>} : vector<2x16xf32>, vector<16x64xf32>, vector<2x64xf32> -> vector<2x64xf32>
    %243 = arith.addf %236, %242 : vector<2x64xf32>
    %244 = vector.extract_strided_slice %243 {offsets = [0, 0], sizes = [2, 16], strides = [1, 1]} : vector<2x64xf32> to vector<2x16xf32>
    %245 = arith.negf %244 : vector<2x16xf32>
    %246 = math.exp %245 : vector<2x16xf32>
    %cst_87 = arith.constant 1.000000e+00 : f32
    %247 = vector.broadcast %cst_87 : f32 to vector<2x16xf32>
    %248 = arith.addf %247, %246 : vector<2x16xf32>
    %249 = arith.divf %247, %248 : vector<2x16xf32>
    %250 = vector.extract_strided_slice %243 {offsets = [0, 16], sizes = [2, 16], strides = [1, 1]} : vector<2x64xf32> to vector<2x16xf32>
    %251 = arith.negf %250 : vector<2x16xf32>
    %252 = math.exp %251 : vector<2x16xf32>
    %cst_88 = arith.constant 1.000000e+00 : f32
    %253 = vector.broadcast %cst_88 : f32 to vector<2x16xf32>
    %254 = arith.addf %253, %252 : vector<2x16xf32>
    %255 = arith.divf %253, %254 : vector<2x16xf32>
    %256 = vector.extract_strided_slice %243 {offsets = [0, 32], sizes = [2, 16], strides = [1, 1]} : vector<2x64xf32> to vector<2x16xf32>
    %257 = math.tanh %256 : vector<2x16xf32>
    %258 = vector.extract_strided_slice %243 {offsets = [0, 48], sizes = [2, 16], strides = [1, 1]} : vector<2x64xf32> to vector<2x16xf32>
    %259 = arith.negf %258 : vector<2x16xf32>
    %260 = math.exp %259 : vector<2x16xf32>
    %cst_89 = arith.constant 1.000000e+00 : f32
    %261 = vector.broadcast %cst_89 : f32 to vector<2x16xf32>
    %262 = arith.addf %261, %260 : vector<2x16xf32>
    %263 = arith.divf %261, %262 : vector<2x16xf32>
    %264 = arith.mulf %255, %182 : vector<2x16xf32>
    %265 = arith.mulf %249, %257 : vector<2x16xf32>
    %266 = arith.addf %264, %265 : vector<2x16xf32>
    %267 = math.tanh %266 : vector<2x16xf32>
    %268 = arith.mulf %263, %267 : vector<2x16xf32>
    %cst_90 = arith.constant 0.000000e+00 : f32
    %269 = vector.broadcast %cst_90 : f32 to vector<2x1xf32>
    %270 = arith.cmpf ogt, %241, %269 : vector<2x1xf32>
    %271 = vector.shape_cast %270 : vector<2x1xi1> to vector<2x1xi1>
    %272 = vector.broadcast %271 : vector<2x1xi1> to vector<2x16xi1>
    %273 = arith.select %272, %268, %179 : vector<2x16xi1>, vector<2x16xf32>
    %274 = vector.shape_cast %270 : vector<2x1xi1> to vector<2x1xi1>
    %275 = vector.broadcast %274 : vector<2x1xi1> to vector<2x16xi1>
    %276 = arith.select %275, %266, %182 : vector<2x16xi1>, vector<2x16xf32>
    %cst_91 = arith.constant 0.000000e+00 : f32
    %277 = vector.shape_cast %270 : vector<2x1xi1> to vector<2x1xi1>
    %278 = vector.broadcast %277 : vector<2x1xi1> to vector<2x16xi1>
    %279 = vector.broadcast %cst_91 : f32 to vector<2x16xf32>
    %280 = arith.select %278, %268, %279 : vector<2x16xi1>, vector<2x16xf32>
    %281 = vector.extract_strided_slice %39 {offsets = [5, 0, 0], sizes = [1, 2, 1], strides = [1, 1, 1]} : vector<8x2x1xf32> to vector<1x2x1xf32>
    %282 = vector.shape_cast %281 : vector<1x2x1xf32> to vector<2x1xf32>
    %cst_92 = arith.constant dense<0.000000e+00> : vector<2x64xf32>
    %283 = tpu.matmul %220, %41, %cst_92 {dimension_numbers = #tpu.dot_dimension_numbers<[1], [0], [0], [1], [0, 0, 1, 1], [], []>} : vector<2x16xf32>, vector<16x64xf32>, vector<2x64xf32> -> vector<2x64xf32>
    %284 = arith.addf %239, %283 : vector<2x64xf32>
    %285 = vector.extract_strided_slice %284 {offsets = [0, 0], sizes = [2, 16], strides = [1, 1]} : vector<2x64xf32> to vector<2x16xf32>
    %286 = arith.negf %285 : vector<2x16xf32>
    %287 = math.exp %286 : vector<2x16xf32>
    %cst_93 = arith.constant 1.000000e+00 : f32
    %288 = vector.broadcast %cst_93 : f32 to vector<2x16xf32>
    %289 = arith.addf %288, %287 : vector<2x16xf32>
    %290 = arith.divf %288, %289 : vector<2x16xf32>
    %291 = vector.extract_strided_slice %284 {offsets = [0, 16], sizes = [2, 16], strides = [1, 1]} : vector<2x64xf32> to vector<2x16xf32>
    %292 = arith.negf %291 : vector<2x16xf32>
    %293 = math.exp %292 : vector<2x16xf32>
    %cst_94 = arith.constant 1.000000e+00 : f32
    %294 = vector.broadcast %cst_94 : f32 to vector<2x16xf32>
    %295 = arith.addf %294, %293 : vector<2x16xf32>
    %296 = arith.divf %294, %295 : vector<2x16xf32>
    %297 = vector.extract_strided_slice %284 {offsets = [0, 32], sizes = [2, 16], strides = [1, 1]} : vector<2x64xf32> to vector<2x16xf32>
    %298 = math.tanh %297 : vector<2x16xf32>
    %299 = vector.extract_strided_slice %284 {offsets = [0, 48], sizes = [2, 16], strides = [1, 1]} : vector<2x64xf32> to vector<2x16xf32>
    %300 = arith.negf %299 : vector<2x16xf32>
    %301 = math.exp %300 : vector<2x16xf32>
    %cst_95 = arith.constant 1.000000e+00 : f32
    %302 = vector.broadcast %cst_95 : f32 to vector<2x16xf32>
    %303 = arith.addf %302, %301 : vector<2x16xf32>
    %304 = arith.divf %302, %303 : vector<2x16xf32>
    %305 = arith.mulf %296, %223 : vector<2x16xf32>
    %306 = arith.mulf %290, %298 : vector<2x16xf32>
    %307 = arith.addf %305, %306 : vector<2x16xf32>
    %308 = math.tanh %307 : vector<2x16xf32>
    %309 = arith.mulf %304, %308 : vector<2x16xf32>
    %cst_96 = arith.constant 0.000000e+00 : f32
    %310 = vector.broadcast %cst_96 : f32 to vector<2x1xf32>
    %311 = arith.cmpf ogt, %282, %310 : vector<2x1xf32>
    %312 = vector.shape_cast %311 : vector<2x1xi1> to vector<2x1xi1>
    %313 = vector.broadcast %312 : vector<2x1xi1> to vector<2x16xi1>
    %314 = arith.select %313, %309, %220 : vector<2x16xi1>, vector<2x16xf32>
    %315 = vector.shape_cast %311 : vector<2x1xi1> to vector<2x1xi1>
    %316 = vector.broadcast %315 : vector<2x1xi1> to vector<2x16xi1>
    %317 = arith.select %316, %307, %223 : vector<2x16xi1>, vector<2x16xf32>
    %cst_97 = arith.constant 0.000000e+00 : f32
    %318 = vector.shape_cast %311 : vector<2x1xi1> to vector<2x1xi1>
    %319 = vector.broadcast %318 : vector<2x1xi1> to vector<2x16xi1>
    %320 = vector.broadcast %cst_97 : f32 to vector<2x16xf32>
    %321 = arith.select %319, %309, %320 : vector<2x16xi1>, vector<2x16xf32>
    %c2_98 = arith.constant 2 : index
    %c0_99 = arith.constant 0 : index
    %c0_100 = arith.constant 0 : index
    %322 = vector.load %arg17[%c2_98, %c0_99, %c0_100] : memref<8x2x16xf32, #tpu.memory_space<vmem>>, vector<1x2x16xf32>
    %323 = vector.shape_cast %322 : vector<1x2x16xf32> to vector<2x16xf32>
    %324 = vector.shape_cast %280 : vector<2x16xf32> to vector<1x2x16xf32>
    tpu.vector_store %arg17[%c2_98, %c0_99, %c0_100], %324 {strides = array<i32>} : memref<8x2x16xf32, #tpu.memory_space<vmem>>, vector<1x2x16xf32>,
    %c5_101 = arith.constant 5 : index
    %c0_102 = arith.constant 0 : index
    %c0_103 = arith.constant 0 : index
    %325 = vector.load %arg18[%c5_101, %c0_102, %c0_103] : memref<8x2x16xf32, #tpu.memory_space<vmem>>, vector<1x2x16xf32>
    %326 = vector.shape_cast %325 : vector<1x2x16xf32> to vector<2x16xf32>
    %327 = vector.shape_cast %321 : vector<2x16xf32> to vector<1x2x16xf32>
    tpu.vector_store %arg18[%c5_101, %c0_102, %c0_103], %327 {strides = array<i32>} : memref<8x2x16xf32, #tpu.memory_space<vmem>>, vector<1x2x16xf32>,
    %c3 = arith.constant 3 : index
    %c0_104 = arith.constant 0 : index
    %c0_105 = arith.constant 0 : index
    %328 = vector.load %arg16[%c3, %c0_104, %c0_105] : memref<8x2x128xf32, #tpu.memory_space<vmem>>, vector<1x2x128xf32>
    %329 = vector.shape_cast %328 : vector<1x2x128xf32> to vector<2x128xf32>
    %330 = vector.extract_strided_slice %329 {offsets = [0, 0], sizes = [2, 64], strides = [1, 1]} : vector<2x128xf32> to vector<2x64xf32>
    %c4 = arith.constant 4 : index
    %c0_106 = arith.constant 0 : index
    %c0_107 = arith.constant 0 : index
    %331 = vector.load %arg16[%c4, %c0_106, %c0_107] : memref<8x2x128xf32, #tpu.memory_space<vmem>>, vector<1x2x128xf32>
    %332 = vector.shape_cast %331 : vector<1x2x128xf32> to vector<2x128xf32>
    %333 = vector.extract_strided_slice %332 {offsets = [0, 64], sizes = [2, 64], strides = [1, 1]} : vector<2x128xf32> to vector<2x64xf32>
    %334 = vector.extract_strided_slice %39 {offsets = [3, 0, 0], sizes = [1, 2, 1], strides = [1, 1, 1]} : vector<8x2x1xf32> to vector<1x2x1xf32>
    %335 = vector.shape_cast %334 : vector<1x2x1xf32> to vector<2x1xf32>
    %cst_108 = arith.constant dense<0.000000e+00> : vector<2x64xf32>
    %336 = tpu.matmul %273, %40, %cst_108 {dimension_numbers = #tpu.dot_dimension_numbers<[1], [0], [0], [1], [0, 0, 1, 1], [], []>} : vector<2x16xf32>, vector<16x64xf32>, vector<2x64xf32> -> vector<2x64xf32>
    %337 = arith.addf %330, %336 : vector<2x64xf32>
    %338 = vector.extract_strided_slice %337 {offsets = [0, 0], sizes = [2, 16], strides = [1, 1]} : vector<2x64xf32> to vector<2x16xf32>
    %339 = arith.negf %338 : vector<2x16xf32>
    %340 = math.exp %339 : vector<2x16xf32>
    %cst_109 = arith.constant 1.000000e+00 : f32
    %341 = vector.broadcast %cst_109 : f32 to vector<2x16xf32>
    %342 = arith.addf %341, %340 : vector<2x16xf32>
    %343 = arith.divf %341, %342 : vector<2x16xf32>
    %344 = vector.extract_strided_slice %337 {offsets = [0, 16], sizes = [2, 16], strides = [1, 1]} : vector<2x64xf32> to vector<2x16xf32>
    %345 = arith.negf %344 : vector<2x16xf32>
    %346 = math.exp %345 : vector<2x16xf32>
    %cst_110 = arith.constant 1.000000e+00 : f32
    %347 = vector.broadcast %cst_110 : f32 to vector<2x16xf32>
    %348 = arith.addf %347, %346 : vector<2x16xf32>
    %349 = arith.divf %347, %348 : vector<2x16xf32>
    %350 = vector.extract_strided_slice %337 {offsets = [0, 32], sizes = [2, 16], strides = [1, 1]} : vector<2x64xf32> to vector<2x16xf32>
    %351 = math.tanh %350 : vector<2x16xf32>
    %352 = vector.extract_strided_slice %337 {offsets = [0, 48], sizes = [2, 16], strides = [1, 1]} : vector<2x64xf32> to vector<2x16xf32>
    %353 = arith.negf %352 : vector<2x16xf32>
    %354 = math.exp %353 : vector<2x16xf32>
    %cst_111 = arith.constant 1.000000e+00 : f32
    %355 = vector.broadcast %cst_111 : f32 to vector<2x16xf32>
    %356 = arith.addf %355, %354 : vector<2x16xf32>
    %357 = arith.divf %355, %356 : vector<2x16xf32>
    %358 = arith.mulf %349, %276 : vector<2x16xf32>
    %359 = arith.mulf %343, %351 : vector<2x16xf32>
    %360 = arith.addf %358, %359 : vector<2x16xf32>
    %361 = math.tanh %360 : vector<2x16xf32>
    %362 = arith.mulf %357, %361 : vector<2x16xf32>
    %cst_112 = arith.constant 0.000000e+00 : f32
    %363 = vector.broadcast %cst_112 : f32 to vector<2x1xf32>
    %364 = arith.cmpf ogt, %335, %363 : vector<2x1xf32>
    %365 = vector.shape_cast %364 : vector<2x1xi1> to vector<2x1xi1>
    %366 = vector.broadcast %365 : vector<2x1xi1> to vector<2x16xi1>
    %367 = arith.select %366, %362, %273 : vector<2x16xi1>, vector<2x16xf32>
    %368 = vector.shape_cast %364 : vector<2x1xi1> to vector<2x1xi1>
    %369 = vector.broadcast %368 : vector<2x1xi1> to vector<2x16xi1>
    %370 = arith.select %369, %360, %276 : vector<2x16xi1>, vector<2x16xf32>
    %cst_113 = arith.constant 0.000000e+00 : f32
    %371 = vector.shape_cast %364 : vector<2x1xi1> to vector<2x1xi1>
    %372 = vector.broadcast %371 : vector<2x1xi1> to vector<2x16xi1>
    %373 = vector.broadcast %cst_113 : f32 to vector<2x16xf32>
    %374 = arith.select %372, %362, %373 : vector<2x16xi1>, vector<2x16xf32>
    %375 = vector.extract_strided_slice %39 {offsets = [4, 0, 0], sizes = [1, 2, 1], strides = [1, 1, 1]} : vector<8x2x1xf32> to vector<1x2x1xf32>
    %376 = vector.shape_cast %375 : vector<1x2x1xf32> to vector<2x1xf32>
    %cst_114 = arith.constant dense<0.000000e+00> : vector<2x64xf32>
    %377 = tpu.matmul %314, %41, %cst_114 {dimension_numbers = #tpu.dot_dimension_numbers<[1], [0], [0], [1], [0, 0, 1, 1], [], []>} : vector<2x16xf32>, vector<16x64xf32>, vector<2x64xf32> -> vector<2x64xf32>
    %378 = arith.addf %333, %377 : vector<2x64xf32>
    %379 = vector.extract_strided_slice %378 {offsets = [0, 0], sizes = [2, 16], strides = [1, 1]} : vector<2x64xf32> to vector<2x16xf32>
    %380 = arith.negf %379 : vector<2x16xf32>
    %381 = math.exp %380 : vector<2x16xf32>
    %cst_115 = arith.constant 1.000000e+00 : f32
    %382 = vector.broadcast %cst_115 : f32 to vector<2x16xf32>
    %383 = arith.addf %382, %381 : vector<2x16xf32>
    %384 = arith.divf %382, %383 : vector<2x16xf32>
    %385 = vector.extract_strided_slice %378 {offsets = [0, 16], sizes = [2, 16], strides = [1, 1]} : vector<2x64xf32> to vector<2x16xf32>
    %386 = arith.negf %385 : vector<2x16xf32>
    %387 = math.exp %386 : vector<2x16xf32>
    %cst_116 = arith.constant 1.000000e+00 : f32
    %388 = vector.broadcast %cst_116 : f32 to vector<2x16xf32>
    %389 = arith.addf %388, %387 : vector<2x16xf32>
    %390 = arith.divf %388, %389 : vector<2x16xf32>
    %391 = vector.extract_strided_slice %378 {offsets = [0, 32], sizes = [2, 16], strides = [1, 1]} : vector<2x64xf32> to vector<2x16xf32>
    %392 = math.tanh %391 : vector<2x16xf32>
    %393 = vector.extract_strided_slice %378 {offsets = [0, 48], sizes = [2, 16], strides = [1, 1]} : vector<2x64xf32> to vector<2x16xf32>
    %394 = arith.negf %393 : vector<2x16xf32>
    %395 = math.exp %394 : vector<2x16xf32>
    %cst_117 = arith.constant 1.000000e+00 : f32
    %396 = vector.broadcast %cst_117 : f32 to vector<2x16xf32>
    %397 = arith.addf %396, %395 : vector<2x16xf32>
    %398 = arith.divf %396, %397 : vector<2x16xf32>
    %399 = arith.mulf %390, %317 : vector<2x16xf32>
    %400 = arith.mulf %384, %392 : vector<2x16xf32>
    %401 = arith.addf %399, %400 : vector<2x16xf32>
    %402 = math.tanh %401 : vector<2x16xf32>
    %403 = arith.mulf %398, %402 : vector<2x16xf32>
    %cst_118 = arith.constant 0.000000e+00 : f32
    %404 = vector.broadcast %cst_118 : f32 to vector<2x1xf32>
    %405 = arith.cmpf ogt, %376, %404 : vector<2x1xf32>
    %406 = vector.shape_cast %405 : vector<2x1xi1> to vector<2x1xi1>
    %407 = vector.broadcast %406 : vector<2x1xi1> to vector<2x16xi1>
    %408 = arith.select %407, %403, %314 : vector<2x16xi1>, vector<2x16xf32>
    %409 = vector.shape_cast %405 : vector<2x1xi1> to vector<2x1xi1>
    %410 = vector.broadcast %409 : vector<2x1xi1> to vector<2x16xi1>
    %411 = arith.select %410, %401, %317 : vector<2x16xi1>, vector<2x16xf32>
    %cst_119 = arith.constant 0.000000e+00 : f32
    %412 = vector.shape_cast %405 : vector<2x1xi1> to vector<2x1xi1>
    %413 = vector.broadcast %412 : vector<2x1xi1> to vector<2x16xi1>
    %414 = vector.broadcast %cst_119 : f32 to vector<2x16xf32>
    %415 = arith.select %413, %403, %414 : vector<2x16xi1>, vector<2x16xf32>
    %c3_120 = arith.constant 3 : index
    %c0_121 = arith.constant 0 : index
    %c0_122 = arith.constant 0 : index
    %416 = vector.load %arg17[%c3_120, %c0_121, %c0_122] : memref<8x2x16xf32, #tpu.memory_space<vmem>>, vector<1x2x16xf32>
    %417 = vector.shape_cast %416 : vector<1x2x16xf32> to vector<2x16xf32>
    %418 = vector.shape_cast %374 : vector<2x16xf32> to vector<1x2x16xf32>
    tpu.vector_store %arg17[%c3_120, %c0_121, %c0_122], %418 {strides = array<i32>} : memref<8x2x16xf32, #tpu.memory_space<vmem>>, vector<1x2x16xf32>,
    %c4_123 = arith.constant 4 : index
    %c0_124 = arith.constant 0 : index
    %c0_125 = arith.constant 0 : index
    %419 = vector.load %arg18[%c4_123, %c0_124, %c0_125] : memref<8x2x16xf32, #tpu.memory_space<vmem>>, vector<1x2x16xf32>
    %420 = vector.shape_cast %419 : vector<1x2x16xf32> to vector<2x16xf32>
    %421 = vector.shape_cast %415 : vector<2x16xf32> to vector<1x2x16xf32>
    tpu.vector_store %arg18[%c4_123, %c0_124, %c0_125], %421 {strides = array<i32>} : memref<8x2x16xf32, #tpu.memory_space<vmem>>, vector<1x2x16xf32>,
    %c4_126 = arith.constant 4 : index
    %c0_127 = arith.constant 0 : index
    %c0_128 = arith.constant 0 : index
    %422 = vector.load %arg16[%c4_126, %c0_127, %c0_128] : memref<8x2x128xf32, #tpu.memory_space<vmem>>, vector<1x2x128xf32>
    %423 = vector.shape_cast %422 : vector<1x2x128xf32> to vector<2x128xf32>
    %424 = vector.extract_strided_slice %423 {offsets = [0, 0], sizes = [2, 64], strides = [1, 1]} : vector<2x128xf32> to vector<2x64xf32>
    %c3_129 = arith.constant 3 : index
    %c0_130 = arith.constant 0 : index
    %c0_131 = arith.constant 0 : index
    %425 = vector.load %arg16[%c3_129, %c0_130, %c0_131] : memref<8x2x128xf32, #tpu.memory_space<vmem>>, vector<1x2x128xf32>
    %426 = vector.shape_cast %425 : vector<1x2x128xf32> to vector<2x128xf32>
    %427 = vector.extract_strided_slice %426 {offsets = [0, 64], sizes = [2, 64], strides = [1, 1]} : vector<2x128xf32> to vector<2x64xf32>
    %428 = vector.extract_strided_slice %39 {offsets = [4, 0, 0], sizes = [1, 2, 1], strides = [1, 1, 1]} : vector<8x2x1xf32> to vector<1x2x1xf32>
    %429 = vector.shape_cast %428 : vector<1x2x1xf32> to vector<2x1xf32>
    %cst_132 = arith.constant dense<0.000000e+00> : vector<2x64xf32>
    %430 = tpu.matmul %367, %40, %cst_132 {dimension_numbers = #tpu.dot_dimension_numbers<[1], [0], [0], [1], [0, 0, 1, 1], [], []>} : vector<2x16xf32>, vector<16x64xf32>, vector<2x64xf32> -> vector<2x64xf32>
    %431 = arith.addf %424, %430 : vector<2x64xf32>
    %432 = vector.extract_strided_slice %431 {offsets = [0, 0], sizes = [2, 16], strides = [1, 1]} : vector<2x64xf32> to vector<2x16xf32>
    %433 = arith.negf %432 : vector<2x16xf32>
    %434 = math.exp %433 : vector<2x16xf32>
    %cst_133 = arith.constant 1.000000e+00 : f32
    %435 = vector.broadcast %cst_133 : f32 to vector<2x16xf32>
    %436 = arith.addf %435, %434 : vector<2x16xf32>
    %437 = arith.divf %435, %436 : vector<2x16xf32>
    %438 = vector.extract_strided_slice %431 {offsets = [0, 16], sizes = [2, 16], strides = [1, 1]} : vector<2x64xf32> to vector<2x16xf32>
    %439 = arith.negf %438 : vector<2x16xf32>
    %440 = math.exp %439 : vector<2x16xf32>
    %cst_134 = arith.constant 1.000000e+00 : f32
    %441 = vector.broadcast %cst_134 : f32 to vector<2x16xf32>
    %442 = arith.addf %441, %440 : vector<2x16xf32>
    %443 = arith.divf %441, %442 : vector<2x16xf32>
    %444 = vector.extract_strided_slice %431 {offsets = [0, 32], sizes = [2, 16], strides = [1, 1]} : vector<2x64xf32> to vector<2x16xf32>
    %445 = math.tanh %444 : vector<2x16xf32>
    %446 = vector.extract_strided_slice %431 {offsets = [0, 48], sizes = [2, 16], strides = [1, 1]} : vector<2x64xf32> to vector<2x16xf32>
    %447 = arith.negf %446 : vector<2x16xf32>
    %448 = math.exp %447 : vector<2x16xf32>
    %cst_135 = arith.constant 1.000000e+00 : f32
    %449 = vector.broadcast %cst_135 : f32 to vector<2x16xf32>
    %450 = arith.addf %449, %448 : vector<2x16xf32>
    %451 = arith.divf %449, %450 : vector<2x16xf32>
    %452 = arith.mulf %443, %370 : vector<2x16xf32>
    %453 = arith.mulf %437, %445 : vector<2x16xf32>
    %454 = arith.addf %452, %453 : vector<2x16xf32>
    %455 = math.tanh %454 : vector<2x16xf32>
    %456 = arith.mulf %451, %455 : vector<2x16xf32>
    %cst_136 = arith.constant 0.000000e+00 : f32
    %457 = vector.broadcast %cst_136 : f32 to vector<2x1xf32>
    %458 = arith.cmpf ogt, %429, %457 : vector<2x1xf32>
    %459 = vector.shape_cast %458 : vector<2x1xi1> to vector<2x1xi1>
    %460 = vector.broadcast %459 : vector<2x1xi1> to vector<2x16xi1>
    %461 = arith.select %460, %456, %367 : vector<2x16xi1>, vector<2x16xf32>
    %462 = vector.shape_cast %458 : vector<2x1xi1> to vector<2x1xi1>
    %463 = vector.broadcast %462 : vector<2x1xi1> to vector<2x16xi1>
    %464 = arith.select %463, %454, %370 : vector<2x16xi1>, vector<2x16xf32>
    %cst_137 = arith.constant 0.000000e+00 : f32
    %465 = vector.shape_cast %458 : vector<2x1xi1> to vector<2x1xi1>
    %466 = vector.broadcast %465 : vector<2x1xi1> to vector<2x16xi1>
    %467 = vector.broadcast %cst_137 : f32 to vector<2x16xf32>
    %468 = arith.select %466, %456, %467 : vector<2x16xi1>, vector<2x16xf32>
    %469 = vector.extract_strided_slice %39 {offsets = [3, 0, 0], sizes = [1, 2, 1], strides = [1, 1, 1]} : vector<8x2x1xf32> to vector<1x2x1xf32>
    %470 = vector.shape_cast %469 : vector<1x2x1xf32> to vector<2x1xf32>
    %cst_138 = arith.constant dense<0.000000e+00> : vector<2x64xf32>
    %471 = tpu.matmul %408, %41, %cst_138 {dimension_numbers = #tpu.dot_dimension_numbers<[1], [0], [0], [1], [0, 0, 1, 1], [], []>} : vector<2x16xf32>, vector<16x64xf32>, vector<2x64xf32> -> vector<2x64xf32>
    %472 = arith.addf %427, %471 : vector<2x64xf32>
    %473 = vector.extract_strided_slice %472 {offsets = [0, 0], sizes = [2, 16], strides = [1, 1]} : vector<2x64xf32> to vector<2x16xf32>
    %474 = arith.negf %473 : vector<2x16xf32>
    %475 = math.exp %474 : vector<2x16xf32>
    %cst_139 = arith.constant 1.000000e+00 : f32
    %476 = vector.broadcast %cst_139 : f32 to vector<2x16xf32>
    %477 = arith.addf %476, %475 : vector<2x16xf32>
    %478 = arith.divf %476, %477 : vector<2x16xf32>
    %479 = vector.extract_strided_slice %472 {offsets = [0, 16], sizes = [2, 16], strides = [1, 1]} : vector<2x64xf32> to vector<2x16xf32>
    %480 = arith.negf %479 : vector<2x16xf32>
    %481 = math.exp %480 : vector<2x16xf32>
    %cst_140 = arith.constant 1.000000e+00 : f32
    %482 = vector.broadcast %cst_140 : f32 to vector<2x16xf32>
    %483 = arith.addf %482, %481 : vector<2x16xf32>
    %484 = arith.divf %482, %483 : vector<2x16xf32>
    %485 = vector.extract_strided_slice %472 {offsets = [0, 32], sizes = [2, 16], strides = [1, 1]} : vector<2x64xf32> to vector<2x16xf32>
    %486 = math.tanh %485 : vector<2x16xf32>
    %487 = vector.extract_strided_slice %472 {offsets = [0, 48], sizes = [2, 16], strides = [1, 1]} : vector<2x64xf32> to vector<2x16xf32>
    %488 = arith.negf %487 : vector<2x16xf32>
    %489 = math.exp %488 : vector<2x16xf32>
    %cst_141 = arith.constant 1.000000e+00 : f32
    %490 = vector.broadcast %cst_141 : f32 to vector<2x16xf32>
    %491 = arith.addf %490, %489 : vector<2x16xf32>
    %492 = arith.divf %490, %491 : vector<2x16xf32>
    %493 = arith.mulf %484, %411 : vector<2x16xf32>
    %494 = arith.mulf %478, %486 : vector<2x16xf32>
    %495 = arith.addf %493, %494 : vector<2x16xf32>
    %496 = math.tanh %495 : vector<2x16xf32>
    %497 = arith.mulf %492, %496 : vector<2x16xf32>
    %cst_142 = arith.constant 0.000000e+00 : f32
    %498 = vector.broadcast %cst_142 : f32 to vector<2x1xf32>
    %499 = arith.cmpf ogt, %470, %498 : vector<2x1xf32>
    %500 = vector.shape_cast %499 : vector<2x1xi1> to vector<2x1xi1>
    %501 = vector.broadcast %500 : vector<2x1xi1> to vector<2x16xi1>
    %502 = arith.select %501, %497, %408 : vector<2x16xi1>, vector<2x16xf32>
    %503 = vector.shape_cast %499 : vector<2x1xi1> to vector<2x1xi1>
    %504 = vector.broadcast %503 : vector<2x1xi1> to vector<2x16xi1>
    %505 = arith.select %504, %495, %411 : vector<2x16xi1>, vector<2x16xf32>
    %cst_143 = arith.constant 0.000000e+00 : f32
    %506 = vector.shape_cast %499 : vector<2x1xi1> to vector<2x1xi1>
    %507 = vector.broadcast %506 : vector<2x1xi1> to vector<2x16xi1>
    %508 = vector.broadcast %cst_143 : f32 to vector<2x16xf32>
    %509 = arith.select %507, %497, %508 : vector<2x16xi1>, vector<2x16xf32>
    %c4_144 = arith.constant 4 : index
    %c0_145 = arith.constant 0 : index
    %c0_146 = arith.constant 0 : index
    %510 = vector.load %arg17[%c4_144, %c0_145, %c0_146] : memref<8x2x16xf32, #tpu.memory_space<vmem>>, vector<1x2x16xf32>
    %511 = vector.shape_cast %510 : vector<1x2x16xf32> to vector<2x16xf32>
    %512 = vector.shape_cast %468 : vector<2x16xf32> to vector<1x2x16xf32>
    tpu.vector_store %arg17[%c4_144, %c0_145, %c0_146], %512 {strides = array<i32>} : memref<8x2x16xf32, #tpu.memory_space<vmem>>, vector<1x2x16xf32>,
    %c3_147 = arith.constant 3 : index
    %c0_148 = arith.constant 0 : index
    %c0_149 = arith.constant 0 : index
    %513 = vector.load %arg18[%c3_147, %c0_148, %c0_149] : memref<8x2x16xf32, #tpu.memory_space<vmem>>, vector<1x2x16xf32>
    %514 = vector.shape_cast %513 : vector<1x2x16xf32> to vector<2x16xf32>
    %515 = vector.shape_cast %509 : vector<2x16xf32> to vector<1x2x16xf32>
    tpu.vector_store %arg18[%c3_147, %c0_148, %c0_149], %515 {strides = array<i32>} : memref<8x2x16xf32, #tpu.memory_space<vmem>>, vector<1x2x16xf32>,
    %c5_150 = arith.constant 5 : index
    %c0_151 = arith.constant 0 : index
    %c0_152 = arith.constant 0 : index
    %516 = vector.load %arg16[%c5_150, %c0_151, %c0_152] : memref<8x2x128xf32, #tpu.memory_space<vmem>>, vector<1x2x128xf32>
    %517 = vector.shape_cast %516 : vector<1x2x128xf32> to vector<2x128xf32>
    %518 = vector.extract_strided_slice %517 {offsets = [0, 0], sizes = [2, 64], strides = [1, 1]} : vector<2x128xf32> to vector<2x64xf32>
    %c2_153 = arith.constant 2 : index
    %c0_154 = arith.constant 0 : index
    %c0_155 = arith.constant 0 : index
    %519 = vector.load %arg16[%c2_153, %c0_154, %c0_155] : memref<8x2x128xf32, #tpu.memory_space<vmem>>, vector<1x2x128xf32>
    %520 = vector.shape_cast %519 : vector<1x2x128xf32> to vector<2x128xf32>
    %521 = vector.extract_strided_slice %520 {offsets = [0, 64], sizes = [2, 64], strides = [1, 1]} : vector<2x128xf32> to vector<2x64xf32>
    %522 = vector.extract_strided_slice %39 {offsets = [5, 0, 0], sizes = [1, 2, 1], strides = [1, 1, 1]} : vector<8x2x1xf32> to vector<1x2x1xf32>
    %523 = vector.shape_cast %522 : vector<1x2x1xf32> to vector<2x1xf32>
    %cst_156 = arith.constant dense<0.000000e+00> : vector<2x64xf32>
    %524 = tpu.matmul %461, %40, %cst_156 {dimension_numbers = #tpu.dot_dimension_numbers<[1], [0], [0], [1], [0, 0, 1, 1], [], []>} : vector<2x16xf32>, vector<16x64xf32>, vector<2x64xf32> -> vector<2x64xf32>
    %525 = arith.addf %518, %524 : vector<2x64xf32>
    %526 = vector.extract_strided_slice %525 {offsets = [0, 0], sizes = [2, 16], strides = [1, 1]} : vector<2x64xf32> to vector<2x16xf32>
    %527 = arith.negf %526 : vector<2x16xf32>
    %528 = math.exp %527 : vector<2x16xf32>
    %cst_157 = arith.constant 1.000000e+00 : f32
    %529 = vector.broadcast %cst_157 : f32 to vector<2x16xf32>
    %530 = arith.addf %529, %528 : vector<2x16xf32>
    %531 = arith.divf %529, %530 : vector<2x16xf32>
    %532 = vector.extract_strided_slice %525 {offsets = [0, 16], sizes = [2, 16], strides = [1, 1]} : vector<2x64xf32> to vector<2x16xf32>
    %533 = arith.negf %532 : vector<2x16xf32>
    %534 = math.exp %533 : vector<2x16xf32>
    %cst_158 = arith.constant 1.000000e+00 : f32
    %535 = vector.broadcast %cst_158 : f32 to vector<2x16xf32>
    %536 = arith.addf %535, %534 : vector<2x16xf32>
    %537 = arith.divf %535, %536 : vector<2x16xf32>
    %538 = vector.extract_strided_slice %525 {offsets = [0, 32], sizes = [2, 16], strides = [1, 1]} : vector<2x64xf32> to vector<2x16xf32>
    %539 = math.tanh %538 : vector<2x16xf32>
    %540 = vector.extract_strided_slice %525 {offsets = [0, 48], sizes = [2, 16], strides = [1, 1]} : vector<2x64xf32> to vector<2x16xf32>
    %541 = arith.negf %540 : vector<2x16xf32>
    %542 = math.exp %541 : vector<2x16xf32>
    %cst_159 = arith.constant 1.000000e+00 : f32
    %543 = vector.broadcast %cst_159 : f32 to vector<2x16xf32>
    %544 = arith.addf %543, %542 : vector<2x16xf32>
    %545 = arith.divf %543, %544 : vector<2x16xf32>
    %546 = arith.mulf %537, %464 : vector<2x16xf32>
    %547 = arith.mulf %531, %539 : vector<2x16xf32>
    %548 = arith.addf %546, %547 : vector<2x16xf32>
    %549 = math.tanh %548 : vector<2x16xf32>
    %550 = arith.mulf %545, %549 : vector<2x16xf32>
    %cst_160 = arith.constant 0.000000e+00 : f32
    %551 = vector.broadcast %cst_160 : f32 to vector<2x1xf32>
    %552 = arith.cmpf ogt, %523, %551 : vector<2x1xf32>
    %553 = vector.shape_cast %552 : vector<2x1xi1> to vector<2x1xi1>
    %554 = vector.broadcast %553 : vector<2x1xi1> to vector<2x16xi1>
    %555 = arith.select %554, %550, %461 : vector<2x16xi1>, vector<2x16xf32>
    %556 = vector.shape_cast %552 : vector<2x1xi1> to vector<2x1xi1>
    %557 = vector.broadcast %556 : vector<2x1xi1> to vector<2x16xi1>
    %558 = arith.select %557, %548, %464 : vector<2x16xi1>, vector<2x16xf32>
    %cst_161 = arith.constant 0.000000e+00 : f32
    %559 = vector.shape_cast %552 : vector<2x1xi1> to vector<2x1xi1>
    %560 = vector.broadcast %559 : vector<2x1xi1> to vector<2x16xi1>
    %561 = vector.broadcast %cst_161 : f32 to vector<2x16xf32>
    %562 = arith.select %560, %550, %561 : vector<2x16xi1>, vector<2x16xf32>
    %563 = vector.extract_strided_slice %39 {offsets = [2, 0, 0], sizes = [1, 2, 1], strides = [1, 1, 1]} : vector<8x2x1xf32> to vector<1x2x1xf32>
    %564 = vector.shape_cast %563 : vector<1x2x1xf32> to vector<2x1xf32>
    %cst_162 = arith.constant dense<0.000000e+00> : vector<2x64xf32>
    %565 = tpu.matmul %502, %41, %cst_162 {dimension_numbers = #tpu.dot_dimension_numbers<[1], [0], [0], [1], [0, 0, 1, 1], [], []>} : vector<2x16xf32>, vector<16x64xf32>, vector<2x64xf32> -> vector<2x64xf32>
    %566 = arith.addf %521, %565 : vector<2x64xf32>
    %567 = vector.extract_strided_slice %566 {offsets = [0, 0], sizes = [2, 16], strides = [1, 1]} : vector<2x64xf32> to vector<2x16xf32>
    %568 = arith.negf %567 : vector<2x16xf32>
    %569 = math.exp %568 : vector<2x16xf32>
    %cst_163 = arith.constant 1.000000e+00 : f32
    %570 = vector.broadcast %cst_163 : f32 to vector<2x16xf32>
    %571 = arith.addf %570, %569 : vector<2x16xf32>
    %572 = arith.divf %570, %571 : vector<2x16xf32>
    %573 = vector.extract_strided_slice %566 {offsets = [0, 16], sizes = [2, 16], strides = [1, 1]} : vector<2x64xf32> to vector<2x16xf32>
    %574 = arith.negf %573 : vector<2x16xf32>
    %575 = math.exp %574 : vector<2x16xf32>
    %cst_164 = arith.constant 1.000000e+00 : f32
    %576 = vector.broadcast %cst_164 : f32 to vector<2x16xf32>
    %577 = arith.addf %576, %575 : vector<2x16xf32>
    %578 = arith.divf %576, %577 : vector<2x16xf32>
    %579 = vector.extract_strided_slice %566 {offsets = [0, 32], sizes = [2, 16], strides = [1, 1]} : vector<2x64xf32> to vector<2x16xf32>
    %580 = math.tanh %579 : vector<2x16xf32>
    %581 = vector.extract_strided_slice %566 {offsets = [0, 48], sizes = [2, 16], strides = [1, 1]} : vector<2x64xf32> to vector<2x16xf32>
    %582 = arith.negf %581 : vector<2x16xf32>
    %583 = math.exp %582 : vector<2x16xf32>
    %cst_165 = arith.constant 1.000000e+00 : f32
    %584 = vector.broadcast %cst_165 : f32 to vector<2x16xf32>
    %585 = arith.addf %584, %583 : vector<2x16xf32>
    %586 = arith.divf %584, %585 : vector<2x16xf32>
    %587 = arith.mulf %578, %505 : vector<2x16xf32>
    %588 = arith.mulf %572, %580 : vector<2x16xf32>
    %589 = arith.addf %587, %588 : vector<2x16xf32>
    %590 = math.tanh %589 : vector<2x16xf32>
    %591 = arith.mulf %586, %590 : vector<2x16xf32>
    %cst_166 = arith.constant 0.000000e+00 : f32
    %592 = vector.broadcast %cst_166 : f32 to vector<2x1xf32>
    %593 = arith.cmpf ogt, %564, %592 : vector<2x1xf32>
    %594 = vector.shape_cast %593 : vector<2x1xi1> to vector<2x1xi1>
    %595 = vector.broadcast %594 : vector<2x1xi1> to vector<2x16xi1>
    %596 = arith.select %595, %591, %502 : vector<2x16xi1>, vector<2x16xf32>
    %597 = vector.shape_cast %593 : vector<2x1xi1> to vector<2x1xi1>
    %598 = vector.broadcast %597 : vector<2x1xi1> to vector<2x16xi1>
    %599 = arith.select %598, %589, %505 : vector<2x16xi1>, vector<2x16xf32>
    %cst_167 = arith.constant 0.000000e+00 : f32
    %600 = vector.shape_cast %593 : vector<2x1xi1> to vector<2x1xi1>
    %601 = vector.broadcast %600 : vector<2x1xi1> to vector<2x16xi1>
    %602 = vector.broadcast %cst_167 : f32 to vector<2x16xf32>
    %603 = arith.select %601, %591, %602 : vector<2x16xi1>, vector<2x16xf32>
    %c5_168 = arith.constant 5 : index
    %c0_169 = arith.constant 0 : index
    %c0_170 = arith.constant 0 : index
    %604 = vector.load %arg17[%c5_168, %c0_169, %c0_170] : memref<8x2x16xf32, #tpu.memory_space<vmem>>, vector<1x2x16xf32>
    %605 = vector.shape_cast %604 : vector<1x2x16xf32> to vector<2x16xf32>
    %606 = vector.shape_cast %562 : vector<2x16xf32> to vector<1x2x16xf32>
    tpu.vector_store %arg17[%c5_168, %c0_169, %c0_170], %606 {strides = array<i32>} : memref<8x2x16xf32, #tpu.memory_space<vmem>>, vector<1x2x16xf32>,
    %c2_171 = arith.constant 2 : index
    %c0_172 = arith.constant 0 : index
    %c0_173 = arith.constant 0 : index
    %607 = vector.load %arg18[%c2_171, %c0_172, %c0_173] : memref<8x2x16xf32, #tpu.memory_space<vmem>>, vector<1x2x16xf32>
    %608 = vector.shape_cast %607 : vector<1x2x16xf32> to vector<2x16xf32>
    %609 = vector.shape_cast %603 : vector<2x16xf32> to vector<1x2x16xf32>
    tpu.vector_store %arg18[%c2_171, %c0_172, %c0_173], %609 {strides = array<i32>} : memref<8x2x16xf32, #tpu.memory_space<vmem>>, vector<1x2x16xf32>,
    %c6_174 = arith.constant 6 : index
    %c0_175 = arith.constant 0 : index
    %c0_176 = arith.constant 0 : index
    %610 = vector.load %arg16[%c6_174, %c0_175, %c0_176] : memref<8x2x128xf32, #tpu.memory_space<vmem>>, vector<1x2x128xf32>
    %611 = vector.shape_cast %610 : vector<1x2x128xf32> to vector<2x128xf32>
    %612 = vector.extract_strided_slice %611 {offsets = [0, 0], sizes = [2, 64], strides = [1, 1]} : vector<2x128xf32> to vector<2x64xf32>
    %c1_177 = arith.constant 1 : index
    %c0_178 = arith.constant 0 : index
    %c0_179 = arith.constant 0 : index
    %613 = vector.load %arg16[%c1_177, %c0_178, %c0_179] : memref<8x2x128xf32, #tpu.memory_space<vmem>>, vector<1x2x128xf32>
    %614 = vector.shape_cast %613 : vector<1x2x128xf32> to vector<2x128xf32>
    %615 = vector.extract_strided_slice %614 {offsets = [0, 64], sizes = [2, 64], strides = [1, 1]} : vector<2x128xf32> to vector<2x64xf32>
    %616 = vector.extract_strided_slice %39 {offsets = [6, 0, 0], sizes = [1, 2, 1], strides = [1, 1, 1]} : vector<8x2x1xf32> to vector<1x2x1xf32>
    %617 = vector.shape_cast %616 : vector<1x2x1xf32> to vector<2x1xf32>
    %cst_180 = arith.constant dense<0.000000e+00> : vector<2x64xf32>
    %618 = tpu.matmul %555, %40, %cst_180 {dimension_numbers = #tpu.dot_dimension_numbers<[1], [0], [0], [1], [0, 0, 1, 1], [], []>} : vector<2x16xf32>, vector<16x64xf32>, vector<2x64xf32> -> vector<2x64xf32>
    %619 = arith.addf %612, %618 : vector<2x64xf32>
    %620 = vector.extract_strided_slice %619 {offsets = [0, 0], sizes = [2, 16], strides = [1, 1]} : vector<2x64xf32> to vector<2x16xf32>
    %621 = arith.negf %620 : vector<2x16xf32>
    %622 = math.exp %621 : vector<2x16xf32>
    %cst_181 = arith.constant 1.000000e+00 : f32
    %623 = vector.broadcast %cst_181 : f32 to vector<2x16xf32>
    %624 = arith.addf %623, %622 : vector<2x16xf32>
    %625 = arith.divf %623, %624 : vector<2x16xf32>
    %626 = vector.extract_strided_slice %619 {offsets = [0, 16], sizes = [2, 16], strides = [1, 1]} : vector<2x64xf32> to vector<2x16xf32>
    %627 = arith.negf %626 : vector<2x16xf32>
    %628 = math.exp %627 : vector<2x16xf32>
    %cst_182 = arith.constant 1.000000e+00 : f32
    %629 = vector.broadcast %cst_182 : f32 to vector<2x16xf32>
    %630 = arith.addf %629, %628 : vector<2x16xf32>
    %631 = arith.divf %629, %630 : vector<2x16xf32>
    %632 = vector.extract_strided_slice %619 {offsets = [0, 32], sizes = [2, 16], strides = [1, 1]} : vector<2x64xf32> to vector<2x16xf32>
    %633 = math.tanh %632 : vector<2x16xf32>
    %634 = vector.extract_strided_slice %619 {offsets = [0, 48], sizes = [2, 16], strides = [1, 1]} : vector<2x64xf32> to vector<2x16xf32>
    %635 = arith.negf %634 : vector<2x16xf32>
    %636 = math.exp %635 : vector<2x16xf32>
    %cst_183 = arith.constant 1.000000e+00 : f32
    %637 = vector.broadcast %cst_183 : f32 to vector<2x16xf32>
    %638 = arith.addf %637, %636 : vector<2x16xf32>
    %639 = arith.divf %637, %638 : vector<2x16xf32>
    %640 = arith.mulf %631, %558 : vector<2x16xf32>
    %641 = arith.mulf %625, %633 : vector<2x16xf32>
    %642 = arith.addf %640, %641 : vector<2x16xf32>
    %643 = math.tanh %642 : vector<2x16xf32>
    %644 = arith.mulf %639, %643 : vector<2x16xf32>
    %cst_184 = arith.constant 0.000000e+00 : f32
    %645 = vector.broadcast %cst_184 : f32 to vector<2x1xf32>
    %646 = arith.cmpf ogt, %617, %645 : vector<2x1xf32>
    %647 = vector.shape_cast %646 : vector<2x1xi1> to vector<2x1xi1>
    %648 = vector.broadcast %647 : vector<2x1xi1> to vector<2x16xi1>
    %649 = arith.select %648, %644, %555 : vector<2x16xi1>, vector<2x16xf32>
    %650 = vector.shape_cast %646 : vector<2x1xi1> to vector<2x1xi1>
    %651 = vector.broadcast %650 : vector<2x1xi1> to vector<2x16xi1>
    %652 = arith.select %651, %642, %558 : vector<2x16xi1>, vector<2x16xf32>
    %cst_185 = arith.constant 0.000000e+00 : f32
    %653 = vector.shape_cast %646 : vector<2x1xi1> to vector<2x1xi1>
    %654 = vector.broadcast %653 : vector<2x1xi1> to vector<2x16xi1>
    %655 = vector.broadcast %cst_185 : f32 to vector<2x16xf32>
    %656 = arith.select %654, %644, %655 : vector<2x16xi1>, vector<2x16xf32>
    %657 = vector.extract_strided_slice %39 {offsets = [1, 0, 0], sizes = [1, 2, 1], strides = [1, 1, 1]} : vector<8x2x1xf32> to vector<1x2x1xf32>
    %658 = vector.shape_cast %657 : vector<1x2x1xf32> to vector<2x1xf32>
    %cst_186 = arith.constant dense<0.000000e+00> : vector<2x64xf32>
    %659 = tpu.matmul %596, %41, %cst_186 {dimension_numbers = #tpu.dot_dimension_numbers<[1], [0], [0], [1], [0, 0, 1, 1], [], []>} : vector<2x16xf32>, vector<16x64xf32>, vector<2x64xf32> -> vector<2x64xf32>
    %660 = arith.addf %615, %659 : vector<2x64xf32>
    %661 = vector.extract_strided_slice %660 {offsets = [0, 0], sizes = [2, 16], strides = [1, 1]} : vector<2x64xf32> to vector<2x16xf32>
    %662 = arith.negf %661 : vector<2x16xf32>
    %663 = math.exp %662 : vector<2x16xf32>
    %cst_187 = arith.constant 1.000000e+00 : f32
    %664 = vector.broadcast %cst_187 : f32 to vector<2x16xf32>
    %665 = arith.addf %664, %663 : vector<2x16xf32>
    %666 = arith.divf %664, %665 : vector<2x16xf32>
    %667 = vector.extract_strided_slice %660 {offsets = [0, 16], sizes = [2, 16], strides = [1, 1]} : vector<2x64xf32> to vector<2x16xf32>
    %668 = arith.negf %667 : vector<2x16xf32>
    %669 = math.exp %668 : vector<2x16xf32>
    %cst_188 = arith.constant 1.000000e+00 : f32
    %670 = vector.broadcast %cst_188 : f32 to vector<2x16xf32>
    %671 = arith.addf %670, %669 : vector<2x16xf32>
    %672 = arith.divf %670, %671 : vector<2x16xf32>
    %673 = vector.extract_strided_slice %660 {offsets = [0, 32], sizes = [2, 16], strides = [1, 1]} : vector<2x64xf32> to vector<2x16xf32>
    %674 = math.tanh %673 : vector<2x16xf32>
    %675 = vector.extract_strided_slice %660 {offsets = [0, 48], sizes = [2, 16], strides = [1, 1]} : vector<2x64xf32> to vector<2x16xf32>
    %676 = arith.negf %675 : vector<2x16xf32>
    %677 = math.exp %676 : vector<2x16xf32>
    %cst_189 = arith.constant 1.000000e+00 : f32
    %678 = vector.broadcast %cst_189 : f32 to vector<2x16xf32>
    %679 = arith.addf %678, %677 : vector<2x16xf32>
    %680 = arith.divf %678, %679 : vector<2x16xf32>
    %681 = arith.mulf %672, %599 : vector<2x16xf32>
    %682 = arith.mulf %666, %674 : vector<2x16xf32>
    %683 = arith.addf %681, %682 : vector<2x16xf32>
    %684 = math.tanh %683 : vector<2x16xf32>
    %685 = arith.mulf %680, %684 : vector<2x16xf32>
    %cst_190 = arith.constant 0.000000e+00 : f32
    %686 = vector.broadcast %cst_190 : f32 to vector<2x1xf32>
    %687 = arith.cmpf ogt, %658, %686 : vector<2x1xf32>
    %688 = vector.shape_cast %687 : vector<2x1xi1> to vector<2x1xi1>
    %689 = vector.broadcast %688 : vector<2x1xi1> to vector<2x16xi1>
    %690 = arith.select %689, %685, %596 : vector<2x16xi1>, vector<2x16xf32>
    %691 = vector.shape_cast %687 : vector<2x1xi1> to vector<2x1xi1>
    %692 = vector.broadcast %691 : vector<2x1xi1> to vector<2x16xi1>
    %693 = arith.select %692, %683, %599 : vector<2x16xi1>, vector<2x16xf32>
    %cst_191 = arith.constant 0.000000e+00 : f32
    %694 = vector.shape_cast %687 : vector<2x1xi1> to vector<2x1xi1>
    %695 = vector.broadcast %694 : vector<2x1xi1> to vector<2x16xi1>
    %696 = vector.broadcast %cst_191 : f32 to vector<2x16xf32>
    %697 = arith.select %695, %685, %696 : vector<2x16xi1>, vector<2x16xf32>
    %c6_192 = arith.constant 6 : index
    %c0_193 = arith.constant 0 : index
    %c0_194 = arith.constant 0 : index
    %698 = vector.load %arg17[%c6_192, %c0_193, %c0_194] : memref<8x2x16xf32, #tpu.memory_space<vmem>>, vector<1x2x16xf32>
    %699 = vector.shape_cast %698 : vector<1x2x16xf32> to vector<2x16xf32>
    %700 = vector.shape_cast %656 : vector<2x16xf32> to vector<1x2x16xf32>
    tpu.vector_store %arg17[%c6_192, %c0_193, %c0_194], %700 {strides = array<i32>} : memref<8x2x16xf32, #tpu.memory_space<vmem>>, vector<1x2x16xf32>,
    %c1_195 = arith.constant 1 : index
    %c0_196 = arith.constant 0 : index
    %c0_197 = arith.constant 0 : index
    %701 = vector.load %arg18[%c1_195, %c0_196, %c0_197] : memref<8x2x16xf32, #tpu.memory_space<vmem>>, vector<1x2x16xf32>
    %702 = vector.shape_cast %701 : vector<1x2x16xf32> to vector<2x16xf32>
    %703 = vector.shape_cast %697 : vector<2x16xf32> to vector<1x2x16xf32>
    tpu.vector_store %arg18[%c1_195, %c0_196, %c0_197], %703 {strides = array<i32>} : memref<8x2x16xf32, #tpu.memory_space<vmem>>, vector<1x2x16xf32>,
    %c7_198 = arith.constant 7 : index
    %c0_199 = arith.constant 0 : index
    %c0_200 = arith.constant 0 : index
    %704 = vector.load %arg16[%c7_198, %c0_199, %c0_200] : memref<8x2x128xf32, #tpu.memory_space<vmem>>, vector<1x2x128xf32>
    %705 = vector.shape_cast %704 : vector<1x2x128xf32> to vector<2x128xf32>
    %706 = vector.extract_strided_slice %705 {offsets = [0, 0], sizes = [2, 64], strides = [1, 1]} : vector<2x128xf32> to vector<2x64xf32>
    %c0_201 = arith.constant 0 : index
    %c0_202 = arith.constant 0 : index
    %c0_203 = arith.constant 0 : index
    %707 = vector.load %arg16[%c0_201, %c0_202, %c0_203] : memref<8x2x128xf32, #tpu.memory_space<vmem>>, vector<1x2x128xf32>
    %708 = vector.shape_cast %707 : vector<1x2x128xf32> to vector<2x128xf32>
    %709 = vector.extract_strided_slice %708 {offsets = [0, 64], sizes = [2, 64], strides = [1, 1]} : vector<2x128xf32> to vector<2x64xf32>
    %710 = vector.extract_strided_slice %39 {offsets = [7, 0, 0], sizes = [1, 2, 1], strides = [1, 1, 1]} : vector<8x2x1xf32> to vector<1x2x1xf32>
    %711 = vector.shape_cast %710 : vector<1x2x1xf32> to vector<2x1xf32>
    %cst_204 = arith.constant dense<0.000000e+00> : vector<2x64xf32>
    %712 = tpu.matmul %649, %40, %cst_204 {dimension_numbers = #tpu.dot_dimension_numbers<[1], [0], [0], [1], [0, 0, 1, 1], [], []>} : vector<2x16xf32>, vector<16x64xf32>, vector<2x64xf32> -> vector<2x64xf32>
    %713 = arith.addf %706, %712 : vector<2x64xf32>
    %714 = vector.extract_strided_slice %713 {offsets = [0, 0], sizes = [2, 16], strides = [1, 1]} : vector<2x64xf32> to vector<2x16xf32>
    %715 = arith.negf %714 : vector<2x16xf32>
    %716 = math.exp %715 : vector<2x16xf32>
    %cst_205 = arith.constant 1.000000e+00 : f32
    %717 = vector.broadcast %cst_205 : f32 to vector<2x16xf32>
    %718 = arith.addf %717, %716 : vector<2x16xf32>
    %719 = arith.divf %717, %718 : vector<2x16xf32>
    %720 = vector.extract_strided_slice %713 {offsets = [0, 16], sizes = [2, 16], strides = [1, 1]} : vector<2x64xf32> to vector<2x16xf32>
    %721 = arith.negf %720 : vector<2x16xf32>
    %722 = math.exp %721 : vector<2x16xf32>
    %cst_206 = arith.constant 1.000000e+00 : f32
    %723 = vector.broadcast %cst_206 : f32 to vector<2x16xf32>
    %724 = arith.addf %723, %722 : vector<2x16xf32>
    %725 = arith.divf %723, %724 : vector<2x16xf32>
    %726 = vector.extract_strided_slice %713 {offsets = [0, 32], sizes = [2, 16], strides = [1, 1]} : vector<2x64xf32> to vector<2x16xf32>
    %727 = math.tanh %726 : vector<2x16xf32>
    %728 = vector.extract_strided_slice %713 {offsets = [0, 48], sizes = [2, 16], strides = [1, 1]} : vector<2x64xf32> to vector<2x16xf32>
    %729 = arith.negf %728 : vector<2x16xf32>
    %730 = math.exp %729 : vector<2x16xf32>
    %cst_207 = arith.constant 1.000000e+00 : f32
    %731 = vector.broadcast %cst_207 : f32 to vector<2x16xf32>
    %732 = arith.addf %731, %730 : vector<2x16xf32>
    %733 = arith.divf %731, %732 : vector<2x16xf32>
    %734 = arith.mulf %725, %652 : vector<2x16xf32>
    %735 = arith.mulf %719, %727 : vector<2x16xf32>
    %736 = arith.addf %734, %735 : vector<2x16xf32>
    %737 = math.tanh %736 : vector<2x16xf32>
    %738 = arith.mulf %733, %737 : vector<2x16xf32>
    %cst_208 = arith.constant 0.000000e+00 : f32
    %739 = vector.broadcast %cst_208 : f32 to vector<2x1xf32>
    %740 = arith.cmpf ogt, %711, %739 : vector<2x1xf32>
    %cst_209 = arith.constant 0.000000e+00 : f32
    %741 = vector.shape_cast %740 : vector<2x1xi1> to vector<2x1xi1>
    %742 = vector.broadcast %741 : vector<2x1xi1> to vector<2x16xi1>
    %743 = vector.broadcast %cst_209 : f32 to vector<2x16xf32>
    %744 = arith.select %742, %738, %743 : vector<2x16xi1>, vector<2x16xf32>
    %745 = vector.extract_strided_slice %39 {offsets = [0, 0, 0], sizes = [1, 2, 1], strides = [1, 1, 1]} : vector<8x2x1xf32> to vector<1x2x1xf32>
    %746 = vector.shape_cast %745 : vector<1x2x1xf32> to vector<2x1xf32>
    %cst_210 = arith.constant dense<0.000000e+00> : vector<2x64xf32>
    %747 = tpu.matmul %690, %41, %cst_210 {dimension_numbers = #tpu.dot_dimension_numbers<[1], [0], [0], [1], [0, 0, 1, 1], [], []>} : vector<2x16xf32>, vector<16x64xf32>, vector<2x64xf32> -> vector<2x64xf32>
    %748 = arith.addf %709, %747 : vector<2x64xf32>
    %749 = vector.extract_strided_slice %748 {offsets = [0, 0], sizes = [2, 16], strides = [1, 1]} : vector<2x64xf32> to vector<2x16xf32>
    %750 = arith.negf %749 : vector<2x16xf32>
    %751 = math.exp %750 : vector<2x16xf32>
    %cst_211 = arith.constant 1.000000e+00 : f32
    %752 = vector.broadcast %cst_211 : f32 to vector<2x16xf32>
    %753 = arith.addf %752, %751 : vector<2x16xf32>
    %754 = arith.divf %752, %753 : vector<2x16xf32>
    %755 = vector.extract_strided_slice %748 {offsets = [0, 16], sizes = [2, 16], strides = [1, 1]} : vector<2x64xf32> to vector<2x16xf32>
    %756 = arith.negf %755 : vector<2x16xf32>
    %757 = math.exp %756 : vector<2x16xf32>
    %cst_212 = arith.constant 1.000000e+00 : f32
    %758 = vector.broadcast %cst_212 : f32 to vector<2x16xf32>
    %759 = arith.addf %758, %757 : vector<2x16xf32>
    %760 = arith.divf %758, %759 : vector<2x16xf32>
    %761 = vector.extract_strided_slice %748 {offsets = [0, 32], sizes = [2, 16], strides = [1, 1]} : vector<2x64xf32> to vector<2x16xf32>
    %762 = math.tanh %761 : vector<2x16xf32>
    %763 = vector.extract_strided_slice %748 {offsets = [0, 48], sizes = [2, 16], strides = [1, 1]} : vector<2x64xf32> to vector<2x16xf32>
    %764 = arith.negf %763 : vector<2x16xf32>
    %765 = math.exp %764 : vector<2x16xf32>
    %cst_213 = arith.constant 1.000000e+00 : f32
    %766 = vector.broadcast %cst_213 : f32 to vector<2x16xf32>
    %767 = arith.addf %766, %765 : vector<2x16xf32>
    %768 = arith.divf %766, %767 : vector<2x16xf32>
    %769 = arith.mulf %760, %693 : vector<2x16xf32>
    %770 = arith.mulf %754, %762 : vector<2x16xf32>
    %771 = arith.addf %769, %770 : vector<2x16xf32>
    %772 = math.tanh %771 : vector<2x16xf32>
    %773 = arith.mulf %768, %772 : vector<2x16xf32>
    %cst_214 = arith.constant 0.000000e+00 : f32
    %774 = vector.broadcast %cst_214 : f32 to vector<2x1xf32>
    %775 = arith.cmpf ogt, %746, %774 : vector<2x1xf32>
    %cst_215 = arith.constant 0.000000e+00 : f32
    %776 = vector.shape_cast %775 : vector<2x1xi1> to vector<2x1xi1>
    %777 = vector.broadcast %776 : vector<2x1xi1> to vector<2x16xi1>
    %778 = vector.broadcast %cst_215 : f32 to vector<2x16xf32>
    %779 = arith.select %777, %773, %778 : vector<2x16xi1>, vector<2x16xf32>
    %c7_216 = arith.constant 7 : index
    %c0_217 = arith.constant 0 : index
    %c0_218 = arith.constant 0 : index
    %780 = vector.load %arg17[%c7_216, %c0_217, %c0_218] : memref<8x2x16xf32, #tpu.memory_space<vmem>>, vector<1x2x16xf32>
    %781 = vector.shape_cast %780 : vector<1x2x16xf32> to vector<2x16xf32>
    %782 = vector.shape_cast %744 : vector<2x16xf32> to vector<1x2x16xf32>
    tpu.vector_store %arg17[%c7_216, %c0_217, %c0_218], %782 {strides = array<i32>} : memref<8x2x16xf32, #tpu.memory_space<vmem>>, vector<1x2x16xf32>,
    %c0_219 = arith.constant 0 : index
    %c0_220 = arith.constant 0 : index
    %c0_221 = arith.constant 0 : index
    %783 = vector.load %arg18[%c0_219, %c0_220, %c0_221] : memref<8x2x16xf32, #tpu.memory_space<vmem>>, vector<1x2x16xf32>
    %784 = vector.shape_cast %783 : vector<1x2x16xf32> to vector<2x16xf32>
    %785 = vector.shape_cast %779 : vector<2x16xf32> to vector<1x2x16xf32>
    tpu.vector_store %arg18[%c0_219, %c0_220, %c0_221], %785 {strides = array<i32>} : memref<8x2x16xf32, #tpu.memory_space<vmem>>, vector<1x2x16xf32>,
    %c0_222 = arith.constant 0 : index
    %c0_223 = arith.constant 0 : index
    %c0_224 = arith.constant 0 : index
    %786 = vector.load %arg17[%c0_222, %c0_223, %c0_224] : memref<8x2x16xf32, #tpu.memory_space<vmem>>, vector<8x2x16xf32>
    %787 = vector.shape_cast %786 : vector<8x2x16xf32> to vector<16x16xf32>
    %c0_225 = arith.constant 0 : index
    %c0_226 = arith.constant 0 : index
    %c0_227 = arith.constant 0 : index
    %788 = vector.load %arg18[%c0_225, %c0_226, %c0_227] : memref<8x2x16xf32, #tpu.memory_space<vmem>>, vector<8x2x16xf32>
    %789 = vector.shape_cast %788 : vector<8x2x16xf32> to vector<16x16xf32>
    %c0_228 = arith.constant 0 : index
    %c0_229 = arith.constant 0 : index
    %790 = vector.load %arg12[%c0_228, %c0_229] : memref<16x128xf32, #tpu.memory_space<vmem>>, vector<16x128xf32>
    %cst_230 = arith.constant dense<0.000000e+00> : vector<16x128xf32>
    %791 = tpu.matmul %787, %790, %cst_230 {dimension_numbers = #tpu.dot_dimension_numbers<[1], [0], [0], [1], [0, 0, 1, 1], [], []>} : vector<16x16xf32>, vector<16x128xf32>, vector<16x128xf32> -> vector<16x128xf32>
    %c0_231 = arith.constant 0 : index
    %c0_232 = arith.constant 0 : index
    %792 = vector.load %arg13[%c0_231, %c0_232] : memref<16x128xf32, #tpu.memory_space<vmem>>, vector<16x128xf32>
    %cst_233 = arith.constant dense<0.000000e+00> : vector<16x128xf32>
    %793 = tpu.matmul %789, %792, %cst_233 {dimension_numbers = #tpu.dot_dimension_numbers<[1], [0], [0], [1], [0, 0, 1, 1], [], []>} : vector<16x16xf32>, vector<16x128xf32>, vector<16x128xf32> -> vector<16x128xf32>
    %794 = arith.addf %791, %793 : vector<16x128xf32>
    %c0_234 = arith.constant 0 : index
    %c0_235 = arith.constant 0 : index
    %795 = vector.load %arg14[%c0_234, %c0_235] : memref<1x128xf32, #tpu.memory_space<vmem>>, vector<1x128xf32>
    %796 = vector.broadcast %795 : vector<1x128xf32> to vector<16x128xf32>
    %797 = arith.addf %794, %796 : vector<16x128xf32>
    %c0_236 = arith.constant 0 : index
    %c0_237 = arith.constant 0 : index
    %798 = vector.load %arg15[%c0_236, %c0_237] : memref<16x128xf32, #tpu.memory_space<vmem>>, vector<16x128xf32>
    tpu.vector_store %arg15[%c0_236, %c0_237], %797 {strides = array<i32>} : memref<16x128xf32, #tpu.memory_space<vmem>>, vector<16x128xf32>,
    return
  }
  func.func @transform_0(%arg0: i32) -> (i32, i32, i32) {
    %c0_i32 = arith.constant 0 : i32
    %c0_i32_0 = arith.constant 0 : i32
    %c0_i32_1 = arith.constant 0 : i32
    %c0_i32_2 = arith.constant 0 : i32
    return %c0_i32, %c0_i32_0, %c0_i32_1 : i32, i32, i32
  }
  func.func @transform_1(%arg0: i32) -> (i32, i32, i32) {
    %c0_i32 = arith.constant 0 : i32
    %c0_i32_0 = arith.constant 0 : i32
    %c0_i32_1 = arith.constant 0 : i32
    %c0_i32_2 = arith.constant 0 : i32
    return %c0_i32, %c0_i32_0, %c0_i32_1 : i32, i32, i32
  }
  func.func @transform_2(%arg0: i32) -> (i32, i32, i32) {
    %c0_i32 = arith.constant 0 : i32
    %c0_i32_0 = arith.constant 0 : i32
    %c0_i32_1 = arith.constant 0 : i32
    %c0_i32_2 = arith.constant 0 : i32
    return %c0_i32, %c0_i32_0, %c0_i32_1 : i32, i32, i32
  }
  func.func @transform_3(%arg0: i32) -> (i32, i32) {
    %c0_i32 = arith.constant 0 : i32
    %c0_i32_0 = arith.constant 0 : i32
    %c0_i32_1 = arith.constant 0 : i32
    return %c0_i32, %c0_i32_0 : i32, i32
  }
  func.func @transform_4(%arg0: i32) -> (i32, i32) {
    %c0_i32 = arith.constant 0 : i32
    %c0_i32_0 = arith.constant 0 : i32
    %c0_i32_1 = arith.constant 0 : i32
    return %c0_i32, %c0_i32_0 : i32, i32
  }
  func.func @transform_5(%arg0: i32) -> (i32, i32) {
    %c0_i32 = arith.constant 0 : i32
    %c0_i32_0 = arith.constant 0 : i32
    %c0_i32_1 = arith.constant 0 : i32
    return %c0_i32, %c0_i32_0 : i32, i32
  }
  func.func @transform_6(%arg0: i32) -> (i32, i32) {
    %c0_i32 = arith.constant 0 : i32
    %c0_i32_0 = arith.constant 0 : i32
    %c0_i32_1 = arith.constant 0 : i32
    return %c0_i32, %c0_i32_0 : i32, i32
  }
  func.func @transform_7(%arg0: i32) -> (i32, i32) {
    %c0_i32 = arith.constant 0 : i32
    %c0_i32_0 = arith.constant 0 : i32
    %c0_i32_1 = arith.constant 0 : i32
    return %c0_i32, %c0_i32_0 : i32, i32
  }
  func.func @transform_8(%arg0: i32) -> (i32, i32) {
    %c0_i32 = arith.constant 0 : i32
    %c0_i32_0 = arith.constant 0 : i32
    %c0_i32_1 = arith.constant 0 : i32
    return %c0_i32, %c0_i32_0 : i32, i32
  }
  func.func @transform_9(%arg0: i32) -> (i32, i32) {
    %c0_i32 = arith.constant 0 : i32
    %c0_i32_0 = arith.constant 0 : i32
    %c0_i32_1 = arith.constant 0 : i32
    return %c0_i32, %c0_i32_0 : i32, i32
  }
  func.func @transform_10(%arg0: i32) -> (i32, i32) {
    %c0_i32 = arith.constant 0 : i32
    %c0_i32_0 = arith.constant 0 : i32
    %c0_i32_1 = arith.constant 0 : i32
    return %c0_i32, %c0_i32_0 : i32, i32
  }
  func.func @transform_11(%arg0: i32) -> (i32, i32) {
    %c0_i32 = arith.constant 0 : i32
    %c0_i32_0 = arith.constant 0 : i32
    %c0_i32_1 = arith.constant 0 : i32
    return %c0_i32, %c0_i32_0 : i32, i32
  }
  func.func @transform_12(%arg0: i32) -> (i32, i32) {
    %c0_i32 = arith.constant 0 : i32
    %c0_i32_0 = arith.constant 0 : i32
    %c0_i32_1 = arith.constant 0 : i32
    return %c0_i32, %c0_i32_0 : i32, i32
  }
  func.func @transform_13(%arg0: i32) -> (i32, i32) {
    %c0_i32 = arith.constant 0 : i32
    %c0_i32_0 = arith.constant 0 : i32
    %c0_i32_1 = arith.constant 0 : i32
    return %c0_i32, %c0_i32_0 : i32, i32
  }
  func.func @transform_14(%arg0: i32) -> (i32, i32) {
    %c0_i32 = arith.constant 0 : i32
    %c0_i32_0 = arith.constant 0 : i32
    %c0_i32_1 = arith.constant 0 : i32
    return %c0_i32, %c0_i32_0 : i32, i32
  }
}

</mosaic_0001>

<bundles_post_ra>
// kernel: ner_forward.1
= control target key start
LH: loop header
LB: loop body
LE: loop exit
PB: predicated region body
PF: predicated region fallthrough
CT: control target
= control target key end

     0   :  { %vm115_vm0 = vcmask 1046528   ;;  %vm260_vm1 = vcmask 1045504   ;;  %s7409_s21 = smov 8   ;;  %s7410_s26 = smov 16   ;;  %vm3396_vm2 = vcmask 1044480   ;;  %vm3541_vm3 = vcmask 1043456   ;;  %s9719_s0 = inlined_call_operand.vmem [shape: f32[16,16,8], index: 0, kind: input, shape index: {}]   ;;  %s9720_s3 = inlined_call_operand.vmem [shape: f32[24,16], index: 3, kind: input, shape index: {}]   ;;  %s9721_s5 = inlined_call_operand.vmem [shape: f32[40,16], index: 5, kind: input, shape index: {}]   ;;  %s9722_s4 = inlined_call_operand.vmem [shape: f32[1,16], index: 4, kind: input, shape index: {}]   ;;  %s9723_s6 = inlined_call_operand.vmem [shape: f32[1,16], index: 6, kind: input, shape index: {}]   ;;  %s9724_s7 = inlined_call_operand.vmem [shape: f32[64,128], index: 7, kind: input, shape index: {}]   ;;  %s9725_s9 = inlined_call_operand.vmem [shape: f32[16,64], index: 9, kind: input, shape index: {}]   ;;  %s9726_s1 = inlined_call_operand.vmem [shape: f32[8,2,32], index: 1, kind: input, shape index: {}]   ;;  %s9727_s10 = inlined_call_operand.vmem [shape: f32[16,64], index: 10, kind: input, shape index: {}]   ;;  %s9728_s8 = inlined_call_operand.vmem [shape: f32[1,128], index: 8, kind: input, shape index: {}]   ;;  %s9729_s2 = inlined_call_operand.vmem [shape: f32[8,2,1], index: 2, kind: input, shape index: {}]   ;;  %s9730_s12 = inlined_call_operand.vmem [shape: f32[16,128], index: 12, kind: input, shape index: {}]   ;;  %s9731_s11 = inlined_call_operand.vmem [shape: f32[16,128], index: 11, kind: input, shape index: {}]   ;;  %s9732_s13 = inlined_call_operand.vmem [shape: f32[1,128], index: 13, kind: input, shape index: {}]   ;;  %s9733_s14 = inlined_call_operand.vmem [shape: f32[16,128], index: 14, kind: output, shape index: {}]  }
   0x1   :  { %v7499_v0 = vld [vmem:[%s9719_s0 + $0x8] sm:$0xff]  ;;  %v7504_v1 = vld [vmem:[%s9719_s0] sm:$0xff]  ;;  %v7509_v2 = vld [vmem:[%s9719_s0 + $0x10] sm:$0xff]  ;;  %s7411_s27 = smov 24   ;;  %s7412_s16 = smov 32   ;;  %vm405_vm4 = vcmask 64512  }
   0x2   :  { %v117_v3 = vrot.slane %v7499_v0, 1  ;;  %v116_v4 = vrot.slane %v7504_v1, 1  ;;  %v7516_v5 = vld [vmem:[%s9719_s0 + $0x18] sm:$0xff]  ;;  %v119_v6 = vrot.slane %v7509_v2, 1  ;;  %v261_v7 = vrot.slane %v7504_v1, 2  ;;  %v7532_v15 = vld [vmem:[%s9719_s0 + $0x20] sm:$0xff] }
   0x3   :  { %v120_v8 = vrot.slane %v7516_v5, 1  ;;  %v262_v9 = vrot.slane %v7499_v0, 2  ;;  %v264_v12 = vrot.slane %v7509_v2, 2  ;;  %v265_v13 = vrot.slane %v7516_v5, 2  ;;  %v7537_v16 = vld [vmem:[%s9719_s0 + $0x28] sm:$0xff]  ;;  %v81_v20 = vld [vmem:[%s9720_s3 + $0x10] sm:$0xff] }
   0x4   :  { %166 = vrot.lane.b32.xlu1 %v117_v3, %s7409_s21  ;;  %v118_v10 = vsel %vm115_vm0, %v116_v4, %v117_v3  ;;  %v122_v18 = vrot.slane %v7532_v15, 1  ;;  %v123_v19 = vrot.slane %v7537_v16, 1  ;;  %7021 = vmatprep.subr.mxu0 %v81_v20  ;;  %v80_v21 = vld [vmem:[%s9720_s3 + $0x8] sm:$0xff]  ;;  %v79_v22 = vld [vmem:[%s9720_s3] sm:$0xff]  ;;  %v267_v24 = vrot.slane %v7532_v15, 2  ;;  %v7561_v26 = vld [vmem:[%s9719_s0 + $0x30] sm:$0xff] }
   0x5   :  { %164 = vrot.lane.b32.xlu0 %v118_v10, %s7409_s21  ;;  %v121_v11 = vsel %vm115_vm0, %v119_v6, %v120_v8  ;;  %v263_v14 = vsel %vm260_vm1, %v261_v7, %v262_v9  ;;  %v266_v17 = vsel %vm260_vm1, %v264_v12, %v265_v13  ;;  %7022 = vmatpush3.msra.mxu0 %v81_v20  ;;  %v268_v25 = vrot.slane %v7537_v16, 2  ;;  %v7566_v27 = vld [vmem:[%s9719_s0 + $0x38] sm:$0xff]  ;;  %v7581_v34 = vld [vmem:[%s9719_s0 + $0x40] sm:$0xff]  ;;  %v7586_v35 = vld [vmem:[%s9719_s0 + $0x48] sm:$0xff]  ;;  %s7414_s23 = smov 48   ;;  %s7417_s19 = smov 64  }
   0x6   :  { %7023 = vmatprep.subr.mxu0 %v80_v21  ;;  %v124_v23 = vsel %vm115_vm0, %v122_v18, %v123_v19  ;;  %v125_v29 = vrot.slane %v7561_v26, 1  ;;  %v126_v30 = vrot.slane %v7566_v27, 1  ;;  %v270_v32 = vrot.slane %v7561_v26, 2  ;;  %v7601_v42 = vld [vmem:[%s9719_s0 + $0x50] sm:$0xff]  ;;  %v7606_v43 = vld [vmem:[%s9719_s0 + $0x58] sm:$0xff]  ;;  %v7621_v50 = vld [vmem:[%s9719_s0 + $0x60] sm:$0xff] }
   0x7   :  { %7024 = vmatpush3.msra.mxu0 %v80_v21  ;;  %v269_v28 = vsel %vm260_vm1, %v267_v24, %v268_v25  ;;  %v271_v33 = vrot.slane %v7566_v27, 2  ;;  %v128_v37 = vrot.slane %v7581_v34, 1  ;;  %v129_v38 = vrot.slane %v7586_v35, 1  ;;  %v7626_v51 = vld [vmem:[%s9719_s0 + $0x68] sm:$0xff]  ;;  %v7644_v59 = vld [vmem:[%s9719_s0 + $0x70] sm:$0xff]  ;;  %v7649_v60 = vld [vmem:[%s9719_s0 + $0x78] sm:$0xff] }
   0x8   :  { %168 = vrot.lane.b32.xlu1 %v121_v11, %s7409_s21  ;;  %7025 = vmatprep.subr.mxu0 %v79_v22  ;;  %v127_v31 = vsel %vm115_vm0, %v125_v29, %v126_v30  ;;  %v273_v40 = vrot.slane %v7581_v34, 2  ;;  %v274_v41 = vrot.slane %v7586_v35, 2  ;;  %v131_v45 = vrot.slane %v7601_v42, 1  ;;  %v7668_v11 = vld [vmem:[%s9719_s0 + $0x80] sm:$0xff]  ;;  %v7673_v12 = vld [vmem:[%s9719_s0 + $0x88] sm:$0xff]  ;;  %v3393_v20 = vld [vmem:[%s9721_s5 + $0x18] sm:$0xff] }
   0x9   :  { %309 = vrot.lane.b32.xlu0 %v263_v14, %s7410_s26  ;;  %7026 = vmatpush3.msra.mxu0 %v79_v22  ;;  %v272_v36 = vsel %vm260_vm1, %v270_v32, %v271_v33  ;;  %v130_v39 = vsel %vm115_vm0, %v128_v37, %v129_v38  ;;  %v132_v46 = vrot.slane %v7606_v43, 1  ;;  %v276_v48 = vrot.slane %v7601_v42, 2  ;;  %v3394_v18 = vld [vmem:[%s9721_s5 + $0x20] sm:$0xff]  ;;  %v3392_v22 = vld [vmem:[%s9721_s5 + $0x10] sm:$0xff]  ;;  %s7419_s3 = smov 96   ;;  %s7420_s24 = smov 80  }
   0xa   :  { %v275_v44 = vsel %vm260_vm1, %v273_v40, %v274_v41  ;;  %v277_v49 = vrot.slane %v7606_v43, 2  ;;  %v134_v52 = vrot.slane %v7621_v50, 1  ;;  %v135_v53 = vrot.slane %v7626_v51, 1  ;;  %7069 = vmatprep.subr.mxu1 %v3394_v18 }
   0xb   :  { %v133_v47 = vsel %vm115_vm0, %v131_v45, %v132_v46  ;;  %v279_v56 = vrot.slane %v7621_v50, 2  ;;  %v280_v57 = vrot.slane %v7626_v51, 2  ;;  %v3397_v61 = vrot.slane %v7504_v1, 3  ;;  %7070 = vmatpush3.msra.mxu1 %v3394_v18  ;;  %v7724_v45 = vld [vmem:[%s9719_s0 + $0x90] sm:$0xff] }
   0xc   :  { %313 = vrot.lane.b32.xlu1 %v266_v17, %s7410_s26  ;;  %v278_v54 = vsel %vm260_vm1, %v276_v48, %v277_v49  ;;  %v136_v55 = vsel %vm115_vm0, %v134_v52, %v135_v53  ;;  %v3398_v62 = vrot.slane %v7499_v0, 3  ;;  %v137_v63 = vrot.slane %v7644_v59, 1  ;;  %7071 = vmatprep.subr.mxu1 %v3393_v20 }
   0xd   :  { %311 = vrot.lane.b32.xlu0 %v262_v9, %s7410_s26  ;;  %v281_v58 = vsel %vm260_vm1, %v279_v56, %v280_v57  ;;  %v138_v3 = vrot.slane %v7649_v60, 1  ;;  %v3542_v6 = vrot.slane %v7504_v1, 4  ;;  %v3543_v7 = vrot.slane %v7499_v0, 4  ;;  %7072 = vmatpush3.msra.mxu1 %v3393_v20 }
   0xe   :  { %v3399_v4 = vsel %vm3396_vm2, %v3397_v61, %v3398_v62  ;;  %v282_v9 = vrot.slane %v7644_v59, 2  ;;  %v283_v10 = vrot.slane %v7649_v60, 2  ;;  %v140_v14 = vrot.slane %v7668_v11, 1  ;;  %7073 = vmatprep.subr.mxu1 %v3392_v22  ;;  %v7754_v61 = vld [vmem:[%s9719_s0 + $0xa8] sm:$0xff] }
   0xf   :  { %v141_v17 = vrot.slane %v7673_v12, 1  ;;  %7074 = vmatpush3.msra.mxu1 %v3392_v22  ;;  %v285_v24 = vrot.slane %v7668_v11, 2  ;;  %v3400_v29 = vrot.slane %v7509_v2, 3  ;;  %v3545_v32 = vrot.slane %v7509_v2, 4  ;;  %v7784_v22 = vld [vmem:[%s9719_s0 + $0xb0] sm:$0xff] }
  0x10   :  { %172 = vrot.lane.b32.xlu1 %v124_v23, %s7409_s21  ;;  %v3391_v23 = vld [vmem:[%s9721_s5 + $0x8] sm:$0xff]  ;;  %v3548_v40 = vrot.slane %v7532_v15, 4  ;;  %v143_v48 = vrot.slane %v7724_v45, 1  ;;  %v288_v52 = vrot.slane %v7724_v45, 2  ;;  %v3406_v56 = vrot.slane %v7561_v26, 3 }
  0x11   :  { %170 = vrot.lane.b32.xlu0 %v120_v8, %s7409_s21  ;;  %v139_v8 = vsel %vm115_vm0, %v137_v63, %v138_v3  ;;  %v142_v21 = vsel %vm115_vm0, %v140_v14, %v141_v17  ;;  %7075 = vmatprep.subr.mxu1 %v3391_v23  ;;  %v3410_v14 = vrot.slane %v7586_v35, 3  ;;  %vm438_vm5 = vcmask 130048  }
  0x12   :  { %7076 = vmatpush3.msra.mxu1 %v3391_v23  ;;  %v7789_v23 = vld [vmem:[%s9719_s0 + $0xb8] sm:$0xff]  ;;  %vm1583_vm6 = vcmask 195584   ;;  %vm3718_vm7 = vcmask 261120   ;;  %vm3835_vm8 = vcmask 326656   ;;  %vm3246_vm9 = vcmask 128000  }
  0x13   :  { %vm4466_vm10 = vcmask 1041409   ;;  %vm4468_vm11 = vcmask 1042434   ;;  %vm4470_vm12 = vcmask 1043459   ;;  %vm4472_vm13 = vcmask 1044484  }
  0x14   :  { %317 = vrot.lane.b32.xlu1 %v269_v28, %s7410_s26  ;;  %v3390_v28 = vld [vmem:[%s9721_s5] sm:$0xff]  ;;  %vm4474_vm14 = vcmask 1045509   ;;  %vm4476_vm15 = vcmask 1046534  }
  0x15   :  { %315 = vrot.lane.b32.xlu0 %v265_v13, %s7410_s26  ;;  %v3544_v13 = vsel %vm3541_vm3, %v3542_v6, %v3543_v7  ;;  %7077 = vmatprep.subr.mxu1 %v3390_v28  ;;  %v3551_v6 = vrot.slane %v7561_v26, 4 }
  0x16   :  { %7078 = vmatpush3.msra.mxu1 %v3390_v28  ;;  %v149_v28 = vrot.slane %v7784_v22, 1 }
  0x18   :  { %176 = vrot.lane.b32.xlu1 %v127_v31, %s7409_s21 }
  0x19   :  { %174 = vrot.lane.b32.xlu0 %v123_v19, %s7409_s21  ;;  %v284_v19 = vsel %vm260_vm1, %v282_v9, %v283_v10 }
  0x1c   :  { %321 = vrot.lane.b32.xlu1 %v272_v36, %s7410_s26 }
  0x1d   :  { %319 = vrot.lane.b32.xlu0 %v268_v25, %s7410_s26  ;;  %v286_v25 = vrot.slane %v7673_v12, 2 }
  0x1f   :  { %v287_v31 = vsel %vm260_vm1, %v285_v24, %v286_v25 }
  0x20   :  { %178 = vrot.lane.b32.xlu1 %v126_v30, %s7409_s21  ;;  %v3401_v30 = vrot.slane %v7516_v5, 3 }
  0x21   :  { %180 = vrot.lane.b32.xlu0 %v130_v39, %s7409_s21  ;;  %v3404_v39 = vrot.slane %v7537_v16, 3 }
  0x22   :  { %v3402_v36 = vsel %vm3396_vm2, %v3400_v29, %v3401_v30  ;;  %v150_v29 = vrot.slane %v7789_v23, 1 }
  0x24   :  { %323 = vrot.lane.b32.xlu1 %v271_v33, %s7410_s26  ;;  %v3546_v33 = vrot.slane %v7516_v5, 4 }
  0x25   :  { %325 = vrot.lane.b32.xlu0 %v275_v44, %s7410_s26 }
  0x26   :  { %v3547_v37 = vsel %vm3541_vm3, %v3545_v32, %v3546_v33  ;;  %v3555_v32 = vrot.slane %v7586_v35, 4 }
  0x28   :  { %182 = vrot.lane.b32.xlu1 %v129_v38, %s7409_s21  ;;  %v3403_v38 = vrot.slane %v7532_v15, 3 }
  0x29   :  { %184 = vrot.lane.b32.xlu0 %v133_v47, %s7409_s21 }
  0x2a   :  { %v3405_v44 = vsel %vm3396_vm2, %v3403_v38, %v3404_v39  ;;  %v294_v38 = vrot.slane %v7784_v22, 2 }
  0x2c   :  { %327 = vrot.lane.b32.xlu1 %v274_v41, %s7410_s26  ;;  %v3549_v41 = vrot.slane %v7537_v16, 4 }
  0x2d   :  { %329 = vrot.lane.b32.xlu0 %v278_v54, %s7410_s26 }
  0x2e   :  { %v3550_v47 = vsel %vm3541_vm3, %v3548_v40, %v3549_v41 }
  0x30   :  { %188 = vrot.lane.b32.xlu1 %v136_v55, %s7409_s21 }
  0x31   :  { %186 = vrot.lane.b32.xlu0 %v132_v46, %s7409_s21  ;;  %v7729_v46 = vld [vmem:[%s9719_s0 + $0x98] sm:$0xff] }
  0x34   :  { %333 = vrot.lane.b32.xlu1 %v281_v58, %s7410_s26  ;;  %v7749_v58 = vld [vmem:[%s9719_s0 + $0xa0] sm:$0xff] }
  0x35   :  { %331 = vrot.lane.b32.xlu0 %v277_v49, %s7410_s26  ;;  %v144_v49 = vrot.slane %v7729_v46, 1  ;;  %v146_v63 = vrot.slane %v7749_v58, 1  ;;  %v291_v9 = vrot.slane %v7749_v58, 2 }
  0x37   :  { %v145_v54 = vsel %vm115_vm0, %v143_v48, %v144_v49  ;;  %v7814_v48 = vld [vmem:[%s9719_s0 + $0xc0] sm:$0xff] }
  0x38   :  { %335 = vrot.lane.b32.xlu1 %v280_v57, %s7410_s26  ;;  %v3407_v57 = vrot.slane %v7566_v27, 3 }
  0x39   :  { %190 = vrot.lane.b32.xlu0 %v135_v53, %s7409_s21  ;;  %v289_v53 = vrot.slane %v7729_v46, 2 }
  0x3b   :  { %v290_v55 = vsel %vm260_vm1, %v288_v52, %v289_v53 }
  0x3c   :  { %3445 = vrot.lane.b32.xlu1 %v3399_v4, %s7411_s27 }
  0x3d   :  { %192 = vrot.lane.b32.xlu0 %v139_v8, %s7409_s21 }
  0x40   :  { %3590 = vrot.lane.b32.xlu1 %v3544_v13, %s7412_s16  ;;  %v3409_v13 = vrot.slane %v7581_v34, 3 }
  0x41   :  { %337 = vrot.lane.b32.xlu0 %v284_v19, %s7410_s26  ;;  %v7413_v19 = vmov 1983009808  }
  0x42   :  { %v3411_v18 = vsel %vm3396_vm2, %v3409_v13, %v3410_v14  ;;  %v510_v20 = vunpack.c.l.s4 %v7413_v19 }
  0x44   :  { %196 = vrot.lane.b32.xlu1 %v142_v21, %s7409_s21  ;;  %v512_v21 = vlaneseq  ;;  %v511_v24 = vunpack.c.0.s8 %v510_v20 }
  0x45   :  { %194 = vrot.lane.b32.xlu0 %v138_v3, %s7409_s21  ;;  %v147_v3 = vrot.slane %v7754_v61, 1 }
  0x47   :  { %v148_v4 = vsel %vm115_vm0, %v146_v63, %v147_v3 }
  0x48   :  { %3447 = vrot.lane.b32.xlu1 %v3398_v62, %s7411_s27  ;;  %v3408_v62 = vsel %vm3396_vm2, %v3406_v56, %v3407_v57 }
  0x49   :  { %339 = vrot.lane.b32.xlu0 %v283_v10, %s7410_s26  ;;  %v292_v10 = vrot.slane %v7754_v61, 2 }
  0x4c   :  { %341 = vrot.lane.b32.xlu1 %v287_v31, %s7410_s26  ;;  %v3554_v31 = vrot.slane %v7581_v34, 4 }
  0x4d   :  { %3449 = vrot.lane.b32.xlu0 %v3402_v36, %s7411_s27 }
  0x50   :  { %3594 = vrot.lane.b32.xlu1 %v3547_v37, %s7412_s16  ;;  %v151_v37 = vsel %vm115_vm0, %v149_v28, %v150_v29 }
  0x51   :  { %3592 = vrot.lane.b32.xlu0 %v3543_v7, %s7412_s16  ;;  %v3552_v7 = vrot.slane %v7566_v27, 4 }
  0x53   :  { %v3553_v8 = vsel %vm3541_vm3, %v3551_v6, %v3552_v7 }
  0x54   :  { %198 = vrot.lane.b32.xlu1 %v141_v17, %s7409_s21  ;;  %v293_v17 = vsel %vm260_vm1, %v291_v9, %v292_v10 }
  0x55   :  { %3453 = vrot.lane.b32.xlu0 %v3405_v44, %s7411_s27 }
  0x58   :  { %3598 = vrot.lane.b32.xlu1 %v3550_v47, %s7412_s16 }
  0x59   :  { %3451 = vrot.lane.b32.xlu0 %v3401_v30, %s7411_s27 }
  0x5c   :  { %343 = vrot.lane.b32.xlu1 %v286_v25, %s7410_s26  ;;  %v513_v25 = vshrl.u32 %v512_v21, 7 }
  0x5d   :  { %200 = vrot.lane.b32.xlu0 %v145_v54, %s7409_s21  ;;  %v3413_v54 = vrot.slane %v7606_v43, 3 }
  0x5e   :  { %v7799_v36 = vsub.s32 %v511_v24, %v513_v25 }
  0x60   :  { %345 = vrot.lane.b32.xlu1 %v290_v55, %s7410_s26 }
  0x61   :  { %3596 = vrot.lane.b32.xlu0 %v3546_v33, %s7412_s16 }
  0x64   :  { %202 = vrot.lane.b32.xlu1 %v144_v49, %s7409_s21  ;;  %v7819_v49 = vld [vmem:[%s9719_s0 + $0xc8] sm:$0xff] }
  0x65   :  { %3457 = vrot.lane.b32.xlu0 %v3408_v62, %s7411_s27  ;;  %v152_v62 = vrot.slane %v7814_v48, 1  ;;  %v153_v63 = vrot.slane %v7819_v49, 1 }
  0x68   :  { %3455 = vrot.lane.b32.xlu1 %v3404_v39, %s7411_s27  ;;  %v295_v39 = vrot.slane %v7789_v23, 2 }
  0x69   :  { %204 = vrot.lane.b32.xlu0 %v148_v4, %s7409_s21 }
  0x6c   :  { %347 = vrot.lane.b32.xlu1 %v289_v53, %s7410_s26 }
  0x6d   :  { %3602 = vrot.lane.b32.xlu0 %v3553_v8, %s7412_s16 }
  0x70   :  { %3459 = vrot.lane.b32.xlu1 %v3407_v57, %s7411_s27 }
  0x71   :  { %349 = vrot.lane.b32.xlu0 %v293_v17, %s7410_s26 }
  0x74   :  { %3461 = vrot.lane.b32.xlu1 %v3411_v18, %s7411_s27 }
  0x75   :  { %3600 = vrot.lane.b32.xlu0 %v3549_v41, %s7412_s16  ;;  %v3556_v41 = vsel %vm3541_vm3, %v3554_v31, %v3555_v32 }
  0x76   :  { %v167_v30 = vpop.permute.xlu1 %166 }
  0x77   :  { %v165_v33 = vpop.permute.xlu0 %164 }
  0x78   :  { %206 = vrot.lane.b32.xlu1 %v147_v3, %s7409_s21  ;;  %v406_v44 = vsel %vm405_vm4, %v7504_v1, %v165_v33  ;;  %v3412_v1 = vrot.slane %v7601_v42, 3  ;;  %v407_v3 = vsel %vm405_vm4, %v7499_v0, %v167_v30 }
  0x79   :  { %3604 = vrot.lane.b32.xlu0 %v3552_v7, %s7412_s16 }
  0x7a   :  { %v169_v40 = vpop.permute.xlu1 %168  ;;  %v3414_v0 = vsel %vm3396_vm2, %v3412_v1, %v3413_v54 }
  0x7b   :  { %v310_v47 = vpop.permute.xlu0 %309  ;;  %v408_v52 = vsel %vm405_vm4, %v7509_v2, %v169_v40  ;;  %v296_v2 = vsel %vm260_vm1, %v294_v38, %v295_v39  ;;  %v3557_v40 = vrot.slane %v7601_v42, 4 }
  0x7c   :  { %v7824_v53 = vsel %vm438_vm5, %v406_v44, %v310_v47  ;;  %208 = vrot.lane.b32.xlu1 %v151_v37, %s7409_s21 }
  0x7d   :  { %v508_v55 = vcombine.high %v7824_v53, %v7824_v53  ;;  %v515_v56 = vrot.slane %v7824_v53, %v7799_v36  ;;  %3606 = vrot.lane.b32.xlu0 %v3556_v41, %s7412_s16  ;;  %v3558_v41 = vrot.slane %v7606_v43, 4 }
  0x7e   :  { %v314_v57 = vpop.permute.xlu1 %313 }
  0x7f   :  { %v522_v4 = vrot.slane %v508_v55, %v7799_v36  ;;  %v523_v6 = vcombine.high %v515_v56, %v515_v56  ;;  %v7843_v7 = vsel %vm438_vm5, %v408_v52, %v314_v57  ;;  %v312_v8 = vpop.permute.xlu0 %311  ;;  %v3416_v57 = vrot.slane %v7626_v51, 3 }
  0x80   :  { %v541_v9 = vcombine.high %v7843_v7, %v7843_v7  ;;  %v548_v13 = vrot.slane %v7843_v7, %v7799_v36  ;;  %v7850_v17 = vsel %vm438_vm5, %v407_v3, %v312_v8  ;;  %353 = vrot.lane.b32.xlu1 %v296_v2, %s7410_s26  ;;  %v3415_v2 = vrot.slane %v7621_v50, 3 }
  0x81   :  { %v525_v18 = vcombine.high %v7850_v17, %v7850_v17  ;;  %v532_v19 = vrot.slane %v7850_v17, %v7799_v36  ;;  %351 = vrot.lane.b32.xlu0 %v292_v10, %s7410_s26  ;;  %v524_v20 = vcombine.high %v522_v4, %v522_v4  ;;  %v1053_v21 = vcombine.low %v515_v56, %v523_v6 }
  0x82   :  { %v555_v24 = vrot.slane %v541_v9, %v7799_v36  ;;  %v556_v25 = vcombine.high %v548_v13, %v548_v13  ;;  %v173_v28 = vpop.permute.xlu1 %172  ;;  %v154_v10 = vsel %vm115_vm0, %v152_v62, %v153_v63 }
  0x83   :  { %v539_v30 = vrot.slane %v525_v18, %v7799_v36  ;;  %v540_v31 = vcombine.high %v532_v19, %v532_v19  ;;  %v171_v33 = vpop.permute.xlu0 %170  ;;  %v1054_v37 = vcombine.low %v522_v4, %v524_v20  ;;  %v410_v38 = vsel %vm405_vm4, %v7532_v15, %v173_v28 }
  0x84   :  { %3465 = vrot.lane.b32.xlu1 %v3414_v0, %s7411_s27  ;;  %v1061_v52 = vrot.slane %v1053_v21, %v7799_v36  ;;  %v1087_v1 = vcombine.low %v556_v25, %v555_v24  ;;  %v409_v55 = vsel %vm405_vm4, %v7516_v5, %v171_v33  ;;  %v557_v9 = vcombine.high %v555_v24, %v555_v24 }
  0x85   :  { %v1070_v44 = vcombine.low %v532_v19, %v540_v31  ;;  %v1071_v47 = vcombine.low %v539_v30, %v548_v13  ;;  %3463 = vrot.lane.b32.xlu0 %v3410_v14, %s7411_s27  ;;  %v1068_v15 = vrot.slane %v1054_v37, %v7799_v36  ;;  %v297_v20 = vrot.slane %v7814_v48, 2 }
  0x86   :  { %v318_v56 = vpop.permute.xlu1 %317  ;;  %v298_v28 = vrot.slane %v7819_v49, 2 }
  0x87   :  { %v1078_v62 = vrot.slane %v1070_v44, %v7799_v36  ;;  %v7882_v3 = vsel %vm438_vm5, %v410_v38, %v318_v56  ;;  %v316_v4 = vpop.permute.xlu0 %315  ;;  %v1069_v14 = vcombine.low %v1061_v52, %v1068_v15  ;;  %v1085_v6 = vrot.slane %v1071_v47, %v7799_v36 }
  0x88   :  { %v574_v8 = vcombine.high %v7882_v3, %v7882_v3  ;;  %v581_v5 = vrot.slane %v7882_v3, %v7799_v36  ;;  %v7890_v13 = vsel %vm438_vm5, %v409_v55, %v316_v4  ;;  %3608 = vrot.lane.b32.xlu1 %v3555_v32, %s7412_s16  ;;  %v3559_v32 = vsel %vm3541_vm3, %v3557_v40, %v3558_v41 }
  0x89   :  { %v558_v0 = vcombine.high %v7890_v13, %v7890_v13  ;;  %v565_v18 = vrot.slane %v7890_v13, %v7799_v36  ;;  %212 = vrot.lane.b32.xlu0 %v154_v10, %s7409_s21  ;;  %7027 = vmatprep.mubr.msk.f32.mxu0 %vm1583_vm6, %v1069_v14  ;;  %v1086_v19 = vcombine.low %v1078_v62, %v1085_v6  ;;  %v7928_v62 = vld [vmem:[%s9719_s0 + $0xd0] sm:$0xff] }
  0x8a   :  { %v588_v21 = vrot.slane %v574_v8, %v7799_v36  ;;  %v589_v24 = vcombine.high %v581_v5, %v581_v5  ;;  %v177_v25 = vpop.permute.xlu1 %176  ;;  %v3417_v47 = vsel %vm3396_vm2, %v3415_v2, %v3416_v57  ;;  %v1095_v52 = vrot.slane %v1087_v1, %v7799_v36  ;;  %v7939_v8 = vld [vmem:[%s9719_s0 + $0xd8] sm:$0xff] }
  0x8b   :  { %v572_v30 = vrot.slane %v558_v0, %v7799_v36  ;;  %v573_v31 = vcombine.high %v565_v18, %v565_v18  ;;  %v1088_v33 = vcombine.low %v557_v9, %v565_v18  ;;  %7028 = vmatmul.mubr.msk.f32.vlgmr.msra.gmra.mxu0 %vm1583_vm6, %v1086_v19  ;;  %v175_v37 = vpop.permute.xlu0 %174  ;;  %v412_v10 = vsel %vm405_vm4, %v7561_v26, %v177_v25 }
  0x8c   :  { %v1105_v38 = vcombine.low %v581_v5, %v589_v24  ;;  %210 = vrot.lane.b32.xlu1 %v150_v29, %s7409_s21  ;;  %v590_v15 = vcombine.high %v588_v21, %v588_v21  ;;  %v299_v26 = vsel %vm260_vm1, %v297_v20, %v298_v28  ;;  %v3560_v29 = vrot.slane %v7621_v50, 4 }
  0x8d   :  { %v1102_v44 = vrot.slane %v1088_v33, %v7799_v36  ;;  %v1104_v40 = vcombine.low %v573_v31, %v572_v30  ;;  %3610 = vrot.lane.b32.xlu0 %v3559_v32, %s7412_s16  ;;  %v411_v2 = vsel %vm405_vm4, %v7537_v16, %v175_v37  ;;  %v3561_v0 = vrot.slane %v7626_v51, 4 }
  0x8e   :  { %v1119_v55 = vrot.slane %v1105_v38, %v7799_v36  ;;  %v322_v56 = vpop.permute.xlu1 %321  ;;  %v155_v24 = vrot.slane %v7928_v62, 1  ;;  %v1121_v25 = vcombine.low %v588_v21, %v590_v15  ;;  %v156_v33 = vrot.slane %v7939_v8, 1 }
  0x8f   :  { %v7933_v1 = vsel %vm438_vm5, %v412_v10, %v322_v56  ;;  %v320_v4 = vpop.permute.xlu0 %319  ;;  %v1103_v14 = vcombine.low %v1095_v52, %v1102_v44  ;;  %v1112_v6 = vrot.slane %v1104_v40, %v7799_v36  ;;  %v3418_v21 = vrot.slane %v7644_v59, 3 }
  0x90   :  { %v607_v5 = vcombine.high %v7933_v1, %v7933_v1  ;;  %v614_v9 = vrot.slane %v7933_v1, %v7799_v36  ;;  %v7946_v16 = vsel %vm438_vm5, %v411_v2, %v320_v4  ;;  %3469 = vrot.lane.b32.xlu1 %v3417_v47, %s7411_s27  ;;  %v3562_v15 = vsel %vm3541_vm3, %v3560_v29, %v3561_v0 }
  0x91   :  { %v591_v18 = vcombine.high %v7946_v16, %v7946_v16  ;;  %v598_v19 = vrot.slane %v7946_v16, %v7799_v36  ;;  %357 = vrot.lane.b32.xlu0 %v299_v26, %s7410_s26  ;;  %7030 = vmatprep.mubr.msk.f32.mxu0 %vm1583_vm6, %v1103_v14  ;;  %v1120_v20 = vcombine.low %v1112_v6, %v1119_v55  ;;  %v3419_v55 = vrot.slane %v7649_v60, 3 }
  0x92   :  { %v621_v32 = vrot.slane %v607_v5, %v7799_v36  ;;  %v622_v30 = vcombine.high %v614_v9, %v614_v9  ;;  %v179_v31 = vpop.permute.xlu1 %178  ;;  %v300_v2 = vrot.slane %v7928_v62, 2 }
  0x93   :  { %v605_v37 = vrot.slane %v591_v18, %v7799_v36  ;;  %v606_v38 = vcombine.high %v598_v19, %v598_v19  ;;  %7031 = vmatmul.mubr.msk.f32.gmra.mxu0 %vm1583_vm6, %v1120_v20  ;;  %v181_v10 = vpop.permute.xlu0 %180  ;;  %v413_v40 = vsel %vm405_vm4, %v7566_v27, %v179_v31  ;;  %v1129_v27 = vrot.slane %v1121_v25, %v7799_v36 }
  0x94   :  { %v1139_v44 = vcombine.low %v622_v30, %v621_v32  ;;  %3467 = vrot.lane.b32.xlu1 %v3413_v54, %s7411_s27  ;;  %v157_v54 = vsel %vm115_vm0, %v155_v24, %v156_v33  ;;  %v623_v5 = vcombine.high %v621_v32, %v621_v32 }
  0x95   :  { %v1122_v47 = vcombine.low %v598_v19, %v606_v38  ;;  %v1138_v52 = vcombine.low %v605_v37, %v614_v9  ;;  %355 = vrot.lane.b32.xlu0 %v295_v39, %s7410_s26  ;;  %v414_v39 = vsel %vm405_vm4, %v7581_v34, %v181_v10  ;;  %v301_v38 = vrot.slane %v7939_v8, 2 }
  0x96   :  { %v324_v56 = vpop.permute.xlu1 %323  ;;  %v1153_v26 = vrot.slane %v1139_v44, %v7799_v36 }
  0x97   :  { %v1136_v4 = vrot.slane %v1122_v47, %v7799_v36  ;;  %v7984_v29 = vsel %vm438_vm5, %v413_v40, %v324_v56  ;;  %v326_v14 = vpop.permute.xlu0 %325  ;;  %v1146_v6 = vrot.slane %v1138_v52, %v7799_v36  ;;  %v3420_v56 = vsel %vm3396_vm2, %v3418_v21, %v3419_v55 }
  0x98   :  { %v624_v9 = vcombine.high %v7984_v29, %v7984_v29  ;;  %v631_v18 = vrot.slane %v7984_v29, %v7799_v36  ;;  %v7992_v19 = vsel %vm438_vm5, %v414_v39, %v326_v14  ;;  %3612 = vrot.lane.b32.xlu1 %v3558_v41, %s7412_s16 }
  0x99   :  { %v640_v34 = vcombine.high %v7992_v19, %v7992_v19  ;;  %v647_v20 = vrot.slane %v7992_v19, %v7799_v36  ;;  %3614 = vrot.lane.b32.xlu0 %v3562_v15, %s7412_s16  ;;  %v1137_v24 = vcombine.low %v1129_v27, %v1136_v4  ;;  %v1154_v25 = vcombine.low %v1146_v6, %v1153_v26 }
  0x9a   :  { %v638_v32 = vrot.slane %v624_v9, %v7799_v36  ;;  %v639_v30 = vcombine.high %v631_v18, %v631_v18  ;;  %v1155_v31 = vcombine.low %v623_v5, %v631_v18  ;;  %v183_v37 = vpop.permute.xlu1 %182 }
  0x9b   :  { %v654_v10 = vrot.slane %v640_v34, %v7799_v36  ;;  %v655_v41 = vcombine.high %v647_v20, %v647_v20  ;;  %7033 = vmatprep.mubr.msk.f32.mxu0 %vm1583_vm6, %v1137_v24  ;;  %v185_v44 = vpop.permute.xlu0 %184  ;;  %v415_v47 = vsel %vm405_vm4, %v7586_v35, %v183_v37  ;;  %v302_v35 = vsel %vm260_vm1, %v300_v2, %v301_v38 }
  0x9c   :  { %v1156_v40 = vcombine.low %v639_v30, %v638_v32  ;;  %214 = vrot.lane.b32.xlu1 %v153_v63, %s7409_s21  ;;  %7034 = vmatmul.mubr.msk.f32.gmra.mxu0 %vm1583_vm6, %v1154_v25  ;;  %v1163_v27 = vrot.slane %v1155_v31, %v7799_v36  ;;  %v416_v39 = vsel %vm405_vm4, %v7601_v42, %v185_v44  ;;  %v3563_v32 = vrot.slane %v7644_v59, 4 }
  0x9d   :  { %v656_v52 = vcombine.high %v654_v10, %v654_v10  ;;  %v1172_v15 = vcombine.low %v647_v20, %v655_v41  ;;  %216 = vrot.lane.b32.xlu0 %v157_v54, %s7409_s21  ;;  %v3564_v30 = vrot.slane %v7649_v60, 4 }
  0x9e   :  { %v328_v26 = vpop.permute.xlu1 %327  ;;  %v1170_v4 = vrot.slane %v1156_v40, %v7799_v36 }
  0x9f   :  { %v1173_v63 = vcombine.low %v654_v10, %v656_v52  ;;  %v8024_v14 = vsel %vm438_vm5, %v415_v47, %v328_v26  ;;  %v330_v54 = vpop.permute.xlu0 %329  ;;  %v1180_v9 = vrot.slane %v1172_v15, %v7799_v36 }
  0xa0   :  { %v657_v21 = vcombine.high %v8024_v14, %v8024_v14  ;;  %v664_v6 = vrot.slane %v8024_v14, %v7799_v36  ;;  %v8031_v5 = vsel %vm438_vm5, %v416_v39, %v330_v54  ;;  %3473 = vrot.lane.b32.xlu1 %v3420_v56, %s7411_s27  ;;  %v1171_v2 = vcombine.low %v1163_v27, %v1170_v4  ;;  %v8070_v4 = vld [vmem:[%s9719_s0 + $0xe0] sm:$0xff] }
  0xa1   :  { %v673_v42 = vcombine.high %v8031_v5, %v8031_v5  ;;  %v680_v18 = vrot.slane %v8031_v5, %v7799_v36  ;;  %361 = vrot.lane.b32.xlu0 %v302_v35, %s7410_s26  ;;  %v1187_v34 = vrot.slane %v1173_v63, %v7799_v36  ;;  %v3422_v35 = vrot.slane %v7673_v12, 3  ;;  %v8075_v63 = vld [vmem:[%s9719_s0 + $0xe8] sm:$0xff] }
  0xa2   :  { %v671_v20 = vrot.slane %v657_v21, %v7799_v36  ;;  %v672_v24 = vcombine.high %v664_v6, %v664_v6  ;;  %v189_v25 = vpop.permute.xlu1 %188  ;;  %7036 = vmatprep.mubr.msk.f32.mxu0 %vm1583_vm6, %v1171_v2 }
  0xa3   :  { %v187_v31 = vpop.permute.xlu0 %186  ;;  %v1188_v37 = vcombine.low %v1180_v9, %v1187_v34  ;;  %v418_v44 = vsel %vm405_vm4, %v7621_v50, %v189_v25  ;;  %v687_v40 = vrot.slane %v673_v42, %v7799_v36  ;;  %v688_v47 = vcombine.high %v680_v18, %v680_v18 }
  0xa4   :  { %v1189_v10 = vcombine.low %v664_v6, %v672_v24  ;;  %v1190_v41 = vcombine.low %v671_v20, %v680_v18  ;;  %3471 = vrot.lane.b32.xlu1 %v3416_v57, %s7411_s27  ;;  %v3565_v50 = vsel %vm3541_vm3, %v3563_v32, %v3564_v30  ;;  %v417_v57 = vsel %vm405_vm4, %v7606_v43, %v187_v31 }
  0xa5   :  { %359 = vrot.lane.b32.xlu0 %v298_v28, %s7410_s26  ;;  %7037 = vmatmul.mubr.msk.f32.gmra.mxu0 %vm1583_vm6, %v1188_v37  ;;  %v3421_v28 = vrot.slane %v7668_v11, 3  ;;  %v1206_v6 = vcombine.low %v688_v47, %v687_v40  ;;  %v689_v2 = vcombine.high %v687_v40, %v687_v40  ;;  %v158_v24 = vrot.slane %v8070_v4, 1 }
  0xa6   :  { %v1197_v52 = vrot.slane %v1189_v10, %v7799_v36  ;;  %v1204_v15 = vrot.slane %v1190_v41, %v7799_v36  ;;  %v334_v56 = vpop.permute.xlu1 %333 }
  0xa7   :  { %v8063_v27 = vsel %vm438_vm5, %v418_v44, %v334_v56  ;;  %v332_v26 = vpop.permute.xlu0 %331  ;;  %v3423_v40 = vsel %vm3396_vm2, %v3421_v28, %v3422_v35  ;;  %v1214_v56 = vrot.slane %v1206_v6, %v7799_v36  ;;  %v3566_v6 = vrot.slane %v7668_v11, 4 }
  0xa8   :  { %v706_v43 = vcombine.high %v8063_v27, %v8063_v27  ;;  %v713_v39 = vrot.slane %v8063_v27, %v7799_v36  ;;  %v8082_v54 = vsel %vm438_vm5, %v417_v57, %v332_v26  ;;  %3475 = vrot.lane.b32.xlu1 %v3419_v55, %s7411_s27  ;;  %v1205_v21 = vcombine.low %v1197_v52, %v1204_v15 }
  0xa9   :  { %v690_v9 = vcombine.high %v8082_v54, %v8082_v54  ;;  %v697_v42 = vrot.slane %v8082_v54, %v7799_v36  ;;  %3618 = vrot.lane.b32.xlu0 %v3565_v50, %s7412_s16  ;;  %v159_v55 = vrot.slane %v8075_v63, 1 }
  0xaa   :  { %v720_v18 = vrot.slane %v706_v43, %v7799_v36  ;;  %v721_v34 = vcombine.high %v713_v39, %v713_v39  ;;  %v336_v20 = vpop.permute.xlu1 %335  ;;  %7039 = vmatprep.mubr.msk.f32.mxu0 %vm1583_vm6, %v1205_v21 }
  0xab   :  { %v704_v25 = vrot.slane %v690_v9, %v7799_v36  ;;  %v705_v32 = vcombine.high %v697_v42, %v697_v42  ;;  %v1207_v31 = vcombine.low %v689_v2, %v697_v42  ;;  %v191_v37 = vpop.permute.xlu0 %190  ;;  %v160_v26 = vsel %vm115_vm0, %v158_v24, %v159_v55 }
  0xac   :  { %v722_v10 = vcombine.high %v720_v18, %v720_v18  ;;  %v1224_v41 = vcombine.low %v713_v39, %v721_v34  ;;  %v419_v44 = vsel %vm405_vm4, %v7626_v51, %v191_v37  ;;  %218 = vrot.lane.b32.xlu1 %v156_v33, %s7409_s21  ;;  %v3567_v9 = vrot.slane %v7673_v12, 4 }
  0xad   :  { %v1221_v47 = vrot.slane %v1207_v31, %v7799_v36  ;;  %v1223_v52 = vcombine.low %v705_v32, %v704_v25  ;;  %v8107_v15 = vsel %vm438_vm5, %v419_v44, %v336_v20  ;;  %3616 = vrot.lane.b32.xlu0 %v3561_v0, %s7412_s16  ;;  %v303_v20 = vrot.slane %v8070_v4, 2 }
  0xae   :  { %v1238_v50 = vrot.slane %v1224_v41, %v7799_v36  ;;  %v730_v33 = vrot.slane %v8107_v15, %v7799_v36  ;;  %v3446_v57 = vpop.permute.xlu1 %3445  ;;  %v1240_v21 = vcombine.low %v720_v18, %v722_v10  ;;  %v723_v51 = vcombine.high %v8107_v15, %v8107_v15 }
  0xaf   :  { %v193_v28 = vpop.permute.xlu0 %192  ;;  %v1222_v43 = vcombine.low %v1214_v56, %v1221_v47  ;;  %v1231_v39 = vrot.slane %v1223_v52, %v7799_v36  ;;  %v3686_v18 = vsel %vm1583_vm6, %v7824_v53, %v3446_v57  ;;  %v304_v24 = vrot.slane %v8075_v63, 2 }
  0xb0   :  { %v738_v2 = vcombine.high %v730_v33, %v730_v33  ;;  %3477 = vrot.lane.b32.xlu1 %v3423_v40, %s7411_s27  ;;  %v420_v25 = vsel %vm405_vm4, %v7644_v59, %v193_v28  ;;  %v1248_v53 = vrot.slane %v1240_v21, %v7799_v36  ;;  %v737_v44 = vrot.slane %v723_v51, %v7799_v36  ;;  %v8165_v21 = vld [vmem:[%s9719_s0 + $0xf0] sm:$0xff] }
  0xb1   :  { %220 = vrot.lane.b32.xlu0 %v160_v26, %s7409_s21  ;;  %7040 = vmatmul.mubr.msk.f32.gmra.mxu0 %vm1583_vm6, %v1222_v43  ;;  %v1239_v0 = vcombine.low %v1231_v39, %v1238_v50  ;;  %v305_v50 = vsel %vm260_vm1, %v303_v20, %v304_v24  ;;  %v3425_v43 = vrot.slane %v7729_v46, 3 }
  0xb2   :  { %v1241_v42 = vcombine.low %v730_v33, %v738_v2  ;;  %v3591_v34 = vpop.permute.xlu1 %3590  ;;  %v8170_v2 = vld [vmem:[%s9719_s0 + $0xf8] sm:$0xff] }
  0xb3   :  { %v3719_v32 = vsel %vm3718_vm7, %v3686_v18, %v3591_v34  ;;  %7042 = vmatprep.mubr.msk.f32.mxu0 %vm1583_vm6, %v1239_v0  ;;  %v338_v31 = vpop.permute.xlu0 %337 }
  0xb4   :  { %v3788_v37 = vcombine.high %v3719_v32, %v3719_v32  ;;  %v8136_v10 = vsel %vm438_vm5, %v420_v25, %v338_v31  ;;  %363 = vrot.lane.b32.xlu1 %v301_v38, %s7410_s26  ;;  %v1255_v41 = vrot.slane %v1241_v42, %v7799_v36  ;;  %v3568_v38 = vsel %vm3541_vm3, %v3566_v6, %v3567_v9 }
  0xb5   :  { %v739_v59 = vcombine.high %v8136_v10, %v8136_v10  ;;  %v746_v40 = vrot.slane %v8136_v10, %v7799_v36  ;;  %3620 = vrot.lane.b32.xlu0 %v3564_v30, %s7412_s16  ;;  %v3424_v30 = vrot.slane %v7724_v45, 3  ;;  %v161_v25 = vrot.slane %v8165_v21, 1 }
  0xb6   :  { %v197_v47 = vpop.permute.xlu1 %196  ;;  %v1256_v52 = vcombine.low %v1248_v53, %v1255_v41  ;;  %v3805_v56 = vcombine.low %v3719_v32, %v3788_v37  ;;  %v162_v32 = vrot.slane %v8170_v2, 1 }
  0xb7   :  { %v753_v33 = vrot.slane %v739_v59, %v7799_v36  ;;  %v754_v57 = vcombine.high %v746_v40, %v746_v40  ;;  %v1257_v26 = vcombine.low %v737_v44, %v746_v40  ;;  %v195_v28 = vpop.permute.xlu0 %194  ;;  %v3426_v20 = vsel %vm3396_vm2, %v3424_v30, %v3425_v43 }
  0xb8   :  { %3622 = vrot.lane.b32.xlu1 %v3568_v38, %s7412_s16  ;;  %7043 = vmatmul.mubr.msk.f32.gmra.mxu0 %vm1583_vm6, %v1256_v52  ;;  %v421_v6 = vsel %vm405_vm4, %v7649_v60, %v195_v28  ;;  %v422_v53 = vsel %vm405_vm4, %v7668_v11, %v197_v47  ;;  %v163_v11 = vsel %vm115_vm0, %v161_v25, %v162_v32  ;;  %vm4478_vm0 = vcmask 1047559  }
  0xb9   :  { %v1258_v39 = vcombine.low %v754_v57, %v753_v33  ;;  %7079 = vmatprep.mubr.msk.f32.mxu1 %vm3835_vm8, %v3805_v56  ;;  %365 = vrot.lane.b32.xlu0 %v305_v50, %s7410_s26  ;;  %v1265_v0 = vrot.slane %v1257_v26, %v7799_v36  ;;  %v755_v31 = vcombine.high %v753_v33, %v753_v33  ;;  %v306_v50 = vrot.slane %v8165_v21, 2 }
  0xba   :  { %v3448_v51 = vpop.permute.xlu1 %3447  ;;  %v307_v33 = vrot.slane %v8170_v2, 2  ;;  %v3569_v57 = vrot.slane %v7724_v45, 4 }
  0xbb   :  { %v340_v42 = vpop.permute.xlu0 %339  ;;  %v1272_v18 = vrot.slane %v1258_v39, %v7799_v36 }
  0xbc   :  { %v8177_v34 = vsel %vm438_vm5, %v421_v6, %v340_v42  ;;  %367 = vrot.lane.b32.xlu1 %v304_v24, %s7410_s26  ;;  %v3687_v6 = vsel %vm1583_vm6, %v7850_v17, %v3448_v51  ;;  %v308_v17 = vsel %vm260_vm1, %v306_v50, %v307_v33  ;;  %vm4254_vm1 = vcmask 125952  }
  0xbd   :  { %v756_v60 = vcombine.high %v8177_v34, %v8177_v34  ;;  %v763_v37 = vrot.slane %v8177_v34, %v7799_v36  ;;  %222 = vrot.lane.b32.xlu0 %v159_v55, %s7409_s21  ;;  %v1273_v24 = vcombine.low %v1265_v0, %v1272_v18  ;;  %v3570_v0 = vrot.slane %v7729_v46, 4 }
  0xbe   :  { %v342_v41 = vpop.permute.xlu1 %341 }
  0xbf   :  { %v770_v44 = vrot.slane %v756_v60, %v7799_v36  ;;  %v771_v59 = vcombine.high %v763_v37, %v763_v37  ;;  %v1274_v40 = vcombine.low %v755_v31, %v763_v37  ;;  %v8196_v38 = vsel %vm438_vm5, %v422_v53, %v342_v41  ;;  %7045 = vmatprep.mubr.msk.f32.mxu0 %vm1583_vm6, %v1273_v24  ;;  %v3450_v52 = vpop.permute.xlu0 %3449 }
  0xc0   :  { %v772_v56 = vcombine.high %v8196_v38, %v8196_v38  ;;  %v779_v55 = vrot.slane %v8196_v38, %v7799_v36  ;;  %3481 = vrot.lane.b32.xlu1 %v3426_v20, %s7411_s27  ;;  %v3688_v30 = vsel %vm1583_vm6, %v7843_v7, %v3450_v52  ;;  %v3571_v53 = vsel %vm3541_vm3, %v3569_v57, %v3570_v0 }
  0xc1   :  { %v1275_v47 = vcombine.low %v771_v59, %v770_v44  ;;  %3479 = vrot.lane.b32.xlu0 %v3422_v35, %s7411_s27  ;;  %v1282_v35 = vrot.slane %v1274_v40, %v7799_v36  ;;  %v3427_v41 = vrot.slane %v7749_v58, 3  ;;  %v3428_v44 = vrot.slane %v7754_v61, 3 }
  0xc2   :  { %v786_v26 = vrot.slane %v772_v56, %v7799_v36  ;;  %v787_v28 = vcombine.high %v779_v55, %v779_v55  ;;  %v3595_v39 = vpop.permute.xlu1 %3594  ;;  %v3572_v52 = vrot.slane %v7749_v58, 4  ;;  %v3573_v56 = vrot.slane %v7754_v61, 4 }
  0xc3   :  { %v3721_v42 = vsel %vm3718_vm7, %v3688_v30, %v3595_v39  ;;  %v3593_v18 = vpop.permute.xlu0 %3592  ;;  %v1289_v20 = vrot.slane %v1275_v47, %v7799_v36  ;;  %v3429_v47 = vsel %vm3396_vm2, %v3427_v41, %v3428_v44 }
  0xc4   :  { %v788_v25 = vcombine.high %v786_v26, %v786_v26  ;;  %v1291_v31 = vcombine.low %v779_v55, %v787_v28  ;;  %v3720_v60 = vsel %vm3718_vm7, %v3687_v6, %v3593_v18  ;;  %3624 = vrot.lane.b32.xlu1 %v3567_v9, %s7412_s16  ;;  %v3574_v57 = vsel %vm3541_vm3, %v3572_v52, %v3573_v56 }
  0xc5   :  { %v3806_v7 = vcombine.low %v3720_v60, %v3721_v42  ;;  %224 = vrot.lane.b32.xlu0 %v163_v11, %s7409_s21  ;;  %v1290_v37 = vcombine.low %v1282_v35, %v1289_v20  ;;  %v3576_v52 = vrot.slane %v7789_v23, 4 }
  0xc6   :  { %v1292_v51 = vcombine.low %v786_v26, %v788_v25  ;;  %v199_v24 = vpop.permute.xlu1 %198  ;;  %v1299_v59 = vrot.slane %v1291_v31, %v7799_v36 }
  0xc7   :  { %7046 = vmatmul.mubr.msk.f32.gmra.mxu0 %vm1583_vm6, %v1290_v37  ;;  %7080 = vmatmul.mubr.msk.f32.vlgmr.msra.gmra.mxu1 %vm3835_vm8, %v3806_v7  ;;  %v3454_v9 = vpop.permute.xlu0 %3453  ;;  %v423_v26 = vsel %vm405_vm4, %v7673_v12, %v199_v24  ;;  %v3430_v12 = vrot.slane %v7784_v22, 3  ;;  %v3789_v7 = vcombine.high %v3721_v42, %v3721_v42 }
  0xc8   :  { %369 = vrot.lane.b32.xlu1 %v308_v17, %s7410_s26  ;;  %v1306_v40 = vrot.slane %v1292_v51, %v7799_v36  ;;  %v3690_v28 = vsel %vm1583_vm6, %v7882_v3, %v3454_v9  ;;  %v3431_v3 = vrot.slane %v7789_v23, 3  ;;  %v3434_v23 = vrot.slane %v7819_v49, 3 }
  0xc9   :  { %3626 = vrot.lane.b32.xlu0 %v3571_v53, %s7412_s16 }
  0xca   :  { %v3599_v55 = vpop.permute.xlu1 %3598  ;;  %v1307_v11 = vcombine.low %v1299_v59, %v1306_v40  ;;  %v3575_v40 = vrot.slane %v7784_v22, 4 }
  0xcb   :  { %v3452_v50 = vpop.permute.xlu0 %3451  ;;  %v3723_v39 = vsel %vm3718_vm7, %v3690_v28, %v3599_v55 }
  0xcc   :  { %226 = vrot.lane.b32.xlu1 %v162_v32, %s7409_s21  ;;  %7048 = vmatprep.mubr.msk.f32.mxu0 %vm1583_vm6, %v1307_v11  ;;  %v3790_v20 = vcombine.high %v3723_v39, %v3723_v39  ;;  %v3689_v37 = vsel %vm1583_vm6, %v7890_v13, %v3452_v50  ;;  %v3432_v13 = vsel %vm3396_vm2, %v3430_v12, %v3431_v3 }
  0xcd   :  { %3485 = vrot.lane.b32.xlu0 %v3429_v47, %s7411_s27 }
  0xce   :  { %v344_v30 = vpop.permute.xlu1 %343  ;;  %v3808_v42 = vcombine.low %v3723_v39, %v3790_v20 }
  0xcf   :  { %v8252_v6 = vsel %vm438_vm5, %v423_v26, %v344_v30  ;;  %v201_v32 = vpop.permute.xlu0 %200  ;;  %v3577_v26 = vsel %vm3541_vm3, %v3575_v40, %v3576_v52 }
  0xd0   :  { %v789_v35 = vcombine.high %v8252_v6, %v8252_v6  ;;  %v796_v18 = vrot.slane %v8252_v6, %v7799_v36  ;;  %3630 = vrot.lane.b32.xlu1 %v3574_v57, %s7412_s16  ;;  %v424_v31 = vsel %vm405_vm4, %v7724_v45, %v201_v32  ;;  %v3578_v32 = vrot.slane %v7814_v48, 4 }
  0xd1   :  { %3483 = vrot.lane.b32.xlu0 %v3425_v43, %s7411_s27 }
  0xd2   :  { %v804_v25 = vcombine.high %v796_v18, %v796_v18  ;;  %v346_v60 = vpop.permute.xlu1 %345  ;;  %v803_v43 = vrot.slane %v789_v35, %v7799_v36  ;;  %v3579_v35 = vrot.slane %v7819_v49, 4  ;;  %v3437_v49 = vrot.slane %v7939_v8, 3 }
  0xd3   :  { %v8269_v17 = vsel %vm438_vm5, %v424_v31, %v346_v60  ;;  %v3597_v51 = vpop.permute.xlu0 %3596 }
  0xd4   :  { %v1308_v24 = vcombine.low %v796_v18, %v804_v25  ;;  %v812_v53 = vrot.slane %v8269_v17, %v7799_v36  ;;  %v3722_v41 = vsel %vm3718_vm7, %v3689_v37, %v3597_v51  ;;  %3628 = vrot.lane.b32.xlu1 %v3570_v0, %s7412_s16  ;;  %v805_v0 = vcombine.high %v8269_v17, %v8269_v17 }
  0xd5   :  { %v3807_v45 = vcombine.low %v3789_v7, %v3722_v41  ;;  %371 = vrot.lane.b32.xlu0 %v307_v33, %s7410_s26  ;;  %v3433_v33 = vrot.slane %v7814_v48, 3  ;;  %v3436_v48 = vrot.slane %v7928_v62, 3 }
  0xd6   :  { %v1309_v9 = vcombine.low %v803_v43, %v812_v53  ;;  %v203_v59 = vpop.permute.xlu1 %202  ;;  %v1316_v11 = vrot.slane %v1308_v24, %v7799_v36  ;;  %v819_v30 = vrot.slane %v805_v0, %v7799_v36  ;;  %v820_v39 = vcombine.high %v812_v53, %v812_v53 }
  0xd7   :  { %7082 = vmatprep.mubr.msk.f32.mxu1 %vm3835_vm8, %v3807_v45  ;;  %v3458_v55 = vpop.permute.xlu0 %3457  ;;  %v425_v18 = vsel %vm405_vm4, %v7729_v46, %v203_v59  ;;  %v3580_v46 = vsel %vm3541_vm3, %v3578_v32, %v3579_v35 }
  0xd8   :  { %v1323_v47 = vrot.slane %v1309_v9, %v7799_v36  ;;  %3487 = vrot.lane.b32.xlu1 %v3428_v44, %s7411_s27  ;;  %7083 = vmatmul.mubr.msk.f32.gmra.mxu1 %vm3835_vm8, %v3808_v42  ;;  %v3435_v44 = vsel %vm3396_vm2, %v3433_v33, %v3434_v23  ;;  %v1325_v31 = vcombine.low %v820_v39, %v819_v30  ;;  %v3581_v42 = vrot.slane %v7928_v62, 4 }
  0xd9   :  { %3489 = vrot.lane.b32.xlu0 %v3432_v13, %s7411_s27  ;;  %v3582_v9 = vrot.slane %v7939_v8, 4  ;;  %v3692_v59 = vsel %vm1583_vm6, %v7933_v1, %v3458_v55 }
  0xda   :  { %v3456_v50 = vpop.permute.xlu1 %3455  ;;  %v1324_v57 = vcombine.low %v1316_v11, %v1323_v47 }
  0xdb   :  { %v205_v28 = vpop.permute.xlu0 %204  ;;  %v3691_v0 = vsel %vm1583_vm6, %v7946_v16, %v3456_v50  ;;  %v3583_v1 = vsel %vm3541_vm3, %v3581_v42, %v3582_v9  ;;  %v3439_v16 = vrot.slane %v8070_v4, 3  ;;  %v3440_v50 = vrot.slane %v8075_v63, 3 }
  0xdc   :  { %3491 = vrot.lane.b32.xlu1 %v3431_v3, %s7411_s27  ;;  %7049 = vmatmul.mubr.msk.f32.gmra.mxu0 %vm1583_vm6, %v1324_v57  ;;  %v821_v3 = vcombine.high %v819_v30, %v819_v30  ;;  %v426_v43 = vsel %vm405_vm4, %v7749_v58, %v205_v28  ;;  %v3438_v58 = vsel %vm3396_vm2, %v3436_v48, %v3437_v49 }
  0xdd   :  { %3634 = vrot.lane.b32.xlu0 %v3577_v26, %s7412_s16 }
  0xde   :  { %v348_v12 = vpop.permute.xlu1 %347 }
  0xdf   :  { %v8303_v20 = vsel %vm438_vm5, %v425_v18, %v348_v12  ;;  %v3603_v25 = vpop.permute.xlu0 %3602 }
  0xe0   :  { %v822_v60 = vcombine.high %v8303_v20, %v8303_v20  ;;  %v829_v7 = vrot.slane %v8303_v20, %v7799_v36  ;;  %3493 = vrot.lane.b32.xlu1 %v3435_v44, %s7411_s27  ;;  %v3725_v33 = vsel %vm3718_vm7, %v3692_v59, %v3603_v25 }
  0xe1   :  { %3632 = vrot.lane.b32.xlu0 %v3573_v56, %s7412_s16  ;;  %v1333_v56 = vrot.slane %v1325_v31, %v7799_v36  ;;  %v3791_v55 = vcombine.high %v3725_v33, %v3725_v33 }
  0xe2   :  { %v1326_v37 = vcombine.low %v821_v3, %v829_v7  ;;  %v3460_v51 = vpop.permute.xlu1 %3459  ;;  %v836_v24 = vrot.slane %v822_v60, %v7799_v36  ;;  %v837_v53 = vcombine.high %v829_v7, %v829_v7  ;;  %v3584_v60 = vrot.slane %v8070_v4, 4 }
  0xe3   :  { %v350_v41 = vpop.permute.xlu0 %349  ;;  %v3693_v39 = vsel %vm1583_vm6, %v7984_v29, %v3460_v51  ;;  %v3441_v29 = vsel %vm3396_vm2, %v3439_v16, %v3440_v50  ;;  %v3585_v7 = vrot.slane %v8075_v63, 4 }
  0xe4   :  { %v1340_v45 = vrot.slane %v1326_v37, %v7799_v36  ;;  %v8321_v61 = vsel %vm438_vm5, %v426_v43, %v350_v41  ;;  %3638 = vrot.lane.b32.xlu1 %v3580_v46, %s7412_s16  ;;  %v1342_v47 = vcombine.low %v837_v53, %v836_v24  ;;  %v3442_v24 = vrot.slane %v8165_v21, 3 }
  0xe5   :  { %v845_v13 = vrot.slane %v8321_v61, %v7799_v36  ;;  %3636 = vrot.lane.b32.xlu0 %v3576_v52, %s7412_s16  ;;  %v838_v44 = vcombine.high %v8321_v61, %v8321_v61  ;;  %v3443_v53 = vrot.slane %v8170_v2, 3  ;;  %v3586_v41 = vsel %vm3541_vm3, %v3584_v60, %v3585_v7 }
  0xe6   :  { %v3462_v40 = vpop.permute.xlu1 %3461  ;;  %v1341_v11 = vcombine.low %v1333_v56, %v1340_v45 }
  0xe7   :  { %v853_v57 = vcombine.high %v845_v13, %v845_v13  ;;  %v3601_v26 = vpop.permute.xlu0 %3600  ;;  %v852_v46 = vrot.slane %v838_v44, %v7799_v36  ;;  %v3694_v48 = vsel %vm1583_vm6, %v7992_v19, %v3462_v40 }
  0xe8   :  { %v3724_v52 = vsel %vm3718_vm7, %v3691_v0, %v3601_v26  ;;  %3497 = vrot.lane.b32.xlu1 %v3438_v58, %s7411_s27  ;;  %7051 = vmatprep.mubr.msk.f32.mxu0 %vm1583_vm6, %v1341_v11 }
  0xe9   :  { %v1343_v8 = vcombine.low %v845_v13, %v853_v57  ;;  %v3809_v28 = vcombine.low %v3724_v52, %v3725_v33  ;;  %3495 = vrot.lane.b32.xlu0 %v3434_v23, %s7411_s27  ;;  %v1350_v23 = vrot.slane %v1342_v47, %v7799_v36  ;;  %v854_v45 = vcombine.high %v852_v46, %v852_v46 }
  0xea   :  { %v207_v30 = vpop.permute.xlu1 %206  ;;  %v3444_v47 = vsel %vm3396_vm2, %v3442_v24, %v3443_v53  ;;  %v3587_v52 = vrot.slane %v8165_v21, 4  ;;  %vm7416_vm2 = vmmov 0  }
  0xeb   :  { %v1357_v32 = vrot.slane %v1343_v8, %v7799_v36  ;;  %7085 = vmatprep.mubr.msk.f32.mxu1 %vm3835_vm8, %v3809_v28  ;;  %v3605_v18 = vpop.permute.xlu0 %3604  ;;  %v1359_v8 = vcombine.low %v852_v46, %v854_v45  ;;  %v7404_v45 = vld [vmem:[%s9719_s0 + $0xb8] sm:$0xff] }
  0xec   :  { %v3726_v12 = vsel %vm3718_vm7, %v3693_v39, %v3605_v18  ;;  %3642 = vrot.lane.b32.xlu1 %v3583_v1, %s7412_s16 }
  0xed   :  { %v3810_v25 = vcombine.low %v3791_v55, %v3726_v12  ;;  %3640 = vrot.lane.b32.xlu0 %v3579_v35, %s7412_s16  ;;  %v1358_v31 = vcombine.low %v1350_v23, %v1357_v32 }
  0xee   :  { %v209_v3 = vpop.permute.xlu1 %208 }
  0xef   :  { %7052 = vmatmul.mubr.msk.f32.gmra.mxu0 %vm1583_vm6, %v1358_v31  ;;  %7086 = vmatmul.mubr.msk.f32.gmra.mxu1 %vm3835_vm8, %v3810_v25  ;;  %v3607_v37 = vpop.permute.xlu0 %3606  ;;  %v428_v35 = vsel %vm405_vm4, %v7784_v22, %v209_v3  ;;  %v7402_v22 = vld [vmem:[%s9719_s0 + $0xa8] sm:$0xff]  ;;  %v1367_v25 = vrot.slane %v1359_v8, %v7799_v36 }
  0xf0   :  { %v3727_v51 = vsel %vm3718_vm7, %v3694_v48, %v3607_v37  ;;  %3499 = vrot.lane.b32.xlu1 %v3437_v49, %s7411_s27  ;;  %v427_v56 = vsel %vm405_vm4, %v7402_v22, %v207_v30 }
  0xf1   :  { %v3792_v43 = vcombine.high %v3727_v51, %v3727_v51  ;;  %3501 = vrot.lane.b32.xlu0 %v3441_v29, %s7411_s27 }
  0xf2   :  { %v354_v19 = vpop.permute.xlu1 %353 }
  0xf3   :  { %v3811_v49 = vcombine.low %v3727_v51, %v3792_v43  ;;  %v8376_v13 = vsel %vm438_vm5, %v428_v35, %v354_v19  ;;  %v352_v58 = vpop.permute.xlu0 %351 }
  0xf4   :  { %v871_v42 = vcombine.high %v8376_v13, %v8376_v13  ;;  %v878_v59 = vrot.slane %v8376_v13, %v7799_v36  ;;  %v8383_v40 = vsel %vm438_vm5, %v427_v56, %v352_v58  ;;  %3644 = vrot.lane.b32.xlu1 %v3582_v9, %s7412_s16  ;;  %v3588_v9 = vrot.slane %v8170_v2, 4 }
  0xf5   :  { %v855_v11 = vcombine.high %v8383_v40, %v8383_v40  ;;  %v862_v0 = vrot.slane %v8383_v40, %v7799_v36  ;;  %3646 = vrot.lane.b32.xlu0 %v3586_v41, %s7412_s16  ;;  %7088 = vmatprep.mubr.msk.f32.mxu1 %vm3835_vm8, %v3811_v49 }
  0xf6   :  { %v8394_v33 = vrot.slane %v871_v42, %v7799_v36  ;;  %v886_v57 = vcombine.high %v878_v59, %v878_v59  ;;  %v3466_v26 = vpop.permute.xlu1 %3465  ;;  %v3589_v32 = vsel %vm3541_vm3, %v3587_v52, %v3588_v9  ;;  %vm4531_vm3 = vcmask 392192  }
  0xf7   :  { %v869_v28 = vrot.slane %v855_v11, %v7799_v36  ;;  %v870_v1 = vcombine.high %v862_v0, %v862_v0  ;;  %v3464_v55 = vpop.permute.xlu0 %3463  ;;  %v3696_v60 = vsel %vm1583_vm6, %v8031_v5, %v3466_v26 }
  0xf8   :  { %v1377_v30 = vcombine.low %v886_v57, %v8394_v33  ;;  %3503 = vrot.lane.b32.xlu1 %v3440_v50, %s7411_s27  ;;  %v3695_v46 = vsel %vm1583_vm6, %v8024_v14, %v3464_v55  ;;  %v7403_v14 = vld [vmem:[%s9719_s0 + $0xc0] sm:$0xff]  ;;  %v887_v26 = vcombine.high %v8394_v33, %v8394_v33 }
  0xf9   :  { %v1360_v16 = vcombine.low %v862_v0, %v870_v1  ;;  %v1376_v39 = vcombine.low %v869_v28, %v878_v59  ;;  %3505 = vrot.lane.b32.xlu0 %v3444_v47, %s7411_s27 }
  0xfa   :  { %v3609_v44 = vpop.permute.xlu1 %3608  ;;  %v1391_v18 = vrot.slane %v1377_v30, %v7799_v36 }
  0xfb   :  { %v1374_v23 = vrot.slane %v1360_v16, %v7799_v36  ;;  %v213_v12 = vpop.permute.xlu0 %212  ;;  %v1384_v31 = vrot.slane %v1376_v39, %v7799_v36  ;;  %v3728_v37 = vsel %vm3718_vm7, %v3695_v46, %v3609_v44 }
  0xfc   :  { %3507 = vrot.lane.b32.xlu1 %v3443_v53, %s7411_s27  ;;  %v430_v43 = vsel %vm405_vm4, %v7403_v14, %v213_v12 }
  0xfd   :  { %3650 = vrot.lane.b32.xlu0 %v3589_v32, %s7412_s16  ;;  %v1375_v50 = vcombine.low %v1367_v25, %v1374_v23  ;;  %v1392_v3 = vcombine.low %v1384_v31, %v1391_v18 }
  0xfe   :  { %v211_v29 = vpop.permute.xlu1 %210 }
  0xff   :  { %7054 = vmatprep.mubr.msk.f32.mxu0 %vm1583_vm6, %v1375_v50  ;;  %v3611_v48 = vpop.permute.xlu0 %3610  ;;  %v429_v22 = vsel %vm405_vm4, %v7404_v45, %v211_v29 }
 0x100   :  { %v3729_v35 = vsel %vm3718_vm7, %v3696_v60, %v3611_v48  ;;  %3652 = vrot.lane.b32.xlu1 %v3588_v9, %s7412_s16  ;;  %7055 = vmatmul.mubr.msk.f32.gmra.mxu0 %vm1583_vm6, %v1392_v3 }
 0x101   :  { %v3812_v51 = vcombine.low %v3728_v37, %v3729_v35  ;;  %3648 = vrot.lane.b32.xlu0 %v3585_v7, %s7412_s16  ;;  %v3793_v47 = vcombine.high %v3729_v35, %v3729_v35  ;;  %v7405_v37 = vld [vmem:[%s9719_s0 + $0xc8] sm:$0xff] }
 0x102   :  { %v3470_v5 = vpop.permute.xlu1 %3469 }
 0x103   :  { %7089 = vmatmul.mubr.msk.f32.gmra.mxu1 %vm3835_vm8, %v3812_v51  ;;  %v358_v24 = vpop.permute.xlu0 %357  ;;  %v3698_v57 = vsel %vm1583_vm6, %v8063_v27, %v3470_v5 }
 0x104   :  { %v8427_v53 = vsel %vm438_vm5, %v430_v43, %v358_v24 }
 0x105   :  { %v904_v19 = vcombine.high %v8427_v53, %v8427_v53  ;;  %v911_v41 = vrot.slane %v8427_v53, %v7799_v36 }
 0x106   :  { %v3468_v7 = vpop.permute.xlu1 %3467 }
 0x107   :  { %v918_v56 = vrot.slane %v904_v19, %v7799_v36  ;;  %v356_v49 = vpop.permute.xlu0 %355  ;;  %v919_v58 = vcombine.high %v911_v41, %v911_v41  ;;  %v3697_v8 = vsel %vm1583_vm6, %v8082_v54, %v3468_v7 }
 0x108   :  { %v8439_v42 = vsel %vm438_vm5, %v429_v22, %v356_v49 }
 0x109   :  { %v920_v59 = vcombine.high %v918_v56, %v918_v56  ;;  %v888_v11 = vcombine.high %v8439_v42, %v8439_v42  ;;  %v895_v0 = vrot.slane %v8439_v42, %v7799_v36  ;;  %v1410_v30 = vcombine.low %v911_v41, %v919_v58 }
 0x10a   :  { %v3613_v52 = vpop.permute.xlu1 %3612 }
 0x10b   :  { %v1411_v9 = vcombine.low %v918_v56, %v920_v59  ;;  %v902_v28 = vrot.slane %v888_v11, %v7799_v36  ;;  %v903_v1 = vcombine.high %v895_v0, %v895_v0  ;;  %v3615_v55 = vpop.permute.xlu0 %3614  ;;  %v1393_v16 = vcombine.low %v887_v26, %v895_v0 }
 0x10c   :  { %v3730_v39 = vsel %vm3718_vm7, %v3697_v8, %v3613_v52  ;;  %v3731_v44 = vsel %vm3718_vm7, %v3698_v57, %v3615_v55  ;;  %v1418_v50 = vrot.slane %v1410_v30, %v7799_v36  ;;  %v7406_v30 = vld [vmem:[%s9719_s0 + $0xd8] sm:$0xff] }
 0x10d   :  { %v1394_v32 = vcombine.low %v903_v1, %v902_v28  ;;  %v3813_v27 = vcombine.low %v3793_v47, %v3730_v39  ;;  %v3794_v18 = vcombine.high %v3731_v44, %v3731_v44  ;;  %v1425_v33 = vrot.slane %v1411_v9, %v7799_v36 }
 0x10e   :  { %v215_v23 = vpop.permute.xlu1 %214  ;;  %v1401_v12 = vrot.slane %v1393_v16, %v7799_v36 }
 0x10f   :  { %v3814_v25 = vcombine.low %v3731_v44, %v3794_v18  ;;  %7091 = vmatprep.mubr.msk.f32.mxu1 %vm3835_vm8, %v3813_v27  ;;  %v217_v54 = vpop.permute.xlu0 %216  ;;  %v1408_v31 = vrot.slane %v1394_v32, %v7799_v36  ;;  %v1426_v60 = vcombine.low %v1418_v50, %v1425_v33  ;;  %v431_v35 = vsel %vm405_vm4, %v7405_v37, %v215_v23 }
 0x110   :  { %v432_v51 = vsel %vm405_vm4, %v7928_v62, %v217_v54 }
 0x111   :  { %7092 = vmatmul.mubr.msk.f32.gmra.mxu1 %vm3835_vm8, %v3814_v25  ;;  %v1409_v3 = vcombine.low %v1401_v12, %v1408_v31 }
 0x112   :  { %v3474_v29 = vpop.permute.xlu1 %3473 }
 0x113   :  { %7057 = vmatprep.mubr.msk.f32.mxu0 %vm1583_vm6, %v1409_v3  ;;  %v362_v46 = vpop.permute.xlu0 %361  ;;  %v3700_v58 = vsel %vm1583_vm6, %v8136_v10, %v3474_v29 }
 0x114   :  { %7058 = vmatmul.mubr.msk.f32.gmra.mxu0 %vm1583_vm6, %v1426_v60  ;;  %v8469_v14 = vsel %vm438_vm5, %v432_v51, %v362_v46 }
 0x115   :  { %v944_v7 = vrot.slane %v8469_v14, %v7799_v36  ;;  %v937_v11 = vcombine.high %v8469_v14, %v8469_v14 }
 0x116   :  { %v3472_v48 = vpop.permute.xlu1 %3471 }
 0x117   :  { %v360_v5 = vpop.permute.xlu0 %359  ;;  %v3699_v0 = vsel %vm1583_vm6, %v8107_v15, %v3472_v48  ;;  %v951_v10 = vrot.slane %v937_v11, %v7799_v36  ;;  %v952_v55 = vcombine.high %v944_v7, %v944_v7 }
 0x118   :  { %v8472_v43 = vsel %vm438_vm5, %v431_v35, %v360_v5 }
 0x119   :  { %v921_v24 = vcombine.high %v8472_v43, %v8472_v43  ;;  %v928_v19 = vrot.slane %v8472_v43, %v7799_v36  ;;  %v1444_v44 = vcombine.low %v952_v55, %v951_v10  ;;  %v953_v33 = vcombine.high %v951_v10, %v951_v10 }
 0x11a   :  { %v3476_v41 = vpop.permute.xlu1 %3475 }
 0x11b   :  { %v935_v45 = vrot.slane %v921_v24, %v7799_v36  ;;  %v936_v62 = vcombine.high %v928_v19, %v928_v19  ;;  %v3619_v22 = vpop.permute.xlu0 %3618  ;;  %v3701_v32 = vsel %vm1583_vm6, %v8177_v34, %v3476_v41 }
 0x11c   :  { %v3733_v52 = vsel %vm3718_vm7, %v3700_v58, %v3619_v22 }
 0x11d   :  { %v1427_v56 = vcombine.low %v928_v19, %v936_v62  ;;  %v1428_v49 = vcombine.low %v935_v45, %v944_v7  ;;  %v3795_v27 = vcombine.high %v3733_v52, %v3733_v52 }
 0x11e   :  { %v219_v59 = vpop.permute.xlu1 %218 }
 0x11f   :  { %v1435_v47 = vrot.slane %v1427_v56, %v7799_v36  ;;  %v3617_v57 = vpop.permute.xlu0 %3616  ;;  %v1442_v26 = vrot.slane %v1428_v49, %v7799_v36  ;;  %v433_v16 = vsel %vm405_vm4, %v7406_v30, %v219_v59 }
 0x120   :  { %v3732_v9 = vsel %vm3718_vm7, %v3699_v0, %v3617_v57 }
 0x121   :  { %v3815_v8 = vcombine.low %v3732_v9, %v3733_v52  ;;  %v1443_v28 = vcombine.low %v1435_v47, %v1442_v26 }
 0x122   :  { %v3478_v1 = vpop.permute.xlu1 %3477 }
 0x123   :  { %7060 = vmatprep.mubr.msk.f32.mxu0 %vm1583_vm6, %v1443_v28  ;;  %7094 = vmatprep.mubr.msk.f32.mxu1 %vm3835_vm8, %v3815_v8  ;;  %v221_v15 = vpop.permute.xlu0 %220  ;;  %v3702_v50 = vsel %vm1583_vm6, %v8196_v38, %v3478_v1  ;;  %v1452_v38 = vrot.slane %v1444_v44, %v7799_v36 }
 0x124   :  { %v434_v29 = vsel %vm405_vm4, %v8070_v4, %v221_v15  ;;  %v6799_v15 = vld [vmem:[%s9722_s4] ss:$0 sm:$0xff] }
 0x126   :  { %v364_v39 = vpop.permute.xlu1 %363 }
 0x127   :  { %v8501_v18 = vsel %vm438_vm5, %v433_v16, %v364_v39  ;;  %v3621_v23 = vpop.permute.xlu0 %3620 }
 0x128   :  { %v954_v12 = vcombine.high %v8501_v18, %v8501_v18  ;;  %v961_v25 = vrot.slane %v8501_v18, %v7799_v36  ;;  %v3734_v54 = vsel %vm3718_vm7, %v3701_v32, %v3621_v23 }
 0x129   :  { %v3816_v31 = vcombine.low %v3795_v27, %v3734_v54  ;;  %v1036_v27 = vcombine.high %v6799_v15, %v6799_v15 }
 0x12a   :  { %v1445_v3 = vcombine.low %v953_v33, %v961_v25  ;;  %v3623_v34 = vpop.permute.xlu1 %3622  ;;  %v968_v60 = vrot.slane %v954_v12, %v7799_v36  ;;  %v969_v46 = vcombine.high %v961_v25, %v961_v25 }
 0x12b   :  { %v3735_v48 = vsel %vm3718_vm7, %v3702_v50, %v3623_v34  ;;  %7095 = vmatmul.mubr.msk.f32.gmra.mxu1 %vm3835_vm8, %v3816_v31  ;;  %v366_v37 = vpop.permute.xlu0 %365 }
 0x12c   :  { %v1459_v35 = vrot.slane %v1445_v3, %v7799_v36  ;;  %v3796_v51 = vcombine.high %v3735_v48, %v3735_v48  ;;  %v8517_v5 = vsel %vm438_vm5, %v434_v29, %v366_v37  ;;  %v1461_v45 = vcombine.low %v969_v46, %v968_v60 }
 0x12d   :  { %v970_v24 = vcombine.high %v8517_v5, %v8517_v5  ;;  %v977_v4 = vrot.slane %v8517_v5, %v7799_v36 }
 0x12e   :  { %v3817_v19 = vcombine.low %v3735_v48, %v3796_v51  ;;  %v368_v41 = vpop.permute.xlu1 %367  ;;  %v1460_v7 = vcombine.low %v1452_v38, %v1459_v35  ;;  %v1469_v52 = vrot.slane %v1461_v45, %v7799_v36  ;;  %v1050_v48 = vrot.slane %v1036_v27, %v7799_v36 }
 0x12f   :  { %v984_v62 = vrot.slane %v970_v24, %v7799_v36  ;;  %v985_v22 = vcombine.high %v977_v4, %v977_v4  ;;  %v223_v56 = vpop.permute.xlu0 %222 }
 0x130   :  { %v435_v49 = vsel %vm405_vm4, %v8075_v63, %v223_v56  ;;  %7061 = vmatmul.mubr.msk.f32.gmra.mxu0 %vm1583_vm6, %v1460_v7  ;;  %7097 = vmatprep.mubr.msk.f32.mxu1 %vm3835_vm8, %v3817_v19 }
 0x131   :  { %v986_v58 = vcombine.high %v984_v62, %v984_v62  ;;  %v1462_v59 = vcombine.low %v977_v4, %v985_v22  ;;  %v8530_v11 = vsel %vm438_vm5, %v435_v49, %v368_v41  ;;  %v1052_v41 = vcombine.high %v1050_v48, %v1050_v48 }
 0x132   :  { %v994_v0 = vrot.slane %v8530_v11, %v7799_v36  ;;  %v3482_v47 = vpop.permute.xlu1 %3481  ;;  %v987_v10 = vcombine.high %v8530_v11, %v8530_v11 }
 0x133   :  { %v1476_v57 = vrot.slane %v1462_v59, %v7799_v36  ;;  %v3480_v26 = vpop.permute.xlu0 %3479  ;;  %v1478_v9 = vcombine.low %v984_v62, %v986_v58  ;;  %v3704_v23 = vsel %vm1583_vm6, %v8269_v17, %v3482_v47  ;;  %v1530_v47 = vcombine.low %v1050_v48, %v1052_v41 }
 0x134   :  { %v1002_v63 = vcombine.high %v994_v0, %v994_v0  ;;  %v3703_v33 = vsel %vm1583_vm6, %v8252_v6, %v3480_v26  ;;  %v1001_v25 = vrot.slane %v987_v10, %v7799_v36  ;;  %v1043_v6 = vrot.slane %v6799_v15, %v7799_v36 }
 0x135   :  { %v1477_v8 = vcombine.low %v1469_v52, %v1476_v57  ;;  %v1486_v30 = vrot.slane %v1478_v9, %v7799_v36 }
 0x136   :  { %v1479_v28 = vcombine.low %v994_v0, %v1002_v63  ;;  %v3625_v1 = vpop.permute.xlu1 %3624  ;;  %v1051_v51 = vcombine.high %v1043_v6, %v1043_v6  ;;  %v1546_v0 = vcombine.low %v1050_v48, %v1043_v6  ;;  %v1556_v27 = vcombine.low %v1052_v41, %v1043_v6 }
 0x137   :  { %7063 = vmatprep.mubr.msk.f32.mxu0 %vm1583_vm6, %v1477_v8  ;;  %v225_v55 = vpop.permute.xlu0 %224  ;;  %v3736_v31 = vsel %vm3718_vm7, %v3703_v33, %v3625_v1 }
 0x138   :  { %v1493_v16 = vrot.slane %v1479_v28, %v7799_v36  ;;  %v436_v39 = vsel %vm405_vm4, %v8165_v21, %v225_v55  ;;  %v1529_v56 = vcombine.low %v1043_v6, %v1051_v51  ;;  %v8586_v10 = vrot.slane %v1546_v0, %v7799_v36 }
 0x139   :  { %v1544_v55 = vrot.slane %v1530_v47, %v7799_v36 }
 0x13a   :  { %v370_v44 = vpop.permute.xlu1 %369  ;;  %v1494_v32 = vcombine.low %v1486_v30, %v1493_v16 }
 0x13b   :  { %v8551_v12 = vsel %vm438_vm5, %v436_v39, %v370_v44  ;;  %v3627_v54 = vpop.permute.xlu0 %3626 }
 0x13c   :  { %v1003_v21 = vcombine.high %v8551_v12, %v8551_v12  ;;  %v1010_v50 = vrot.slane %v8551_v12, %v7799_v36  ;;  %v3737_v3 = vsel %vm3718_vm7, %v3704_v23, %v3627_v54  ;;  %7064 = vmatmul.mubr.msk.f32.gmra.mxu0 %vm1583_vm6, %v1494_v32 }
 0x13d   :  { %v3818_v17 = vcombine.low %v3736_v31, %v3737_v3  ;;  %v3797_v49 = vcombine.high %v3737_v3, %v3737_v3 }
 0x13e   :  { %v1017_v34 = vrot.slane %v1003_v21, %v7799_v36  ;;  %v1018_v29 = vcombine.high %v1010_v50, %v1010_v50  ;;  %v1495_v60 = vcombine.low %v1001_v25, %v1010_v50  ;;  %v227_v46 = vpop.permute.xlu1 %226  ;;  %v1555_v50 = vcombine.low %v1051_v51, %v1050_v48 }
 0x13f   :  { %7098 = vmatmul.mubr.msk.f32.gmra.mxu1 %vm3835_vm8, %v3818_v17  ;;  %v3486_v37 = vpop.permute.xlu0 %3485 }
 0x140   :  { %v1496_v35 = vcombine.low %v1018_v29, %v1017_v34  ;;  %v1503_v38 = vrot.slane %v1495_v60, %v7799_v36  ;;  %v3706_v24 = vsel %vm1583_vm6, %v8321_v61, %v3486_v37  ;;  %v437_v61 = vsel %vm405_vm4, %v8170_v2, %v227_v46 }
 0x141   :  { %v1019_v8 = vcombine.high %v1017_v34, %v1017_v34  ;;  %v1537_v2 = vrot.slane %v1529_v56, %v7799_v36  ;;  %v8599_v34 = vrot.slane %v1556_v27, %v7799_v36  ;;  %v8604_v46 = vrot.slane %v1555_v50, %v7799_v36 }
 0x142   :  { %v3631_v4 = vpop.permute.xlu1 %3630  ;;  %v1510_v19 = vrot.slane %v1496_v35, %v7799_v36  ;;  %vm4549_vm4 = vcmask 523264  }
 0x143   :  { %v3739_v7 = vsel %vm3718_vm7, %v3706_v24, %v3631_v4  ;;  %v3484_v45 = vpop.permute.xlu0 %3483  ;;  %v8592_v23 = vcombine.low %v1537_v2, %v8586_v10  ;;  %v8594_v33 = vcombine.low %v1537_v2, %v1544_v55  ;;  %v8615_v4 = vcombine.low %v8604_v46, %v8599_v34 }
 0x144   :  { %v1511_v62 = vcombine.low %v1503_v38, %v1510_v19  ;;  %v3798_v22 = vcombine.high %v3739_v7, %v3739_v7  ;;  %v3705_v58 = vsel %vm1583_vm6, %v8303_v20, %v3484_v45  ;;  %v8620_v56 = vcombine.low %v8604_v46, %v1537_v2 }
 0x146   :  { %v3629_v59 = vpop.permute.xlu1 %3628  ;;  %7066 = vmatprep.mubr.msk.f32.mxu0 %vm1583_vm6, %v1511_v62  ;;  %v3820_v63 = vcombine.low %v3739_v7, %v3798_v22 }
 0x147   :  { %v3738_v57 = vsel %vm3718_vm7, %v3705_v58, %v3629_v59  ;;  %v372_v26 = vpop.permute.xlu0 %371 }
 0x148   :  { %v3819_v52 = vcombine.low %v3797_v49, %v3738_v57  ;;  %v8577_v9 = vsel %vm438_vm5, %v437_v61, %v372_v26 }
 0x149   :  { %v1020_v20 = vcombine.high %v8577_v9, %v8577_v9  ;;  %v1027_v28 = vrot.slane %v8577_v9, %v7799_v36 }
 0x14a   :  { %v3488_v1 = vpop.permute.xlu1 %3487  ;;  %7100 = vmatprep.mubr.msk.f32.mxu1 %vm3835_vm8, %v3819_v52 }
 0x14b   :  { %v1034_v15 = vrot.slane %v1020_v20, %v7799_v36  ;;  %v1035_v30 = vcombine.high %v1027_v28, %v1027_v28  ;;  %v1512_v16 = vcombine.low %v1019_v8, %v1027_v28  ;;  %v7029_v39 = vpop.f32.mrf.mxu0  ;;  %7101 = vmatmul.mubr.msk.f32.gmra.mxu1 %vm3835_vm8, %v3820_v63  ;;  %v3490_v44 = vpop.permute.xlu0 %3489  ;;  %v3707_v48 = vsel %vm1583_vm6, %v8383_v40, %v3488_v1 }
 0x14c   :  { %v1712_v29 = vadd.f32 %v7029_v39, %v8592_v23  ;;  %v3708_v51 = vsel %vm1583_vm6, %v8376_v13, %v3490_v44  ;;  %v8629_v8 = vcombine.low %v1544_v55, %v1537_v2 }
 0x14d   :  { %v1513_v32 = vcombine.low %v1035_v30, %v1034_v15  ;;  %v1520_v54 = vrot.slane %v1512_v16, %v7799_v36  ;;  %v1706_v31 = vpop.f32.mrf.mxu0 }
 0x14e   :  { %v3492_v25 = vpop.permute.xlu1 %3491  ;;  %v1707_v6 = vadd.f32 %v1706_v31, %v8594_v33  ;;  %v1897_v19 = vrot.slane %v1712_v29, %v7799_v36  ;;  %v1890_v13 = vcombine.high %v1712_v29, %v1712_v29 }
 0x14f   :  { %v3635_v21 = vpop.permute.xlu0 %3634  ;;  %v1527_v3 = vrot.slane %v1513_v32, %v7799_v36 }
 0x150   :  { %v3741_v38 = vsel %vm3718_vm7, %v3708_v51, %v3635_v21  ;;  %v1873_v41 = vcombine.high %v1707_v6, %v1707_v6  ;;  %v1880_v22 = vrot.slane %v1707_v6, %v7799_v36  ;;  %v1905_v59 = vcombine.high %v1897_v19, %v1897_v19 }
 0x151   :  { %v1528_v17 = vcombine.low %v1520_v54, %v1527_v3  ;;  %v8632_v20 = vrot.slane %v1890_v13, %v7799_v36  ;;  %v3799_v16 = vcombine.high %v3741_v38, %v3741_v38  ;;  %v2465_v2 = vmax.f32 %v1897_v19, 0.0 }
 0x152   :  { %v3494_v60 = vpop.permute.xlu1 %3493  ;;  %v1887_v0 = vrot.slane %v1873_v41, %v7799_v36  ;;  %v1888_v57 = vcombine.high %v1880_v22, %v1880_v22  ;;  %v2466_v15 = vmax.f32 %v1905_v59, 0.0  ;;  %v2461_v50 = vmax.f32 %v1880_v22, 0.0 }
 0x153   :  { %v7032_v37 = vpop.f32.mrf.mxu0  ;;  %7067 = vmatmul.mubr.msk.f32.gmra.mxu0 %vm1583_vm6, %v1528_v17  ;;  %v3633_v35 = vpop.permute.xlu0 %3632  ;;  %v3710_v49 = vsel %vm1583_vm6, %v8427_v53, %v3494_v60  ;;  %v3709_v53 = vsel %vm1583_vm6, %v8439_v42, %v3492_v25  ;;  %v8643_v25 = vcombine.low %v8586_v10, %v8604_v46  ;;  %v1906_v17 = vcombine.high %v8632_v20, %v8632_v20 }
 0x154   :  { %v3740_v24 = vsel %vm3718_vm7, %v3707_v48, %v3633_v35  ;;  %v1722_v52 = vadd.f32 %v7032_v37, %v8620_v56  ;;  %v1889_v30 = vcombine.high %v1887_v0, %v1887_v0  ;;  %v2462_v32 = vmax.f32 %v1888_v57, 0.0 }
 0x155   :  { %v3821_v7 = vcombine.low %v3740_v24, %v3741_v38  ;;  %v1716_v45 = vpop.f32.mrf.mxu0  ;;  %v8647_v29 = vcombine.low %v2465_v2, %v2466_v15  ;;  %v2463_v37 = vmax.f32 %v1887_v0, 0.0  ;;  %v2467_v41 = vmax.f32 %v8632_v20, 0.0 }
 0x156   :  { %v3639_v62 = vpop.permute.xlu1 %3638  ;;  %v1717_v58 = vadd.f32 %v1716_v45, %v8615_v4  ;;  %v1924_v55 = vcombine.high %v1722_v52, %v1722_v52  ;;  %v2464_v6 = vmax.f32 %v1889_v30, 0.0  ;;  %v2685_v35 = vcombine.low %v2461_v50, %v2462_v32 }
 0x157   :  { %v3637_v40 = vpop.permute.xlu0 %3636  ;;  %7103 = vmatprep.mubr.msk.f32.mxu1 %vm3835_vm8, %v3821_v7  ;;  %v3743_v47 = vsel %vm3718_vm7, %v3710_v49, %v3639_v62  ;;  %v1931_v48 = vrot.slane %v1722_v52, %v7799_v36  ;;  %v8660_v62 = vcombine.low %v8599_v34, %v8604_v46  ;;  %v2468_v22 = vmax.f32 %v1906_v17, 0.0 }
 0x158   :  { %v1907_v28 = vcombine.high %v1717_v58, %v1717_v58  ;;  %v3800_v1 = vcombine.high %v3743_v47, %v3743_v47  ;;  %v3742_v39 = vsel %vm3718_vm7, %v3709_v53, %v3637_v40  ;;  %v8638_v3 = vrot.slane %v1717_v58, %v7799_v36 }
 0x159   :  { %v3822_v21 = vcombine.low %v3799_v16, %v3742_v39  ;;  %v1938_v51 = vrot.slane %v1924_v55, %v7799_v36  ;;  %v2709_v40 = vrot.slane %v8647_v29, %v7799_v36  ;;  %v2686_v13 = vcombine.low %v2463_v37, %v2464_v6 }
 0x15a   :  { %v3498_v61 = vpop.permute.xlu1 %3497  ;;  %v3823_v27 = vcombine.low %v3743_v47, %v3800_v1  ;;  %v1921_v42 = vrot.slane %v1907_v28, %v7799_v36  ;;  %v1922_v7 = vcombine.high %v8638_v3, %v8638_v3  ;;  %v2693_v58 = vrot.slane %v2685_v35, %v7799_v36 }
 0x15b   :  { %v3496_v26 = vpop.permute.xlu0 %3495  ;;  %7104 = vmatmul.mubr.msk.f32.gmra.mxu1 %vm3835_vm8, %v3822_v21  ;;  %v3712_v59 = vsel %vm1583_vm6, %v8469_v14, %v3498_v61  ;;  %v1939_v57 = vcombine.high %v1931_v48, %v1931_v48  ;;  %v1940_v52 = vcombine.high %v1938_v51, %v1938_v51  ;;  %v2473_v20 = vmax.f32 %v1931_v48, 0.0 }
 0x15c   :  { %v7035_v63 = vpop.f32.mrf.mxu0  ;;  %7106 = vmatprep.mubr.msk.f32.mxu1 %vm3835_vm8, %v3823_v27  ;;  %v1923_v45 = vcombine.high %v1921_v42, %v1921_v42  ;;  %v2470_v46 = vmax.f32 %v1922_v7, 0.0  ;;  %v2471_v53 = vmax.f32 %v1921_v42, 0.0  ;;  %v3711_v1 = vsel %vm1583_vm6, %v8472_v43, %v3496_v26 }
 0x15d   :  { %v1732_v49 = vadd.f32 %v7035_v63, %v8643_v25  ;;  %v2700_v15 = vrot.slane %v2686_v13, %v7799_v36  ;;  %v2469_v32 = vmax.f32 %v8638_v3, 0.0  ;;  %v2475_v2 = vmax.f32 %v1938_v51, 0.0 }
 0x15e   :  { %v3643_v44 = vpop.permute.xlu1 %3642  ;;  %v1726_v54 = vpop.f32.mrf.mxu0  ;;  %v2472_v28 = vmax.f32 %v1923_v45, 0.0  ;;  %v2476_v55 = vmax.f32 %v1940_v52, 0.0  ;;  %v2719_v21 = vcombine.low %v2470_v46, %v2471_v53  ;;  %v2716_v45 = vrot.slane %v2467_v41, %v7799_v36 }
 0x15f   :  { %v3641_v31 = vpop.permute.xlu0 %3640  ;;  %v1727_v60 = vadd.f32 %v1726_v54, %v8629_v8  ;;  %v3745_v34 = vsel %vm3718_vm7, %v3712_v59, %v3643_v44  ;;  %v1958_v30 = vcombine.high %v1732_v49, %v1732_v49  ;;  %v8674_v14 = vrot.slane %v1732_v49, %v7799_v36 }
 0x160   :  { %v3744_v61 = vsel %vm3718_vm7, %v3711_v1, %v3641_v31  ;;  %v3801_v43 = vcombine.high %v3745_v34, %v3745_v34  ;;  %v2735_v50 = vcombine.low %v2472_v28, %v2473_v20  ;;  %v2718_v37 = vcombine.low %v2468_v22, %v2469_v32 }
 0x161   :  { %v1941_v10 = vcombine.high %v1727_v60, %v1727_v60  ;;  %v1948_v38 = vrot.slane %v1727_v60, %v7799_v36  ;;  %v3824_v54 = vcombine.low %v3744_v61, %v3745_v34  ;;  %v1972_v17 = vrot.slane %v1958_v30, %v7799_v36 }
 0x162   :  { %v3500_v24 = vpop.permute.xlu1 %3499  ;;  %v1973_v3 = vcombine.high %v8674_v14, %v8674_v14  ;;  %v2701_v51 = vcombine.low %v2693_v58, %v2700_v15  ;;  %v2733_v13 = vrot.slane %v2719_v21, %v7799_v36  ;;  %v2742_v49 = vrot.slane %v2735_v50, %v7799_v36 }
 0x163   :  { %v3502_v19 = vpop.permute.xlu0 %3501  ;;  %v1955_v0 = vrot.slane %v1941_v10, %v7799_v36  ;;  %v1956_v47 = vcombine.high %v1948_v38, %v1948_v38  ;;  %v3713_v26 = vsel %vm1583_vm6, %v8501_v18, %v3500_v24  ;;  %v2477_v42 = vmax.f32 %v1948_v38, 0.0  ;;  %7107 = vmatmul.mubr.msk.f32.gmra.mxu1 %vm3835_vm8, %v3824_v54 }
 0x164   :  { %v3714_v29 = vsel %vm1583_vm6, %v8517_v5, %v3502_v19  ;;  %v2474_v10 = vmax.f32 %v1939_v57, 0.0  ;;  %v2751_v38 = vcombine.low %v2475_v2, %v2476_v55  ;;  %v2482_v59 = vmax.f32 %v1973_v3, 0.0 }
 0x165   :  { %v7038_v63 = vpop.f32.mrf.mxu0  ;;  %v1957_v44 = vcombine.high %v1955_v0, %v1955_v0  ;;  %v2478_v27 = vmax.f32 %v1956_v47, 0.0  ;;  %v2479_v5 = vmax.f32 %v1955_v0, 0.0  ;;  %v2483_v47 = vmax.f32 %v1972_v17, 0.0 }
 0x166   :  { %v3645_v16 = vpop.permute.xlu1 %3644  ;;  %v1742_v24 = vadd.f32 %v7038_v63, %v8594_v33  ;;  %v2717_v57 = vcombine.low %v2709_v40, %v2716_v45  ;;  %v2726_v52 = vrot.slane %v2718_v37, %v7799_v36  ;;  %v3245_v46 = vsel %vm438_vm5, %v2701_v51, -inf }
 0x167   :  { %v3647_v39 = vpop.permute.xlu0 %3646  ;;  %v3746_v31 = vsel %vm3718_vm7, %v3713_v26, %v3645_v16  ;;  %v1736_v60 = vpop.f32.mrf.mxu0  ;;  %v2480_v35 = vmax.f32 %v1957_v44, 0.0  ;;  %v2752_v18 = vcombine.low %v2477_v42, %v2478_v27  ;;  %v2749_v41 = vrot.slane %v2474_v10, %v7799_v36 }
 0x168   :  { %v3825_v6 = vcombine.low %v3801_v43, %v3746_v31  ;;  %v3747_v48 = vsel %vm3718_vm7, %v3714_v29, %v3647_v39  ;;  %v1737_v19 = vadd.f32 %v1736_v60, %v8660_v62  ;;  %v2759_v0 = vrot.slane %v2751_v38, %v7799_v36 }
 0x169   :  { %v3802_v58 = vcombine.high %v3747_v48, %v3747_v48  ;;  %v2766_v20 = vrot.slane %v2752_v18, %v7799_v36  ;;  %v2768_v34 = vcombine.low %v2479_v5, %v2480_v35  ;;  %v1992_v53 = vcombine.high %v1742_v24, %v1742_v24 }
 0x16a   :  { %7109 = vmatprep.mubr.msk.f32.mxu1 %vm3835_vm8, %v3825_v6  ;;  %v3504_v22 = vpop.permute.xlu1 %3503  ;;  %v2734_v1 = vcombine.low %v2726_v52, %v2733_v13  ;;  %v2481_v63 = vmax.f32 %v8674_v14, 0.0  ;;  %v1975_v15 = vcombine.high %v1737_v19, %v1737_v19  ;;  %v1982_v30 = vrot.slane %v1737_v19, %v7799_v36 }
 0x16b   :  { %v3506_v7 = vpop.permute.xlu0 %3505  ;;  %v2750_v40 = vcombine.low %v2742_v49, %v2749_v41  ;;  %v1974_v61 = vcombine.high %v1972_v17, %v1972_v17  ;;  %v8701_v16 = vcombine.low %v2482_v59, %v2483_v47  ;;  %v3826_v39 = vcombine.low %v3747_v48, %v3802_v58 }
 0x16c   :  { %v3247_v44 = vsel %vm3246_vm9, %v2717_v57, -inf  ;;  %v2767_v27 = vcombine.low %v2759_v0, %v2766_v20  ;;  %v2775_v54 = vrot.slane %v2768_v34, %v7799_v36  ;;  %v1999_v43 = vrot.slane %v1742_v24, %v7799_v36 }
 0x16d   :  { %v8705_v55 = vmax.f32 %v3245_v46, %v3247_v44  ;;  %v2006_v14 = vrot.slane %v1992_v53, %v7799_v36  ;;  %7110 = vmatmul.mubr.msk.f32.gmra.mxu1 %vm3835_vm8, %v3826_v39  ;;  %v8711_v21 = vsel %vm438_vm5, %v2734_v1, -inf  ;;  %v2782_v50 = vrot.slane %v2481_v63, %v7799_v36 }
 0x16e   :  { %v3508_v2 = vpop.permute.xlu1 %3507  ;;  %v1989_v42 = vrot.slane %v1975_v15, %v7799_v36  ;;  %v1990_v31 = vcombine.high %v1982_v30, %v1982_v30  ;;  %v8716_v17 = vsel %vm3246_vm9, %v2750_v40, -inf  ;;  %v2484_v3 = vmax.f32 %v1974_v61, 0.0 }
 0x16f   :  { %v3651_v32 = vpop.permute.xlu0 %3650  ;;  %v2792_v29 = vrot.slane %v8701_v16, %v7799_v36  ;;  %v8721_v60 = vcombine.low %v2775_v54, %v2782_v50  ;;  %v8724_v37 = vsel %vm438_vm5, %v2767_v27, -inf  ;;  %v3716_v35 = vsel %vm1583_vm6, %v8551_v12, %v3506_v7 }
 0x170   :  { %v2007_v48 = vcombine.high %v1999_v43, %v1999_v43  ;;  %v2008_v51 = vcombine.high %v2006_v14, %v2006_v14  ;;  %v2485_v10 = vmax.f32 %v1982_v30, 0.0  ;;  %v3749_v38 = vsel %vm3718_vm7, %v3716_v35, %v3651_v32 }
 0x171   :  { %v7041_v28 = vpop.f32.mrf.mxu0  ;;  %v2486_v45 = vmax.f32 %v1990_v31, 0.0  ;;  %v2487_v13 = vmax.f32 %v1989_v42, 0.0  ;;  %v1991_v47 = vcombine.high %v1989_v42, %v1989_v42  ;;  %v3715_v58 = vsel %vm1583_vm6, %v8530_v11, %v3504_v22 }
 0x172   :  { %v1752_v6 = vadd.f32 %v7041_v28, %v8615_v4  ;;  %v3653_v19 = vpop.permute.xlu1 %3652  ;;  %v3717_v12 = vsel %vm1583_vm6, %v8577_v9, %v3508_v2  ;;  %v3803_v57 = vcombine.high %v3749_v38, %v3749_v38  ;;  %v2490_v46 = vmax.f32 %v2007_v48, 0.0 }
 0x173   :  { %v1746_v26 = vpop.f32.mrf.mxu0  ;;  %v3649_v24 = vpop.permute.xlu0 %3648  ;;  %v3750_v41 = vsel %vm3718_vm7, %v3717_v12, %v3653_v19  ;;  %v2492_v28 = vmax.f32 %v2008_v51, 0.0  ;;  %v2785_v11 = vcombine.low %v2484_v3, %v2485_v10  ;;  %v2801_v22 = vcombine.low %v2486_v45, %v2487_v13 }
 0x174   :  { %v1747_v18 = vadd.f32 %v1746_v26, %v8592_v23  ;;  %v2026_v5 = vcombine.high %v1752_v6, %v1752_v6  ;;  %v2033_v52 = vrot.slane %v1752_v6, %v7799_v36  ;;  %v3748_v34 = vsel %vm3718_vm7, %v3715_v58, %v3649_v24 }
 0x175   :  { %v2489_v63 = vmax.f32 %v1999_v43, 0.0  ;;  %v3827_v40 = vcombine.low %v3748_v34, %v3749_v38  ;;  %v2491_v61 = vmax.f32 %v2006_v14, 0.0  ;;  %v2488_v39 = vmax.f32 %v1991_v47, 0.0 }
 0x176   :  { %v2009_v49 = vcombine.high %v1747_v18, %v1747_v18  ;;  %v2016_v7 = vrot.slane %v1747_v18, %v7799_v36  ;;  %v2040_v9 = vrot.slane %v2026_v5, %v7799_v36  ;;  %v2041_v32 = vcombine.high %v2033_v52, %v2033_v52 }
 0x177   :  { %v3828_v44 = vcombine.low %v3803_v57, %v3750_v41  ;;  %v2817_v27 = vcombine.low %v2489_v63, %v2490_v46  ;;  %7112 = vmatprep.mubr.msk.f32.mxu1 %vm3835_vm8, %v3827_v40  ;;  %v2818_v50 = vcombine.low %v2491_v61, %v2492_v28  ;;  %v2799_v42 = vrot.slane %v2785_v11, %v7799_v36 }
 0x178   :  { %v7044_v59 = vpop.f32.mrf.mxu0  ;;  %v2023_v20 = vrot.slane %v2009_v49, %v7799_v36  ;;  %v2024_v0 = vcombine.high %v2016_v7, %v2016_v7  ;;  %v2493_v54 = vmax.f32 %v2016_v7, 0.0  ;;  %v2808_v31 = vrot.slane %v2801_v22, %v7799_v36 }
 0x179   :  { %v1762_v53 = vadd.f32 %v7044_v59, %v8629_v8  ;;  %v2042_v43 = vcombine.high %v2040_v9, %v2040_v9  ;;  %7113 = vmatmul.mubr.msk.f32.gmra.mxu1 %vm3835_vm8, %v3828_v44  ;;  %v2815_v18 = vrot.slane %v2488_v39, %v7799_v36  ;;  %v2497_v48 = vmax.f32 %v2033_v52, 0.0 }
 0x17a   :  { %v1756_v1 = vpop.f32.mrf.mxu0  ;;  %v2025_v15 = vcombine.high %v2023_v20, %v2023_v20  ;;  %v2494_v30 = vmax.f32 %v2024_v0, 0.0  ;;  %v2498_v51 = vmax.f32 %v2041_v32, 0.0  ;;  %v2499_v38 = vmax.f32 %v2040_v9, 0.0 }
 0x17b   :  { %v2060_v2 = vcombine.high %v1762_v53, %v1762_v53  ;;  %v1757_v26 = vadd.f32 %v1756_v1, %v8620_v56  ;;  %v2067_v6 = vrot.slane %v1762_v53, %v7799_v36  ;;  %v2495_v24 = vmax.f32 %v2023_v20, 0.0 }
 0x17c   :  { %v2496_v3 = vmax.f32 %v2025_v15, 0.0  ;;  %v2834_v14 = vcombine.low %v2493_v54, %v2494_v30  ;;  %v2832_v19 = vrot.slane %v2818_v50, %v7799_v36  ;;  %v2500_v49 = vmax.f32 %v2042_v43, 0.0 }
 0x17d   :  { %v2043_v35 = vcombine.high %v1757_v26, %v1757_v26  ;;  %v2050_v10 = vrot.slane %v1757_v26, %v7799_v36  ;;  %v2074_v45 = vrot.slane %v2060_v2, %v7799_v36  ;;  %v2075_v7 = vcombine.high %v2067_v6, %v2067_v6 }
 0x17e   :  { %v2841_v58 = vrot.slane %v2834_v14, %v7799_v36  ;;  %v2850_v12 = vcombine.low %v2496_v3, %v2497_v48  ;;  %v2825_v52 = vrot.slane %v2817_v27, %v7799_v36  ;;  %v2851_v41 = vcombine.low %v2498_v51, %v2499_v38 }
 0x17f   :  { %v2057_v13 = vrot.slane %v2043_v35, %v7799_v36  ;;  %v2058_v59 = vcombine.high %v2050_v10, %v2050_v10  ;;  %v2501_v47 = vmax.f32 %v2050_v10, 0.0  ;;  %v2848_v0 = vrot.slane %v2495_v24, %v7799_v36 }
 0x180   :  { %v2076_v53 = vcombine.high %v2074_v45, %v2074_v45  ;;  %v3265_v22 = vsel %vm3246_vm9, %v8721_v60, -inf  ;;  %v2833_v9 = vcombine.low %v2825_v52, %v2832_v19  ;;  %v2800_v1 = vcombine.low %v2792_v29, %v2799_v42 }
 0x181   :  { %v2059_v57 = vcombine.high %v2057_v13, %v2057_v13  ;;  %v2502_v34 = vmax.f32 %v2058_v59, 0.0  ;;  %v2867_v46 = vcombine.low %v2500_v49, %v2501_v47  ;;  %v2816_v63 = vcombine.low %v2808_v31, %v2815_v18 }
 0x182   :  { %v2849_v15 = vcombine.low %v2841_v58, %v2848_v0  ;;  %v2858_v30 = vrot.slane %v2850_v12, %v7799_v36  ;;  %v2506_v40 = vmax.f32 %v2075_v7, 0.0  ;;  %v2503_v61 = vmax.f32 %v2057_v13, 0.0 }
 0x183   :  { %v2504_v28 = vmax.f32 %v2059_v57, 0.0  ;;  %v2874_v39 = vrot.slane %v2867_v46, %v7799_v36  ;;  %v2881_v32 = vrot.slane %v2502_v34, %v7799_v36  ;;  %v2865_v60 = vrot.slane %v2851_v41, %v7799_v36 }
 0x184   :  { %v2505_v54 = vmax.f32 %v2067_v6, 0.0  ;;  %v2508_v2 = vmax.f32 %v2076_v53, 0.0  ;;  %v3257_v16 = vmax.f32 %v8711_v21, %v8716_v17  ;;  %v3266_v29 = vmax.f32 %v8724_v37, %v3265_v22 }
 0x185   :  { %v2883_v26 = vcombine.low %v2503_v61, %v2504_v28  ;;  %v3274_v50 = vsel %vm3246_vm9, %v2816_v63, -inf  ;;  %v2866_v31 = vcombine.low %v2858_v30, %v2865_v60  ;;  %v3283_v43 = vsel %vm3246_vm9, %v2849_v15, -inf }
 0x186   :  { %v2507_v3 = vmax.f32 %v2074_v45, 0.0  ;;  %v2884_v14 = vcombine.low %v2505_v54, %v2506_v40  ;;  %v2882_v35 = vcombine.low %v2874_v39, %v2881_v32  ;;  %v3282_v51 = vsel %vm438_vm5, %v2833_v9, -inf }
 0x187   :  { %v7047_v5 = vpop.f32.mrf.mxu0  ;;  %v3273_v21 = vsel %vm438_vm5, %v2800_v1, -inf  ;;  %v2891_v37 = vrot.slane %v2883_v26, %v7799_v36  ;;  %v3291_v49 = vsel %vm438_vm5, %v2866_v31, -inf  ;;  %v3258_v53 = vrot.slane %v3257_v16, 4 }
 0x188   :  { %v1772_v20 = vadd.f32 %v7047_v5, %v8660_v62  ;;  %v2900_v17 = vcombine.low %v2507_v3, %v2508_v2  ;;  %v3275_v45 = vmax.f32 %v3273_v21, %v3274_v50  ;;  %v3284_v5 = vmax.f32 %v3282_v51, %v3283_v43 }
 0x189   :  { %v1766_v11 = vpop.f32.mrf.mxu0  ;;  %v2898_v19 = vrot.slane %v2884_v14, %v7799_v36  ;;  %v3292_v59 = vsel %vm3246_vm9, %v2882_v35, -inf  ;;  %v3249_v22 = vrot.slane %v8705_v55, 4  ;;  %v3267_v9 = vrot.slane %v3266_v29, 4 }
 0x18a   :  { %v2094_v44 = vcombine.high %v1772_v20, %v1772_v20  ;;  %v1767_v27 = vadd.f32 %v1766_v11, %v8643_v25  ;;  %v2101_v42 = vrot.slane %v1772_v20, %v7799_v36  ;;  %v2907_v52 = vrot.slane %v2900_v17, %v7799_v36 }
 0x18b   :  { %v2899_v7 = vcombine.low %v2891_v37, %v2898_v19  ;;  %v3293_v28 = vmax.f32 %v3291_v49, %v3292_v59  ;;  %v3276_v63 = vrot.slane %v3275_v45, 4  ;;  %v3285_v15 = vrot.slane %v3284_v5, 4  ;;  %v7081_v19 = vpop.f32.mrf.mxu1 }
 0x18c   :  { %v2108_v18 = vrot.slane %v2094_v44, %v7799_v36  ;;  %v2077_v6 = vcombine.high %v1767_v27, %v1767_v27  ;;  %v2084_v48 = vrot.slane %v1767_v27, %v7799_v36  ;;  %v2109_v10 = vcombine.high %v2101_v42, %v2101_v42 }
 0x18d   :  { %v2513_v58 = vmax.f32 %v2101_v42, 0.0  ;;  %v3300_v30 = vsel %vm438_vm5, %v2899_v7, -inf  ;;  %v3259_v27 = vmax.f32 %v3257_v16, %v3258_v53  ;;  %v3294_v60 = vrot.slane %v3293_v28, 4 }
 0x18e   :  { %v2091_v38 = vrot.slane %v2077_v6, %v7799_v36  ;;  %v2092_v24 = vcombine.high %v2084_v48, %v2084_v48  ;;  %v2509_v13 = vmax.f32 %v2084_v48, 0.0  ;;  %v2110_v47 = vcombine.high %v2108_v18, %v2108_v18 }
 0x18f   :  { %v2515_v57 = vmax.f32 %v2108_v18, 0.0  ;;  %v2514_v46 = vmax.f32 %v2109_v10, 0.0  ;;  %v3268_v54 = vmax.f32 %v3266_v29, %v3267_v9  ;;  %v3250_v26 = vmax.f32 %v8705_v55, %v3249_v22  ;;  %v6828_v10 = vld [vmem:[%s9723_s6] ss:$0 sm:$0xff] }
 0x190   :  { %v2093_v12 = vcombine.high %v2091_v38, %v2091_v38  ;;  %v2914_v34 = vrot.slane %v2509_v13, %v7799_v36  ;;  %v2510_v20 = vmax.f32 %v2092_v24, 0.0  ;;  %v2511_v41 = vmax.f32 %v2091_v38, 0.0 }
 0x191   :  { %v2516_v61 = vmax.f32 %v2110_v47, 0.0  ;;  %v2933_v39 = vcombine.low %v2514_v46, %v2515_v57  ;;  %v3277_v50 = vmax.f32 %v3275_v45, %v3276_v63  ;;  %v3286_v42 = vmax.f32 %v3284_v5, %v3285_v15 }
 0x192   :  { %v2512_v0 = vmax.f32 %v2093_v12, 0.0  ;;  %v2915_v11 = vcombine.low %v2907_v52, %v2914_v34  ;;  %v2916_v32 = vcombine.low %v2510_v20, %v2511_v41  ;;  %v3260_v35 = vrot.slane %v3259_v27, 2 }
 0x193   :  { %v2940_v31 = vrot.slane %v2933_v39, %v7799_v36  ;;  %v2947_v43 = vrot.slane %v2516_v61, %v7799_v36  ;;  %v3295_v18 = vmax.f32 %v3293_v28, %v3294_v60  ;;  %v3269_v6 = vrot.slane %v3268_v54, 2 }
 0x194   :  { %v2917_v1 = vcombine.low %v2512_v0, %v2513_v58  ;;  %v3301_v40 = vsel %vm3246_vm9, %v2915_v11, -inf  ;;  %v2924_v3 = vrot.slane %v2916_v32, %v7799_v36  ;;  %v3251_v16 = vrot.slane %v3250_v26, 2  ;;  %v3950_v0 = vpop.f32.mrf.mxu1 }
 0x195   :  { %v3302_v44 = vmax.f32 %v3300_v30, %v3301_v40  ;;  %v3278_v51 = vrot.slane %v3277_v50, 2  ;;  %v3287_v29 = vrot.slane %v3286_v42, 2  ;;  %v2948_v21 = vcombine.low %v2940_v31, %v2947_v43 }
 0x196   :  { %v2931_v2 = vrot.slane %v2917_v1, %v7799_v36  ;;  %v3261_v37 = vmax.f32 %v3259_v27, %v3260_v35  ;;  %v3296_v55 = vrot.slane %v3295_v18, 2  ;;  %v3270_v38 = vmax.f32 %v3268_v54, %v3269_v6 }
 0x197   :  { %v3303_v14 = vrot.slane %v3302_v44, 4  ;;  %v3252_v13 = vmax.f32 %v3250_v26, %v3251_v16  ;;  %v3279_v45 = vmax.f32 %v3277_v50, %v3278_v51  ;;  %v3310_v5 = vsel %vm3246_vm9, %v2948_v21, -inf }
 0x198   :  { %v2932_v48 = vcombine.low %v2924_v3, %v2931_v2  ;;  %v3804_v49 = vcombine.high %v6828_v10, %v6828_v10  ;;  %v3288_v59 = vmax.f32 %v3286_v42, %v3287_v29  ;;  %v3262_v58 = vrot.slane %v3261_v37, 1  ;;  %v7084_v1 = vpop.f32.mrf.mxu1 }
 0x199   :  { %v3304_v17 = vmax.f32 %v3302_v44, %v3303_v14  ;;  %v3297_v12 = vmax.f32 %v3295_v18, %v3296_v55  ;;  %v3271_v57 = vrot.slane %v3270_v38, 1  ;;  %v3253_v34 = vrot.slane %v3252_v13, 1 }
 0x19a   :  { %v3309_v24 = vsel %vm438_vm5, %v2932_v48, -inf  ;;  %v3280_v46 = vrot.slane %v3279_v45, 1  ;;  %v8796_v41 = vcombine.low %v6828_v10, %v3804_v49  ;;  %v3289_v53 = vrot.slane %v3288_v59, 1  ;;  %v3960_v2 = vpop.f32.mrf.mxu1 }
 0x19b   :  { %v3305_v47 = vrot.slane %v3304_v17, 2  ;;  %v3311_v7 = vmax.f32 %v3309_v24, %v3310_v5  ;;  %v3263_v28 = vmax.f32 %v3261_v37, %v3262_v58  ;;  %v3298_v11 = vrot.slane %v3297_v12, 1 }
 0x19c   :  { %v8798_v9 = vcombine.low %v6828_v10, %v6828_v10  ;;  %v3272_v63 = vmax.f32 %v3270_v38, %v3271_v57  ;;  %v3254_v30 = vmax.f32 %v3252_v13, %v3253_v34  ;;  %v3281_v40 = vmax.f32 %v3279_v45, %v3280_v46  ;;  %v7050_v31 = vpop.f32.mrf.mxu0 }
 0x19d   :  { %v3306_v52 = vmax.f32 %v3304_v17, %v3305_v47  ;;  %v3312_v20 = vrot.slane %v3311_v7, 4  ;;  %v3951_v39 = vadd.f32 %v3950_v0, %v8796_v41  ;;  %v8801_v32 = vcombine.low %v3804_v49, %v6828_v10 }
 0x19e   :  { %v3290_v44 = vmax.f32 %v3288_v59, %v3289_v53  ;;  %v3299_v27 = vmax.f32 %v3297_v12, %v3298_v11  ;;  %v4467_v54 = vsel %vm4466_vm10, %v3263_v28, %v3254_v30  ;;  %v3956_v42 = vadd.f32 %v7081_v19, %v8798_v9  ;;  %v1776_v29 = vpop.f32.mrf.mxu0 }
 0x19f   :  { %v3313_v22 = vmax.f32 %v3311_v7, %v3312_v20  ;;  %v3307_v15 = vrot.slane %v3306_v52, 1  ;;  %v4469_v50 = vsel %vm4468_vm11, %v3272_v63, %v4467_v54  ;;  %v4093_v14 = vcombine.high %v3951_v39, %v3951_v39 }
 0x1a0   :  { %v4471_v3 = vsel %vm4470_vm12, %v3281_v40, %v4469_v50  ;;  %v3961_v18 = vadd.f32 %v3960_v2, %v8801_v32  ;;  %v4094_v51 = vcombine.high %v3956_v42, %v3956_v42  ;;  %v4141_v38 = vmax.f32 %v3951_v39, 0.0 }
 0x1a1   :  { %v3314_v61 = vrot.slane %v3313_v22, 2  ;;  %v3308_v26 = vmax.f32 %v3306_v52, %v3307_v15  ;;  %v4473_v35 = vsel %vm4472_vm13, %v3290_v44, %v4471_v3  ;;  %v4142_v17 = vmax.f32 %v4093_v14, 0.0 }
 0x1a2   :  { %v4475_v48 = vsel %vm4474_vm14, %v3299_v27, %v4473_v35  ;;  %v4095_v37 = vcombine.high %v3961_v18, %v3961_v18  ;;  %v4145_v55 = vmax.f32 %v3961_v18, 0.0  ;;  %v4144_v24 = vmax.f32 %v4094_v51, 0.0 }
 0x1a3   :  { %v3315_v60 = vmax.f32 %v3313_v22, %v3314_v61  ;;  %v4477_v16 = vsel %vm4476_vm15, %v3308_v26, %v4475_v48  ;;  %v1777_v13 = vadd.f32 %v1776_v29, %v8594_v33  ;;  %v4221_v45 = vcombine.low %v4141_v38, %v4142_v17 }
 0x1a4   :  { %v4146_v5 = vmax.f32 %v4095_v37, 0.0  ;;  %v4222_v19 = vcombine.low %v4144_v24, %v4145_v55  ;;  %v4143_v59 = vmax.f32 %v3956_v42, 0.0  ;;  %v3966_v47 = vadd.f32 %v7084_v1, %v8796_v41 }
 0x1a5   :  { %v3316_v43 = vrot.slane %v3315_v60, 1  ;;  %v2111_v58 = vcombine.high %v1777_v13, %v1777_v13  ;;  %v4253_v7 = vsel %vm438_vm5, %v4221_v45, -inf  ;;  %v1782_v57 = vadd.f32 %v7050_v31, %v8592_v23 }
 0x1a6   :  { %v4263_v34 = vsel %vm438_vm5, %v4222_v19, -inf  ;;  %v4264_v46 = vsel %vm4254_vm1, %v4146_v5, -inf  ;;  %v4255_v20 = vsel %vm4254_vm1, %v4143_v59, -inf  ;;  %v4096_v53 = vcombine.high %v3966_v47, %v3966_v47 }
 0x1a7   :  { %v3317_v6 = vmax.f32 %v3315_v60, %v3316_v43  ;;  %v4256_v0 = vmax.f32 %v4253_v7, %v4255_v20  ;;  %v2125_v28 = vrot.slane %v2111_v58, %v7799_v36  ;;  %v4265_v22 = vmax.f32 %v4263_v34, %v4264_v46 }
 0x1a8   :  { %v2135_v1 = vrot.slane %v1782_v57, %v7799_v36  ;;  %v2118_v15 = vrot.slane %v1777_v13, %v7799_v36  ;;  %v2128_v30 = vcombine.high %v1782_v57, %v1782_v57  ;;  %v4148_v39 = vmax.f32 %v4096_v53, 0.0 }
 0x1a9   :  { %v4479_v21 = vsel %vm4478_vm0, %v3317_v6, %v4477_v16  ;;  %v4257_v61 = vrot.slane %v4256_v0, 4  ;;  %v2127_v44 = vcombine.high %v2125_v28, %v2125_v28  ;;  %v4266_v27 = vrot.slane %v4265_v22, 4 }
 0x1aa   :  { %4487 = vrot.lane.b32.xlu0 %v4479_v21, %s7412_s16  ;;  %v2143_v60 = vcombine.high %v2135_v1, %v2135_v1  ;;  %v4147_v2 = vmax.f32 %v3966_v47, 0.0  ;;  %v2126_v26 = vcombine.high %v2118_v15, %v2118_v15  ;;  %v2142_v42 = vrot.slane %v2128_v30, %v7799_v36 }
 0x1ab   :  { %v4258_v3 = vmax.f32 %v4256_v0, %v4257_v61  ;;  %v2520_v35 = vmax.f32 %v2127_v44, 0.0  ;;  %v4267_v6 = vmax.f32 %v4265_v22, %v4266_v27  ;;  %v2521_v48 = vmax.f32 %v2135_v1, 0.0 }
 0x1ac   :  { %v4223_v14 = vcombine.low %v4147_v2, %v4148_v39  ;;  %v2522_v16 = vmax.f32 %v2143_v60, 0.0  ;;  %v2518_v29 = vmax.f32 %v2126_v26, 0.0  ;;  %v2519_v21 = vmax.f32 %v2125_v28, 0.0 }
 0x1ad   :  { %v2144_v55 = vcombine.high %v2142_v42, %v2142_v42  ;;  %v2517_v13 = vmax.f32 %v2118_v15, 0.0 }
 0x1ae   :  { %v2950_v45 = vcombine.low %v2519_v21, %v2520_v35  ;;  %v2966_v59 = vcombine.low %v2521_v48, %v2522_v16  ;;  %v4272_v1 = vsel %vm438_vm5, %v4223_v14, -inf }
 0x1af   :  { %v7053_v10 = vpop.f32.mrf.mxu0  ;;  %v7087_v12 = vpop.f32.mrf.mxu1  ;;  %v2949_v7 = vcombine.low %v2517_v13, %v2518_v29  ;;  %v2524_v39 = vmax.f32 %v2144_v55, 0.0 }
 0x1b0   :  { %v1792_v50 = vadd.f32 %v7053_v10, %v8620_v56  ;;  %v3976_v18 = vadd.f32 %v7087_v12, %v8801_v32  ;;  %v2523_v10 = vmax.f32 %v2142_v42, 0.0  ;;  %v4268_v12 = vrot.slane %v4267_v6, 2 }
 0x1b1   :  { %v1786_v49 = vpop.f32.mrf.mxu0  ;;  %v3970_v11 = vpop.f32.mrf.mxu1  ;;  %v2964_v28 = vrot.slane %v2950_v45, %v7799_v36  ;;  %v2957_v27 = vrot.slane %v2949_v7, %v7799_v36 }
 0x1b2   :  { %v1787_v52 = vadd.f32 %v1786_v49, %v8615_v4  ;;  %v3971_v40 = vadd.f32 %v3970_v11, %v8798_v9  ;;  %v2169_v17 = vrot.slane %v1792_v50, %v7799_v36  ;;  %v2162_v5 = vcombine.high %v1792_v50, %v1792_v50 }
 0x1b3   :  { %v4098_v19 = vcombine.high %v3976_v18, %v3976_v18  ;;  %v4259_v49 = vrot.slane %v4258_v3, 2  ;;  %v4151_v47 = vmax.f32 %v3976_v18, 0.0  ;;  %v2980_v44 = vrot.slane %v2523_v10, %v7799_v36 }
 0x1b4   :  { %v2145_v63 = vcombine.high %v1787_v52, %v1787_v52  ;;  %v2152_v31 = vrot.slane %v1787_v52, %v7799_v36  ;;  %v4097_v43 = vcombine.high %v3971_v40, %v3971_v40  ;;  %v4149_v37 = vmax.f32 %v3971_v40, 0.0 }
 0x1b5   :  { %v2177_v57 = vcombine.high %v2169_v17, %v2169_v17  ;;  %v2529_v46 = vmax.f32 %v2169_v17, 0.0  ;;  %v2176_v11 = vrot.slane %v2162_v5, %v7799_v36  ;;  %v4152_v22 = vmax.f32 %v4098_v19, 0.0 }
 0x1b6   :  { %v2159_v54 = vrot.slane %v2145_v63, %v7799_v36  ;;  %v2160_v38 = vcombine.high %v2152_v31, %v2152_v31  ;;  %v4150_v24 = vmax.f32 %v4097_v43, 0.0  ;;  %v4273_v52 = vsel %vm4254_vm1, %v4149_v37, -inf }
 0x1b7   :  { %v2525_v15 = vmax.f32 %v2152_v31, 0.0  ;;  %v4274_v40 = vmax.f32 %v4272_v1, %v4273_v52  ;;  %v4260_v61 = vmax.f32 %v4258_v3, %v4259_v49  ;;  %v2530_v2 = vmax.f32 %v2177_v57, 0.0 }
 0x1b8   :  { %v2161_v51 = vcombine.high %v2159_v54, %v2159_v54  ;;  %v2526_v20 = vmax.f32 %v2160_v38, 0.0  ;;  %v2527_v0 = vmax.f32 %v2159_v54, 0.0  ;;  %v4224_v53 = vcombine.low %v4150_v24, %v4151_v47 }
 0x1b9   :  { %v2973_v54 = vrot.slane %v2966_v59, %v7799_v36  ;;  %v4269_v42 = vmax.f32 %v4267_v6, %v4268_v12  ;;  %v2965_v43 = vcombine.low %v2957_v27, %v2964_v28  ;;  %v2178_v14 = vcombine.high %v2176_v11, %v2176_v11 }
 0x1ba   :  { %v2528_v58 = vmax.f32 %v2161_v51, 0.0  ;;  %v2983_v26 = vcombine.low %v2526_v20, %v2527_v0  ;;  %v4281_v50 = vsel %vm438_vm5, %v4224_v53, -inf  ;;  %v4282_v31 = vsel %vm4254_vm1, %v4152_v22, -inf }
 0x1bb   :  { %v2982_v18 = vcombine.low %v2524_v39, %v2525_v15  ;;  %v4275_v48 = vrot.slane %v4274_v40, 4  ;;  %v4261_v29 = vrot.slane %v4260_v61, 1  ;;  %v4283_v21 = vmax.f32 %v4281_v50, %v4282_v31 }
 0x1bc   :  { %v2999_v30 = vcombine.low %v2528_v58, %v2529_v46  ;;  %v2981_v17 = vcombine.low %v2973_v54, %v2980_v44  ;;  %v3013_v37 = vrot.slane %v2530_v2, %v7799_v36  ;;  %v2997_v55 = vrot.slane %v2983_v26, %v7799_v36 }
 0x1bd   :  { %v4270_v10 = vrot.slane %v4269_v42, 1  ;;  %v3318_v38 = vsel %vm438_vm5, %v2965_v43, -inf  ;;  %v2532_v24 = vmax.f32 %v2178_v14, 0.0  ;;  %v2990_v13 = vrot.slane %v2982_v18, %v7799_v36 }
 0x1be   :  { %v3006_v3 = vrot.slane %v2999_v30, %v7799_v36  ;;  %v4276_v5 = vmax.f32 %v4274_v40, %v4275_v48  ;;  %v2531_v59 = vmax.f32 %v2176_v11, 0.0  ;;  %v4284_v47 = vrot.slane %v4283_v21, 4 }
 0x1bf   :  { %v4262_v7 = vmax.f32 %v4260_v61, %v4261_v29  ;;  %v3319_v57 = vsel %vm3246_vm9, %v2981_v17, -inf  ;;  %v2998_v52 = vcombine.low %v2990_v13, %v2997_v55  ;;  %v4271_v20 = vmax.f32 %v4269_v42, %v4270_v10 }
 0x1c0   :  { %v7056_v63 = vpop.f32.mrf.mxu0  ;;  %v3014_v45 = vcombine.low %v3006_v3, %v3013_v37  ;;  %v8850_v0 = vmax.f32 %v3318_v38, %v3319_v57  ;;  %v8852_v53 = vcombine.low %v2531_v59, %v2532_v24  ;;  %v4277_v11 = vrot.slane %v4276_v5, 2 }
 0x1c1   :  { %v1802_v58 = vadd.f32 %v7056_v63, %v8643_v25  ;;  %v4285_v15 = vmax.f32 %v4283_v21, %v4284_v47  ;;  %v3327_v61 = vsel %vm438_vm5, %v2998_v52, -inf }
 0x1c2   :  { %v1796_v35 = vpop.f32.mrf.mxu0  ;;  %v3328_v22 = vsel %vm3246_vm9, %v3014_v45, -inf  ;;  %v3321_v50 = vrot.slane %v8850_v0, 4  ;;  %v4278_v42 = vmax.f32 %v4276_v5, %v4277_v11 }
 0x1c3   :  { %v7090_v34 = vpop.f32.mrf.mxu1  ;;  %v1797_v6 = vadd.f32 %v1796_v35, %v8629_v8  ;;  %v2203_v30 = vrot.slane %v1802_v58, %v7799_v36  ;;  %v8864_v54 = vmax.f32 %v3327_v61, %v3328_v22  ;;  %v4286_v31 = vrot.slane %v4285_v15, 2 }
 0x1c4   :  { %v3986_v12 = vadd.f32 %v7090_v34, %v8798_v9  ;;  %v2196_v34 = vcombine.high %v1802_v58, %v1802_v58  ;;  %v4279_v10 = vrot.slane %v4278_v42, 1 }
 0x1c5   :  { %v3980_v60 = vpop.f32.mrf.mxu1  ;;  %v2179_v46 = vcombine.high %v1797_v6, %v1797_v6  ;;  %v2186_v39 = vrot.slane %v1797_v6, %v7799_v36  ;;  %v2211_v18 = vcombine.high %v2203_v30, %v2203_v30  ;;  %v3330_v17 = vrot.slane %v8864_v54, 4 }
 0x1c6   :  { %v3981_v16 = vadd.f32 %v3980_v60, %v8796_v41  ;;  %v4100_v40 = vcombine.high %v3986_v12, %v3986_v12  ;;  %v8862_v60 = vsel %vm4466_vm10, %v4271_v20, %v4262_v7  ;;  %v2210_v35 = vrot.slane %v2196_v34, %v7799_v36 }
 0x1c7   :  { %v2193_v44 = vrot.slane %v2179_v46, %v7799_v36  ;;  %v4155_v21 = vmax.f32 %v3986_v12, 0.0  ;;  %v2537_v37 = vmax.f32 %v2203_v30, 0.0  ;;  %v4287_v45 = vmax.f32 %v4285_v15, %v4286_v31 }
 0x1c8   :  { %v4099_v19 = vcombine.high %v3981_v16, %v3981_v16  ;;  %v4153_v27 = vmax.f32 %v3981_v16, 0.0  ;;  %v4156_v3 = vmax.f32 %v4100_v40, 0.0  ;;  %v3023_v16 = vrot.slane %v8852_v53, %v7799_v36 }
 0x1c9   :  { %v2195_v29 = vcombine.high %v2193_v44, %v2193_v44  ;;  %v2212_v5 = vcombine.high %v2210_v35, %v2210_v35  ;;  %v4291_v58 = vsel %vm4254_vm1, %v4155_v21, -inf  ;;  %v2533_v22 = vmax.f32 %v2186_v39, 0.0 }
 0x1ca   :  { %v4154_v1 = vmax.f32 %v4099_v19, 0.0  ;;  %v2538_v19 = vmax.f32 %v2211_v18, 0.0  ;;  %v3046_v15 = vrot.slane %v2537_v37, %v7799_v36  ;;  %v2535_v34 = vmax.f32 %v2193_v44, 0.0 }
 0x1cb   :  { %v2536_v47 = vmax.f32 %v2195_v29, 0.0  ;;  %v4288_v61 = vrot.slane %v4287_v45, 1 }
 0x1cc   :  { %v4225_v43 = vcombine.low %v4153_v27, %v4154_v1  ;;  %v8879_v27 = vmax.f32 %v2212_v5, 0.0 }
 0x1ce   :  { %v4290_v38 = vsel %vm438_vm5, %v4225_v43, -inf  ;;  %v3032_v43 = vcombine.low %v2535_v34, %v2536_v47 }
 0x1cf   :  { %v4292_v57 = vmax.f32 %v4290_v38, %v4291_v58 }
 0x1d1   :  { %v7093_v51 = vpop.f32.mrf.mxu1 }
 0x1d2   :  { %v3996_v63 = vadd.f32 %v7093_v51, %v8796_v41  ;;  %v2194_v51 = vcombine.high %v2186_v39, %v2186_v39 }
 0x1d3   :  { %v3990_v49 = vpop.f32.mrf.mxu1 }
 0x1d4   :  { %v3991_v28 = vadd.f32 %v3990_v49, %v8801_v32  ;;  %v4102_v14 = vcombine.high %v3996_v63, %v3996_v63  ;;  %v7059_v48 = vpop.f32.mrf.mxu0  ;;  %v2539_v49 = vmax.f32 %v2210_v35, 0.0  ;;  %v2534_v59 = vmax.f32 %v2194_v51, 0.0 }
 0x1d5   :  { %v1812_v13 = vadd.f32 %v7059_v48, %v8594_v33  ;;  %v4159_v12 = vmax.f32 %v3996_v63, 0.0 }
 0x1d6   :  { %v4101_v2 = vcombine.high %v3991_v28, %v3991_v28  ;;  %v4157_v26 = vmax.f32 %v3991_v28, 0.0  ;;  %v4160_v24 = vmax.f32 %v4102_v14, 0.0  ;;  %v4280_v28 = vmax.f32 %v4278_v42, %v4279_v10  ;;  %v1806_v30 = vpop.f32.mrf.mxu0 }
 0x1d7   :  { %v2230_v11 = vcombine.high %v1812_v13, %v1812_v13  ;;  %v4293_v14 = vrot.slane %v4292_v57, 4  ;;  %v2237_v35 = vrot.slane %v1812_v13, %v7799_v36  ;;  %v1807_v44 = vadd.f32 %v1806_v30, %v8660_v62 }
 0x1d8   :  { %v4158_v55 = vmax.f32 %v4101_v2, 0.0  ;;  %v4226_v6 = vcombine.low %v4156_v3, %v4157_v26  ;;  %v4227_v33 = vcombine.low %v4159_v12, %v4160_v24  ;;  %v3016_v2 = vcombine.low %v2533_v22, %v2534_v59 }
 0x1d9   :  { %v2244_v18 = vrot.slane %v2230_v11, %v7799_v36  ;;  %v4289_v24 = vmax.f32 %v4287_v45, %v4288_v61  ;;  %v3039_v13 = vrot.slane %v3032_v43, %v7799_v36  ;;  %v4294_v5 = vmax.f32 %v4292_v57, %v4293_v14 }
 0x1da   :  { %v4299_v52 = vsel %vm438_vm5, %v4226_v6, -inf  ;;  %v4300_v46 = vsel %vm4254_vm1, %v4158_v55, -inf  ;;  %v4308_v3 = vsel %vm438_vm5, %v4227_v33, -inf  ;;  %v8886_v55 = vcombine.low %v2538_v19, %v2539_v49 }
 0x1db   :  { %v4301_v26 = vmax.f32 %v4299_v52, %v4300_v46  ;;  %v3030_v6 = vrot.slane %v3016_v2, %v7799_v36  ;;  %v2245_v47 = vcombine.high %v2237_v35, %v2237_v35  ;;  %v2213_v58 = vcombine.high %v1807_v44, %v1807_v44 }
 0x1dc   :  { %v2246_v52 = vcombine.high %v2244_v18, %v2244_v18  ;;  %v2220_v46 = vrot.slane %v1807_v44, %v7799_v36  ;;  %v4295_v33 = vrot.slane %v4294_v5, 2  ;;  %v3047_v34 = vcombine.low %v3039_v13, %v3046_v15 }
 0x1dd   :  { %v4302_v10 = vrot.slane %v4301_v26, 4  ;;  %v3031_v45 = vcombine.low %v3023_v16, %v3030_v6  ;;  %v2546_v30 = vmax.f32 %v2245_v47, 0.0  ;;  %v2227_v2 = vrot.slane %v2213_v58, %v7799_v36 }
 0x1de   :  { %v2548_v61 = vmax.f32 %v2246_v52, 0.0  ;;  %v2228_v43 = vcombine.high %v2220_v46, %v2220_v46  ;;  %v2545_v14 = vmax.f32 %v2237_v35, 0.0  ;;  %v2541_v35 = vmax.f32 %v2220_v46, 0.0 }
 0x1df   :  { %v4303_v57 = vmax.f32 %v4301_v26, %v4302_v10  ;;  %v3336_v16 = vsel %vm438_vm5, %v3031_v45, -inf }
 0x1e0   :  { %v8909_v44 = vcombine.low %v2545_v14, %v2546_v30  ;;  %v3049_v45 = vcombine.low %v8879_v27, %v2541_v35 }
 0x1e1   :  { %v4304_v26 = vrot.slane %v4303_v57, 2 }
 0x1e2   :  { %v3089_v58 = vrot.slane %v8909_v44, %v7799_v36 }
 0x1e3   :  { %v4305_v10 = vmax.f32 %v4303_v57, %v4304_v26 }
 0x1eb   :  { %v7096_v7 = vpop.f32.mrf.mxu1 }
 0x1ec   :  { %v4006_v20 = vadd.f32 %v7096_v7, %v8801_v32 }
 0x1ed   :  { %v4000_v1 = vpop.f32.mrf.mxu1 }
 0x1ee   :  { %v4104_v40 = vcombine.high %v4006_v20, %v4006_v20  ;;  %v4001_v63 = vadd.f32 %v4000_v1, %v8798_v9  ;;  %v4163_v48 = vmax.f32 %v4006_v20, 0.0  ;;  %v3056_v20 = vrot.slane %v8886_v55, %v7799_v36 }
 0x1ef   :  { %v4510_v1 = vsel %vm4468_vm11, %v4280_v28, %v8862_v60  ;;  %v8968_v55 = vmax.f32 %v8850_v0, %v3321_v50 }
 0x1f0   :  { %v4103_v31 = vcombine.high %v4001_v63, %v4001_v63  ;;  %v4161_v42 = vmax.f32 %v4001_v63, 0.0  ;;  %v7062_v39 = vpop.f32.mrf.mxu0  ;;  %v4164_v51 = vmax.f32 %v4104_v40, 0.0  ;;  %v8905_v53 = vsel %vm4470_vm12, %v4289_v24, %v4510_v1 }
 0x1f2   :  { %v4162_v29 = vmax.f32 %v4103_v31, 0.0  ;;  %v4309_v21 = vsel %vm4254_vm1, %v4161_v42, -inf  ;;  %v1816_v37 = vpop.f32.mrf.mxu0  ;;  %v4318_v19 = vsel %vm4254_vm1, %v4164_v51, -inf  ;;  %v4296_v31 = vmax.f32 %v4294_v5, %v4295_v33  ;;  %v4541_v33 = vld [vmem:[%s9724_s7 + $0x38] sm:$0xff] }
 0x1f3   :  { %v4310_v38 = vmax.f32 %v4308_v3, %v4309_v21  ;;  %v1817_v7 = vadd.f32 %v1816_v37, %v8592_v23  ;;  %v1822_v23 = vadd.f32 %v7062_v39, %v8615_v4  ;;  %v2547_v42 = vmax.f32 %v2244_v18, 0.0  ;;  %7115 = vmatprep.subr.mxu1 %v4541_v33 }
 0x1f4   :  { %v4228_v59 = vcombine.low %v4162_v29, %v4163_v48  ;;  %v3337_v39 = vsel %vm3246_vm9, %v3047_v34, -inf  ;;  %v2229_v29 = vcombine.high %v2227_v2, %v2227_v2  ;;  %v2542_v21 = vmax.f32 %v2228_v43, 0.0  ;;  %7116 = vmatpush3.msra.mxu1 %v4541_v33 }
 0x1f5   :  { %v4311_v12 = vrot.slane %v4310_v38, 4  ;;  %v2254_v63 = vrot.slane %v1817_v7, %v7799_v36  ;;  %v2247_v4 = vcombine.high %v1817_v7, %v1817_v7  ;;  %v2264_v28 = vcombine.high %v1822_v23, %v1822_v23 }
 0x1f6   :  { %v4317_v49 = vsel %vm438_vm5, %v4228_v59, -inf  ;;  %v8911_v51 = vcombine.low %v2547_v42, %v2548_v61  ;;  %v2543_v37 = vmax.f32 %v2227_v2, 0.0  ;;  %v4297_v24 = vrot.slane %v4296_v31, 1 }
 0x1f7   :  { %v4319_v22 = vmax.f32 %v4317_v49, %v4318_v19  ;;  %v4312_v11 = vmax.f32 %v4310_v38, %v4311_v12  ;;  %v2262_v48 = vcombine.high %v2254_v63, %v2254_v63  ;;  %v2261_v38 = vrot.slane %v2247_v4, %v7799_v36 }
 0x1f8   :  { %v2271_v5 = vrot.slane %v1822_v23, %v7799_v36  ;;  %v2278_v59 = vrot.slane %v2264_v28, %v7799_v36  ;;  %v8917_v47 = vmax.f32 %v3336_v16, %v3337_v39  ;;  %v3096_v52 = vrot.slane %v8911_v51, %v7799_v36 }
 0x1f9   :  { %v4320_v40 = vrot.slane %v4319_v22, 4  ;;  %v4313_v60 = vrot.slane %v4312_v11, 2  ;;  %v2550_v12 = vmax.f32 %v2262_v48, 0.0  ;;  %v2544_v46 = vmax.f32 %v2229_v29, 0.0 }
 0x1fa   :  { %v3065_v19 = vcombine.low %v2542_v21, %v2543_v37  ;;  %v4306_v49 = vrot.slane %v4305_v10, 1  ;;  %v2263_v57 = vcombine.high %v2261_v38, %v2261_v38  ;;  %v4298_v23 = vmax.f32 %v4296_v31, %v4297_v24 }
 0x1fb   :  { %v4321_v3 = vmax.f32 %v4319_v22, %v4320_v40  ;;  %v4314_v13 = vmax.f32 %v4312_v11, %v4313_v60  ;;  %v2549_v22 = vmax.f32 %v2254_v63, 0.0  ;;  %v4540_v11 = vld [vmem:[%s9724_s7 + $0x30] sm:$0xff]  ;;  %v2279_v34 = vcombine.high %v2271_v5, %v2271_v5  ;;  %v4539_v63 = vld [vmem:[%s9724_s7 + $0x28] sm:$0xff] }
 0x1fc   :  { %v7065_v15 = vpop.f32.mrf.mxu0  ;;  %v2280_v30 = vcombine.high %v2278_v59, %v2278_v59  ;;  %v3072_v43 = vrot.slane %v3065_v19, %v7799_v36  ;;  %v3079_v16 = vrot.slane %v2544_v46, %v7799_v36  ;;  %7117 = vmatprep.subr.mxu1 %v4540_v11  ;;  %v4307_v4 = vmax.f32 %v4305_v10, %v4306_v49 }
 0x1fd   :  { %v4322_v7 = vrot.slane %v4321_v3, 2  ;;  %v4315_v1 = vrot.slane %v4314_v13, 1  ;;  %v3098_v40 = vcombine.low %v2549_v22, %v2550_v12  ;;  %v1832_v61 = vadd.f32 %v7065_v15, %v8629_v8  ;;  %7118 = vmatpush3.msra.mxu1 %v4540_v11  ;;  %v4538_v8 = vld [vmem:[%s9724_s7 + $0x20] sm:$0xff] }
 0x1fe   :  { %v1826_v6 = vpop.f32.mrf.mxu0  ;;  %v2553_v31 = vmax.f32 %v2271_v5, 0.0  ;;  %v2551_v42 = vmax.f32 %v2261_v38, 0.0  ;;  %v2552_v60 = vmax.f32 %v2263_v57, 0.0  ;;  %v2554_v28 = vmax.f32 %v2279_v34, 0.0  ;;  %7119 = vmatprep.subr.mxu1 %v4539_v63 }
 0x1ff   :  { %v1827_v18 = vadd.f32 %v1826_v6, %v8620_v56  ;;  %v4323_v27 = vmax.f32 %v4321_v3, %v4322_v7  ;;  %v2555_v15 = vmax.f32 %v2278_v59, 0.0  ;;  %v2556_v39 = vmax.f32 %v2280_v30, 0.0  ;;  %7120 = vmatpush3.msra.mxu1 %v4539_v63 }
 0x200   :  { %v4316_v3 = vmax.f32 %v4314_v13, %v4315_v1  ;;  %v3105_v48 = vrot.slane %v3098_v40, %v7799_v36  ;;  %v2298_v29 = vcombine.high %v1832_v61, %v1832_v61  ;;  %v3063_v6 = vrot.slane %v3049_v45, %v7799_v36  ;;  %7121 = vmatprep.subr.mxu1 %v4538_v8 }
 0x201   :  { %v2288_v56 = vrot.slane %v1827_v18, %v7799_v36  ;;  %v2281_v2 = vcombine.high %v1827_v18, %v1827_v18  ;;  %v4324_v37 = vrot.slane %v4323_v27, 1  ;;  %v4512_v38 = vsel %vm4472_vm13, %v4298_v23, %v8905_v53  ;;  %7122 = vmatpush3.msra.mxu1 %v4538_v8 }
 0x202   :  { %v3112_v18 = vrot.slane %v2551_v42, %v7799_v36  ;;  %v3114_v24 = vcombine.low %v2552_v60, %v2553_v31  ;;  %v4513_v5 = vsel %vm4474_vm14, %v4307_v4, %v4512_v38  ;;  %v3080_v59 = vcombine.low %v3072_v43, %v3079_v16 }
 0x203   :  { %v2296_v26 = vcombine.high %v2288_v56, %v2288_v56  ;;  %v2557_v14 = vmax.f32 %v2288_v56, 0.0  ;;  %v2295_v21 = vrot.slane %v2281_v2, %v7799_v36  ;;  %v4325_v13 = vmax.f32 %v4323_v27, %v4324_v37 }
 0x204   :  { %v3115_v12 = vcombine.low %v2554_v28, %v2555_v15  ;;  %v2305_v7 = vrot.slane %v1832_v61, %v7799_v36  ;;  %v4514_v46 = vsel %vm4476_vm15, %v4316_v3, %v4513_v5  ;;  %v3113_v19 = vcombine.low %v3105_v48, %v3112_v18 }
 0x205   :  { %v2558_v10 = vmax.f32 %v2296_v26, 0.0  ;;  %v3131_v35 = vcombine.low %v2556_v39, %v2557_v14  ;;  %v2312_v56 = vrot.slane %v2298_v29, %v7799_v36  ;;  %v2297_v49 = vcombine.high %v2295_v21, %v2295_v21 }
 0x206   :  { %v4515_v53 = vsel %vm4478_vm0, %v4325_v13, %v4514_v46  ;;  %v3339_v45 = vrot.slane %v8917_v47, 4  ;;  %v3064_v57 = vcombine.low %v3056_v20, %v3063_v6  ;;  %v3097_v11 = vcombine.low %v3089_v58, %v3096_v52 }
 0x207   :  { %v3138_v22 = vrot.slane %v3131_v35, %v7799_v36  ;;  %v3145_v33 = vrot.slane %v2558_v10, %v7799_v36  ;;  %4523 = vrot.lane.b32.xlu0 %v4515_v53, %s7414_s23  ;;  %v3122_v23 = vrot.slane %v3114_v24, %v7799_v36  ;;  %v8973_v20 = vmax.f32 %v8864_v54, %v3330_v17  ;;  %v8992_v35 = vpop.f32.mrf.mxu1 }
 0x208   :  { %v3346_v1 = vsel %vm3246_vm9, %v3080_v59, -inf  ;;  %v2313_v34 = vcombine.high %v2305_v7, %v2305_v7  ;;  %v3129_v51 = vrot.slane %v3115_v12, %v7799_v36  ;;  %v3355_v44 = vsel %vm3246_vm9, %v3113_v19, -inf }
 0x209   :  { %v2314_v58 = vcombine.high %v2312_v56, %v2312_v56  ;;  %v2560_v52 = vmax.f32 %v2297_v49, 0.0  ;;  %v8979_v30 = vmax.f32 %v8917_v47, %v3339_v45  ;;  %v3345_v0 = vsel %vm438_vm5, %v3064_v57, -inf  ;;  %v4010_v57 = vpop.f32.mrf.mxu1 }
 0x20a   :  { %v3146_v50 = vcombine.low %v3138_v22, %v3145_v33  ;;  %v3354_v40 = vsel %vm438_vm5, %v3097_v11, -inf  ;;  %v3347_v61 = vmax.f32 %v3345_v0, %v3346_v1  ;;  %v3130_v54 = vcombine.low %v3122_v23, %v3129_v51 }
 0x20b   :  { %v2559_v17 = vmax.f32 %v2295_v21, 0.0  ;;  %v3323_v27 = vrot.slane %v8968_v55, 2  ;;  %v3356_v63 = vmax.f32 %v3354_v40, %v3355_v44  ;;  %v2562_v43 = vmax.f32 %v2313_v34, 0.0  ;;  %v7102_v44 = vpop.f32.mrf.mxu1 }
 0x20c   :  { %v3332_v26 = vrot.slane %v8973_v20, 2  ;;  %v2561_v14 = vmax.f32 %v2305_v7, 0.0  ;;  %v2564_v47 = vmax.f32 %v2314_v58, 0.0  ;;  %v3364_v42 = vsel %vm3246_vm9, %v3146_v50, -inf }
 0x20d   :  { %v3147_v4 = vcombine.low %v2559_v17, %v2560_v52  ;;  %v3341_v15 = vrot.slane %v8979_v30, 2  ;;  %v3348_v39 = vrot.slane %v3347_v61, 4  ;;  %v2563_v3 = vmax.f32 %v2312_v56, 0.0 }
 0x20e   :  { %v3363_v48 = vsel %vm438_vm5, %v3130_v54, -inf  ;;  %v3148_v29 = vcombine.low %v2561_v14, %v2562_v43  ;;  %v3324_v40 = vmax.f32 %v8968_v55, %v3323_v27 }
 0x20f   :  { %v3164_v6 = vcombine.low %v2563_v3, %v2564_v47  ;;  %v3365_v10 = vmax.f32 %v3363_v48, %v3364_v42  ;;  %v3349_v59 = vmax.f32 %v3347_v61, %v3348_v39  ;;  %v3333_v61 = vmax.f32 %v8973_v20, %v3332_v26 }
 0x210   :  { %v3162_v56 = vrot.slane %v3148_v29, %v7799_v36  ;;  %v3342_v43 = vmax.f32 %v8979_v30, %v3341_v15  ;;  %v3325_v27 = vrot.slane %v3324_v40, 1  ;;  %v4011_v15 = vadd.f32 %v4010_v57, %v8796_v41 }
 0x211   :  { %v3366_v45 = vrot.slane %v3365_v10, 4  ;;  %v3171_v34 = vrot.slane %v3164_v6, %v7799_v36  ;;  %v3350_v17 = vrot.slane %v3349_v59, 2  ;;  %v3334_v20 = vrot.slane %v3333_v61, 1 }
 0x212   :  { %v3343_v30 = vrot.slane %v3342_v43, 1 }
 0x213   :  { %v7068_v2 = vpop.f32.mrf.mxu0  ;;  %v3351_v26 = vmax.f32 %v3349_v59, %v3350_v17 }
 0x214   :  { %v1842_v16 = vadd.f32 %v7068_v2, %v8660_v62  ;;  %v3357_v62 = vrot.slane %v3356_v63, 4  ;;  %v3367_v2 = vmax.f32 %v3365_v10, %v3366_v45  ;;  %v3335_v10 = vmax.f32 %v3333_v61, %v3334_v20  ;;  %v4534_v61 = vld [vmem:[%s9724_s7] sm:$0xff] }
 0x215   :  { %v1836_v31 = vpop.f32.mrf.mxu0  ;;  %v3344_v59 = vmax.f32 %v3342_v43, %v3343_v30  ;;  %v4165_v43 = vmax.f32 %v4011_v15, 0.0 }
 0x216   :  { %v2332_v60 = vcombine.high %v1842_v16, %v1842_v16  ;;  %v2339_v8 = vrot.slane %v1842_v16, %v7799_v36  ;;  %v1837_v28 = vadd.f32 %v1836_v31, %v8643_v25  ;;  %v3155_v25 = vrot.slane %v3147_v4, %v7799_v36  ;;  %v4020_v4 = vpop.f32.mrf.mxu1 }
 0x217   :  { %v3358_v19 = vmax.f32 %v3356_v63, %v3357_v62 }
 0x218   :  { %v2346_v21 = vrot.slane %v2332_v60, %v7799_v36  ;;  %v2347_v37 = vcombine.high %v2339_v8, %v2339_v8  ;;  %v2315_v38 = vcombine.high %v1837_v28, %v1837_v28  ;;  %v2322_v18 = vrot.slane %v1837_v28, %v7799_v36 }
 0x219   :  { %v3163_v23 = vcombine.low %v3155_v25, %v3162_v56  ;;  %v2569_v1 = vmax.f32 %v2339_v8, 0.0  ;;  %v3359_v16 = vrot.slane %v3358_v19, 2  ;;  %v3368_v8 = vrot.slane %v3367_v2, 2 }
 0x21a   :  { %v2348_v24 = vcombine.high %v2346_v21, %v2346_v21  ;;  %v2570_v13 = vmax.f32 %v2347_v37, 0.0  ;;  %v2571_v5 = vmax.f32 %v2346_v21, 0.0  ;;  %v2329_v12 = vrot.slane %v2315_v38, %v7799_v36 }
 0x21b   :  { %v2330_v7 = vcombine.high %v2322_v18, %v2322_v18  ;;  %v2565_v46 = vmax.f32 %v2322_v18, 0.0  ;;  %v3372_v14 = vsel %vm438_vm5, %v3163_v23, -inf  ;;  %v7105_v3 = vpop.f32.mrf.mxu1  ;;  %v3360_v21 = vmax.f32 %v3358_v19, %v3359_v16  ;;  %v4535_v23 = vld [vmem:[%s9724_s7 + $0x8] sm:$0xff] }
 0x21c   :  { %v2572_v49 = vmax.f32 %v2348_v24, 0.0  ;;  %v3197_v53 = vcombine.low %v2570_v13, %v2571_v5  ;;  %v2331_v22 = vcombine.high %v2329_v12, %v2329_v12  ;;  %v2567_v11 = vmax.f32 %v2329_v12, 0.0 }
 0x21d   :  { %v2566_v33 = vmax.f32 %v2330_v7, 0.0  ;;  %v3178_v51 = vrot.slane %v2565_v46, %v7799_v36  ;;  %v3326_v37 = vmax.f32 %v3324_v40, %v3325_v27  ;;  %v4030_v38 = vpop.f32.mrf.mxu1  ;;  %v3352_v18 = vrot.slane %v3351_v26, 1 }
 0x21e   :  { %v3204_v58 = vrot.slane %v3197_v53, %v7799_v36  ;;  %v3211_v52 = vrot.slane %v2572_v49, %v7799_v36  ;;  %v2568_v0 = vmax.f32 %v2331_v22, 0.0  ;;  %v3369_v25 = vmax.f32 %v3367_v2, %v3368_v8  ;;  %v4537_v49 = vld [vmem:[%s9724_s7 + $0x18] sm:$0xff]  ;;  %v4536_v53 = vld [vmem:[%s9724_s7 + $0x10] sm:$0xff] }
 0x21f   :  { %v3180_v50 = vcombine.low %v2566_v33, %v2567_v11  ;;  %v3179_v54 = vcombine.low %v3171_v34, %v3178_v51  ;;  %v9014_v13 = vadd.f32 %v8992_v35, %v8798_v9  ;;  %v4105_v5 = vcombine.high %v4011_v15, %v4011_v15  ;;  %7123 = vmatprep.subr.mxu1 %v4537_v49 }
 0x220   :  { %v3181_v63 = vcombine.low %v2568_v0, %v2569_v1  ;;  %v3212_v31 = vcombine.low %v3204_v58, %v3211_v52  ;;  %v4026_v7 = vadd.f32 %v7102_v44, %v8796_v41  ;;  %v4021_v46 = vadd.f32 %v4020_v4, %v8801_v32  ;;  %7124 = vmatpush3.msra.mxu1 %v4537_v49 }
 0x221   :  { %v3373_v47 = vsel %vm3246_vm9, %v3179_v54, -inf  ;;  %v3188_v42 = vrot.slane %v3180_v50, %v7799_v36  ;;  %v3361_v56 = vrot.slane %v3360_v21, 1  ;;  %v9025_v35 = vadd.f32 %v4030_v38, %v8798_v9  ;;  %7125 = vmatprep.subr.mxu1 %v4536_v53 }
 0x222   :  { %v3195_v60 = vrot.slane %v3181_v63, %v7799_v36  ;;  %v3374_v55 = vmax.f32 %v3372_v14, %v3373_v47  ;;  %v3382_v48 = vsel %vm3246_vm9, %v3212_v31, -inf  ;;  %v3353_v22 = vmax.f32 %v3351_v26, %v3352_v18  ;;  %7126 = vmatpush3.msra.mxu1 %v4536_v53 }
 0x223   :  { %v7108_v57 = vpop.f32.mrf.mxu1  ;;  %v3370_v33 = vrot.slane %v3369_v25, 1  ;;  %v4480_v11 = vsel %vm4466_vm10, %v3335_v10, %v3326_v37  ;;  %v4106_v1 = vcombine.high %v9014_v13, %v9014_v13  ;;  %v4166_v58 = vmax.f32 %v4105_v5, 0.0  ;;  %7127 = vmatprep.subr.mxu1 %v4535_v23 }
 0x224   :  { %v3196_v28 = vcombine.low %v3188_v42, %v3195_v60  ;;  %v3375_v39 = vrot.slane %v3374_v55, 4  ;;  %v4481_v44 = vsel %vm4468_vm11, %v3344_v59, %v4480_v11  ;;  %v4108_v52 = vcombine.high %v4026_v7, %v4026_v7  ;;  %7128 = vmatpush3.msra.mxu1 %v4535_v23 }
 0x225   :  { %v4107_v0 = vcombine.high %v4021_v46, %v4021_v46  ;;  %v4040_v50 = vpop.f32.mrf.mxu1  ;;  %v3362_v40 = vmax.f32 %v3360_v21, %v3361_v56  ;;  %v4169_v54 = vmax.f32 %v4021_v46, 0.0  ;;  %v4109_v17 = vcombine.high %v9025_v35, %v9025_v35  ;;  %7129 = vmatprep.subr.mxu1 %v4534_v61 }
 0x226   :  { %v3376_v62 = vmax.f32 %v3374_v55, %v3375_v39  ;;  %v3381_v29 = vsel %vm438_vm5, %v3196_v28, -inf  ;;  %v4041_v2 = vadd.f32 %v4040_v50, %v8796_v41  ;;  %v4036_v16 = vadd.f32 %v7105_v3, %v8801_v32  ;;  %7130 = vmatpush3.msra.mxu1 %v4534_v61 }
 0x227   :  { %v3383_v6 = vmax.f32 %v3381_v29, %v3382_v48  ;;  %v3371_v14 = vmax.f32 %v3369_v25, %v3370_v33  ;;  %v4482_v47 = vsel %vm4470_vm12, %v3353_v22, %v4481_v44  ;;  %v4168_v4 = vmax.f32 %v4106_v1, 0.0 }
 0x228   :  { %v3377_v24 = vrot.slane %v3376_v62, 2  ;;  %v4171_v31 = vmax.f32 %v4026_v7, 0.0  ;;  %v4111_v42 = vcombine.high %v4041_v2, %v4041_v2  ;;  %v4229_v55 = vcombine.low %v4165_v43, %v4166_v58 }
 0x229   :  { %v3384_v12 = vrot.slane %v3383_v6, 4  ;;  %v4172_v27 = vmax.f32 %v4108_v52, 0.0  ;;  %v4483_v26 = vsel %vm4472_vm13, %v3362_v40, %v4482_v47  ;;  %v4170_v8 = vmax.f32 %v4107_v0, 0.0 }
 0x22a   :  { %v3378_v19 = vmax.f32 %v3376_v62, %v3377_v24  ;;  %v4230_v28 = vcombine.low %v4168_v4, %v4169_v54  ;;  %v4174_v39 = vmax.f32 %v4109_v17, 0.0  ;;  %v4178_v30 = vmax.f32 %v4111_v42, 0.0 }
 0x22b   :  { %v3385_v45 = vmax.f32 %v3383_v6, %v3384_v12  ;;  %v4110_v3 = vcombine.high %v4036_v16, %v4036_v16  ;;  %v4175_v15 = vmax.f32 %v4036_v16, 0.0  ;;  %v4484_v62 = vsel %vm4474_vm14, %v3371_v14, %v4483_v26 }
 0x22c   :  { %v3379_v34 = vrot.slane %v3378_v19, 1  ;;  %v4173_v29 = vmax.f32 %v9025_v35, 0.0  ;;  %v4046_v21 = vadd.f32 %v7108_v57, %v8798_v9  ;;  %v4177_v37 = vmax.f32 %v4041_v2, 0.0 }
 0x22d   :  { %v3386_v51 = vrot.slane %v3385_v45, 2  ;;  %v4167_v10 = vmax.f32 %v9014_v13, 0.0  ;;  %v4231_v18 = vcombine.low %v4171_v31, %v4172_v27  ;;  %v4232_v25 = vcombine.low %v4174_v39, %v4175_v15  ;;  %v7111_v5 = vpop.f32.mrf.mxu1 }
 0x22e   :  { %v3380_v60 = vmax.f32 %v3378_v19, %v3379_v34  ;;  %v4233_v24 = vcombine.low %v4177_v37, %v4178_v30  ;;  %v4326_v59 = vsel %vm438_vm5, %v4229_v55, -inf  ;;  %v4335_v12 = vsel %vm438_vm5, %v4230_v28, -inf }
 0x22f   :  { %v3387_v63 = vmax.f32 %v3385_v45, %v3386_v51  ;;  %v4176_v7 = vmax.f32 %v4110_v3, 0.0  ;;  %v4336_v46 = vsel %vm4254_vm1, %v4170_v8, -inf  ;;  %v4345_v56 = vsel %vm4254_vm1, %v4173_v29, -inf  ;;  %v4050_v13 = vpop.f32.mrf.mxu1 }
 0x230   :  { %v4485_v6 = vsel %vm4476_vm15, %v3380_v60, %v4484_v62  ;;  %v4112_v19 = vcombine.high %v4046_v21, %v4046_v21  ;;  %v4179_v49 = vmax.f32 %v4046_v21, 0.0  ;;  %v4327_v53 = vsel %vm4254_vm1, %v4167_v10, -inf }
 0x231   :  { %v3388_v20 = vrot.slane %v3387_v63, 1  ;;  %v4056_v35 = vadd.f32 %v7111_v5, %v8796_v41  ;;  %v4344_v45 = vsel %vm438_vm5, %v4231_v18, -inf  ;;  %v4353_v57 = vsel %vm438_vm5, %v4232_v25, -inf }
 0x232   :  { %v4362_v22 = vsel %vm438_vm5, %v4233_v24, -inf  ;;  %v4051_v33 = vadd.f32 %v4050_v13, %v8801_v32  ;;  %v4328_v11 = vmax.f32 %v4326_v59, %v4327_v53  ;;  %v4337_v23 = vmax.f32 %v4335_v12, %v4336_v46 }
 0x233   :  { %v3389_v48 = vmax.f32 %v3387_v63, %v3388_v20  ;;  %v4354_v1 = vsel %vm4254_vm1, %v4176_v7, -inf  ;;  %v4346_v34 = vmax.f32 %v4344_v45, %v4345_v56  ;;  %v4180_v51 = vmax.f32 %v4112_v19, 0.0 }
 0x234   :  { %v4363_v44 = vsel %vm4254_vm1, %v4179_v49, -inf  ;;  %v4113_v58 = vcombine.high %v4051_v33, %v4051_v33  ;;  %v4181_v52 = vmax.f32 %v4051_v33, 0.0  ;;  %v4355_v0 = vmax.f32 %v4353_v57, %v4354_v1 }
 0x235   :  { %v4486_v38 = vsel %vm4478_vm0, %v3389_v48, %v4485_v6  ;;  %v4364_v41 = vmax.f32 %v4362_v22, %v4363_v44  ;;  %v4114_v50 = vcombine.high %v4056_v35, %v4056_v35  ;;  %v4338_v54 = vrot.slane %v4337_v23, 4 }
 0x236   :  { %4489 = vrot.lane.b32.xlu1 %v4486_v38, %s7412_s16  ;;  %v4182_v40 = vmax.f32 %v4113_v58, 0.0  ;;  %v4234_v61 = vcombine.low %v4180_v51, %v4181_v52  ;;  %v4329_v17 = vrot.slane %v4328_v11, 4  ;;  %v4347_v2 = vrot.slane %v4346_v34, 4 }
 0x237   :  { %v4356_v16 = vrot.slane %v4355_v0, 4  ;;  %v4365_v14 = vrot.slane %v4364_v41, 4  ;;  %v4184_v47 = vmax.f32 %v4114_v50, 0.0  ;;  %v4339_v31 = vmax.f32 %v4337_v23, %v4338_v54 }
 0x238   :  { %v4371_v63 = vsel %vm438_vm5, %v4234_v61, -inf  ;;  %v4372_v43 = vsel %vm4254_vm1, %v4182_v40, -inf  ;;  %v4183_v42 = vmax.f32 %v4056_v35, 0.0  ;;  %v4330_v27 = vmax.f32 %v4328_v11, %v4329_v17 }
 0x239   :  { %v4373_v4 = vmax.f32 %v4371_v63, %v4372_v43  ;;  %v7114_v55 = vpop.f32.mrf.mxu1  ;;  %v4348_v20 = vmax.f32 %v4346_v34, %v4347_v2  ;;  %v4357_v8 = vmax.f32 %v4355_v0, %v4356_v16  ;;  %v4366_v28 = vmax.f32 %v4364_v41, %v4365_v14 }
 0x23a   :  { %v4066_v26 = vadd.f32 %v7114_v55, %v8801_v32  ;;  %v4235_v39 = vcombine.low %v4183_v42, %v4184_v47  ;;  %v4340_v48 = vrot.slane %v4339_v31, 2  ;;  %v4331_v29 = vrot.slane %v4330_v27, 2  ;;  %v9078_v47 = vld [vmem:[%s9725_s9 + $0x8] sm:$0xff] }
 0x23b   :  { %v4374_v60 = vrot.slane %v4373_v4, 4  ;;  %v4060_v30 = vpop.f32.mrf.mxu1  ;;  %v4349_v21 = vrot.slane %v4348_v20, 2  ;;  %v4358_v10 = vrot.slane %v4357_v8, 2  ;;  %v4367_v38 = vrot.slane %v4366_v28, 2 }
 0x23c   :  { %v4116_v3 = vcombine.high %v4066_v26, %v4066_v26  ;;  %v4061_v15 = vadd.f32 %v4060_v30, %v8798_v9  ;;  %v4380_v18 = vsel %vm438_vm5, %v4235_v39, -inf  ;;  %v4187_v25 = vmax.f32 %v4066_v26, 0.0  ;;  %v4398_v39 = vld [vmem:[%s9726_s1] sm:$0x3]  ;;  %v4399_v30 = vld [vmem:[%s9726_s1 + $0x2] sm:$0x3] }
 0x23d   :  { %v4375_v62 = vmax.f32 %v4373_v4, %v4374_v60  ;;  %v4341_v59 = vmax.f32 %v4339_v31, %v4340_v48  ;;  %v4332_v46 = vmax.f32 %v4330_v27, %v4331_v29  ;;  %v4350_v9 = vmax.f32 %v4348_v20, %v4349_v21  ;;  %v9083_v4 = vld [vmem:[%s9725_s9] sm:$0xff] }
 0x23e   :  { %v4115_v37 = vcombine.high %v4061_v15, %v4061_v15  ;;  %v4185_v6 = vmax.f32 %v4061_v15, 0.0  ;;  %v4188_v24 = vmax.f32 %v4116_v3, 0.0  ;;  %v4359_v19 = vmax.f32 %v4357_v8, %v4358_v10  ;;  %v4400_v3 = vld [vmem:[%s9726_s1 + $0x4] sm:$0x3]  ;;  %v4401_v15 = vld [vmem:[%s9726_s1 + $0x6] sm:$0x3] }
 0x23f   :  { %v4376_v12 = vrot.slane %v4375_v62, 2  ;;  %v4368_v13 = vmax.f32 %v4366_v28, %v4367_v38  ;;  %v4342_v45 = vrot.slane %v4341_v59, 1  ;;  %v4333_v11 = vrot.slane %v4332_v46, 1 }
 0x240   :  { %v4186_v32 = vmax.f32 %v4115_v37, 0.0  ;;  %v4381_v5 = vsel %vm4254_vm1, %v4185_v6, -inf  ;;  %v4390_v53 = vsel %vm4254_vm1, %v4188_v24, -inf  ;;  %v4351_v23 = vrot.slane %v4350_v9, 1  ;;  %v4488_v6 = vpop.permute.xlu0 %4487  ;;  %v4403_v24 = vld [vmem:[%s9726_s1 + $0xa] sm:$0x3] }
 0x241   :  { %v4382_v7 = vmax.f32 %v4380_v18, %v4381_v5  ;;  %v4377_v57 = vmax.f32 %v4375_v62, %v4376_v12  ;;  %v4360_v1 = vrot.slane %v4359_v19, 1  ;;  %v4369_v44 = vrot.slane %v4368_v13, 1  ;;  %v4405_v5 = vld [vmem:[%s9726_s1 + $0xe] sm:$0x3] }
 0x242   :  { %v4236_v56 = vcombine.low %v4186_v32, %v4187_v25  ;;  %v7415_v58 = vmov 0.0   ;;  %v4343_v52 = vmax.f32 %v4341_v59, %v4342_v45  ;;  %v4334_v40 = vmax.f32 %v4332_v46, %v4333_v11  ;;  %v4402_v25 = vld [vmem:[%s9726_s1 + $0x8] sm:$0x3]  ;;  %v4404_v32 = vld [vmem:[%s9726_s1 + $0xc] sm:$0x3] }
 0x243   :  { %v4383_v49 = vrot.slane %v4382_v7, 4  ;;  %7141 = vmatprep.subr.mxu1 %v7415_v58  ;;  %7134 = vmatprep.subr.mxu0 %v7415_v58  ;;  %v4378_v0 = vrot.slane %v4377_v57, 1  ;;  %v4352_v61 = vmax.f32 %v4350_v9, %v4351_v23  ;;  %v4361_v54 = vmax.f32 %v4359_v19, %v4360_v1 }
 0x244   :  { %v4389_v35 = vsel %vm438_vm5, %v4236_v56, -inf  ;;  %v4370_v63 = vmax.f32 %v4368_v13, %v4369_v44  ;;  %7138 = vmatprep.mubr.msk.f32.mxu0 %vm7416_vm2, %v7415_v58  ;;  %v4516_v43 = vsel %vm4466_vm10, %v4343_v52, %v4334_v40  ;;  %7135 = vmatpush3.msra.mxu0 %v9078_v47  ;;  %v4414_v48 = vcombine.low %v4398_v39, %v4399_v30  ;;  %v9138_v13 = vld [vmem:[%s9727_s10 + $0x8] sm:$0xff] }
 0x245   :  { %v4384_v22 = vmax.f32 %v4382_v7, %v4383_v49  ;;  %v4391_v33 = vmax.f32 %v4389_v35, %v4390_v53  ;;  %v4379_v16 = vmax.f32 %v4377_v57, %v4378_v0  ;;  %v4517_v42 = vsel %vm4468_vm11, %v4352_v61, %v4516_v43  ;;  %7136 = vmatprep.subr.mxu0 %v7415_v58  ;;  %v9145_v35 = vld [vmem:[%s9727_s10] sm:$0xff] }
 0x246   :  { %v4518_v55 = vsel %vm4470_vm12, %v4361_v54, %v4517_v42  ;;  %7137 = vmatpush3.msra.mxu0 %v9083_v4  ;;  %v4415_v62 = vcombine.low %v4400_v3, %v4401_v15  ;;  %v4422_v29 = vrot.slane %v4414_v48, %v7799_v36  ;;  %v4431_v59 = vcombine.low %v4402_v25, %v4403_v24  ;;  %v4683_v25 = vld [vmem:[%s9729_s2] sm:$0x3] }
 0x247   :  { %v4385_v34 = vrot.slane %v4384_v22, 2  ;;  %v4392_v51 = vrot.slane %v4391_v33, 4  ;;  %v4519_v27 = vsel %vm4472_vm13, %v4370_v63, %v4518_v55  ;;  %7139 = vmatmul.mubr.f32.vlgmr.msra.gmra.mxu0 %v7415_v58  ;;  %7148 = vmatprep.subr.mxu0 %v7415_v58  ;;  %v4432_v12 = vcombine.low %v4404_v32, %v4405_v5 }
 0x248   :  { %v4520_v26 = vsel %vm4474_vm14, %v4379_v16, %v4519_v27  ;;  %7149 = vmatpush3.msra.mxu0 %v9078_v47  ;;  %7152 = vmatprep.mubr.msk.f32.mxu0 %vm7416_vm2, %v7415_v58  ;;  %v4429_v21 = vrot.slane %v4415_v62, %v7799_v36  ;;  %v4439_v7 = vrot.slane %v4431_v59, %v7799_v36  ;;  %v7418_v63 = vmov 0  }
 0x249   :  { %v4386_v41 = vmax.f32 %v4384_v22, %v4385_v34  ;;  %v4393_v50 = vmax.f32 %v4391_v33, %v4392_v51  ;;  %7150 = vmatprep.subr.mxu0 %v7415_v58  ;;  %v4446_v46 = vrot.slane %v4432_v12, %v7799_v36  ;;  %v6853_v22 = vld [vmem:[%s9728_s8] ss:$0 sm:$0xff]  ;;  %7272 = vset.pattern.permute.xlu1 %v7418_v63  ;;  %vm4796_vm8 = vcmp.gt.f32.partialorder %v4683_v25, 0.0 }
 0x24a   :  { %7151 = vmatpush3.msra.mxu0 %v9083_v4  ;;  %v4430_v37 = vcombine.low %v4422_v29, %v4429_v21  ;;  %7273 = vset.pattern.permute.xlu0 %v7418_v63  ;;  %v4797_v12 = vsel %vm4796_vm8, 1, %v7418_v63  ;;  %vm4915_vm9 = vcmask 123904  }
 0x24b   :  { %v4387_v17 = vrot.slane %v4386_v41, 1  ;;  %v4394_v2 = vrot.slane %v4393_v50, 2  ;;  %7162 = vmatprep.subr.mxu0 %v7415_v58  ;;  %v4447_v9 = vcombine.low %v4439_v7, %v4446_v46 }
 0x24c   :  { %v4529_v10 = vsel %vm3718_vm7, %v4430_v37, %v4488_v6 }
 0x24d   :  { %v4395_v14 = vmax.f32 %v4393_v50, %v4394_v2  ;;  %v4388_v31 = vmax.f32 %v4386_v41, %v4387_v17 }
 0x24f   :  { %v4396_v60 = vrot.slane %v4395_v14, 1  ;;  %v4521_v8 = vsel %vm4476_vm15, %v4388_v31, %v4520_v26  ;;  %v4690_v31 = vld [vmem:[%s9729_s2 + $0xe] sm:$0x3] }
 0x250   :  { %vm4903_vm6 = vcmp.gt.f32.partialorder %v4690_v31, 0.0 }
 0x251   :  { %v4397_v20 = vmax.f32 %v4395_v14, %v4396_v60  ;;  %v4904_v60 = vsel %vm4903_vm6, 1, %v7418_v63 }
 0x253   :  { %v4522_v28 = vsel %vm4478_vm0, %v4397_v20, %v4521_v8 }
 0x254   :  { %4525 = vrot.lane.b32.xlu1 %v4522_v28, %s7414_s23 }
 0x279   :  { %v4524_v38 = vpop.permute.xlu0 %4523 }
 0x27a   :  { %v4532_v18 = vsel %vm4531_vm3, %v4529_v10, %v4524_v38 }
 0x27b   :  { %7131 = vmatprep.mubr.msk.f32.mxu1 %vm4549_vm4, %v4532_v18 }
 0x2a8   :  { %v4490_v56 = vpop.permute.xlu1 %4489 }
 0x2a9   :  { %v4530_v19 = vsel %vm3718_vm7, %v4447_v9, %v4490_v56 }
 0x2c6   :  { %v4526_v49 = vpop.permute.xlu1 %4525 }
 0x2c7   :  { %v4533_v53 = vsel %vm4531_vm3, %v4530_v19, %v4526_v49 }
 0x2c8   :  { %7132 = vmatmul.mubr.msk.f32.vlgmr.msra.gmra.mxu1 %vm4549_vm4, %v4533_v53 }
 0x2c9   :  { %7142 = vmatpush3.msra.mxu1 %v9138_v13  ;;  %7145 = vmatprep.mubr.msk.f32.mxu1 %vm7416_vm2, %v7415_v58 }
 0x2ca   :  { %7143 = vmatprep.subr.mxu1 %v7415_v58 }
 0x2cb   :  { %7144 = vmatpush3.msra.mxu1 %v9145_v35 }
 0x2cc   :  { %7146 = vmatmul.mubr.f32.vlgmr.msra.gmra.mxu1 %v7415_v58  ;;  %7155 = vmatprep.subr.mxu1 %v7415_v58 }
 0x2cd   :  { %7156 = vmatpush3.msra.mxu1 %v9138_v13  ;;  %7159 = vmatprep.mubr.msk.f32.mxu1 %vm7416_vm2, %v7415_v58 }
 0x2ce   :  { %7157 = vmatprep.subr.mxu1 %v7415_v58 }
 0x2cf   :  { %7158 = vmatpush3.msra.mxu1 %v9145_v35 }
 0x2d0   :  { %7169 = vmatprep.subr.mxu1 %v7415_v58 }
 0x307   :  { %v4767_v45 = vpop.f32.mrf.mxu0 }
 0x309   :  { %v7140_v57 = vpop.f32.mrf.mxu0 }
 0x388   :  { %v7133_v33 = vpop.f32.mrf.mxu1 }
 0x389   :  { %v4628_v11 = vadd.f32 %v7133_v33, %v6853_v22 }
 0x38a   :  { %v4622_v23 = vpop.f32.mrf.mxu1 }
 0x38b   :  { %v4650_v1 = vcombine.high %v4628_v11, %v4628_v11  ;;  %v4657_v34 = vrot.slane %v4628_v11, %v7799_v36  ;;  %6858 = vst.sshfl [vmem:[#allocation2 + $0x8] sm:$0x3 pattern:$0x76325410] %v4628_v11  ;;  %v4623_v51 = vadd.f32 %v6853_v22, %v4622_v23 }
 0x38c   :  { %v4870_v44 = vpop.f32.mrf.mxu1 }
 0x38d   :  { %v4664_v52 = vrot.slane %v4650_v1, %v7799_v36  ;;  %v4665_v0 = vcombine.high %v4657_v34, %v4657_v34  ;;  %6859 = vst.sshfl [vmem:[#allocation2 + $0xc] sm:$0x3 pattern:$0x76325410] %v4650_v1  ;;  %v4633_v41 = vcombine.high %v4623_v51, %v4623_v51  ;;  %v4640_v50 = vrot.slane %v4623_v51, %v7799_v36  ;;  %v4689_v34 = vld [vmem:[%s9729_s2 + $0xc] sm:$0x3] }
 0x38e   :  { %6856 = vst.sshfl [vmem:[#allocation2] sm:$0x3 pattern:$0x76325410] %v4623_v51  ;;  %4875 = vrot.lane.b32.xlu0 %v4870_v44, %s7417_s19  ;;  %v7147_v40 = vpop.f32.mrf.mxu1  ;;  %vm5134_vm10 = vcmp.gt.f32.partialorder %v4689_v34, 0.0 }
 0x38f   :  { %v4666_v61 = vcombine.high %v4664_v52, %v4664_v52  ;;  %4680 = vst [vmem:[#allocation2 + $0xa] sm:$0x3] %v4665_v0  ;;  %v4647_v54 = vrot.slane %v4633_v41, %v7799_v36  ;;  %v4648_v17 = vcombine.high %v4640_v50, %v4640_v50  ;;  %6857 = vst.sshfl [vmem:[#allocation2 + $0x4] sm:$0x3 pattern:$0x76325410] %v4633_v41 }
 0x390   :  { %v5135_v50 = vsel %vm5134_vm10, 1, %v7418_v63 }
 0x391   :  { %4682 = vst [vmem:[#allocation2 + $0xe] sm:$0x3] %v4666_v61  ;;  %v4649_v2 = vcombine.high %v4647_v54, %v4647_v54  ;;  %4676 = vst [vmem:[#allocation2 + $0x2] sm:$0x3] %v4648_v17 }
 0x393   :  { %4678 = vst [vmem:[#allocation2 + $0x6] sm:$0x3] %v4649_v2 }
 0x394   :  { %v4926_v19 = vld [vmem:[#allocation2 + $0xc] sm:$0x3] }
 0x395   :  { %v4695_v30 = vld [vmem:[#allocation2] sm:$0x3] }
 0x396   :  { %v4771_v48 = vadd.f32 %v4767_v45, %v4695_v30 }
 0x398   :  { %v4697_v43 = vld [vmem:[#allocation2 + $0xe] sm:$0x3]  ;;  %v6860_v21 = vmul.f32 -1.442695, %v4771_v48 }
 0x400   :  { %v4876_v16 = vpop.permute.xlu0 %4875 }
 0x401   :  { %v4878_v14 = vadd.f32 %v4876_v16, %v4697_v43 }
 0x403   :  { %7274 = vtanh.f32 %v4878_v14  ;;  %v6861_v55 = vmul.f32 -1.442695, %v4878_v14 }
 0x405   :  { %7276 = vpow2.f32 %v6861_v55 }
 0x410   :  { %v7275_v42 = vpop.eup %7274 }
 0x411   :  { %4888 = vrot.lane.b32.xlu1 %v7275_v42, %s7419_s3 }
 0x412   :  { %v7277_v27 = vpop.eup %7276 }
 0x413   :  { %v4882_v20 = vadd.f32 1.0, %v7277_v27  ;;  %v4924_v27 = vld [vmem:[#allocation2 + $0x2] sm:$0x3] }
 0x415   :  { %4906 = vperm.xlu1 %7272, %v4904_v60   ;;  %7278 = vrcp.f32 %v4882_v20 }
 0x422   :  { %v7279_v26 = vpop.eup %7278 }
 0x423   :  { %v4886_v39 = vmul.f32 0.0, %v7279_v26 }
 0x483   :  { %v4889_v8 = vpop.permute.xlu1 %4888 }
 0x484   :  { %v4891_v28 = vmul.f32 %v7279_v26, %v4889_v8 }
 0x486   :  { %4893 = vrot.lane.b32.xlu0 %v4891_v28, %s7410_s26 }
 0x490   :  { %v9181_v10 = vpop.permute.xlu1 %4906 }
 0x491   :  { %vm4908_vm7 = vcmp.eq.s32.totalorder %v9181_v10, 1 }
 0x4f8   :  { %v4894_v3 = vpop.permute.xlu0 %4893 }
 0x4f9   :  { %v9176_v15 = vadd.f32 %v4894_v3, %v4886_v39 }
 0x4fb   :  { %7280 = vtanh.f32 %v9176_v15  ;;  %v9226_v54 = vsel %vm4908_vm7, %v9176_v15, 0.0 }
 0x4fc   :  { %7282 = vtanh.f32 %v4771_v48  ;;  %v4684_v48 = vld [vmem:[%s9729_s2 + $0x2] sm:$0x3] }
 0x4fd   :  { %7284 = vpow2.f32 %v6860_v21  ;;  %vm5024_vm13 = vcmp.gt.f32.partialorder %v4684_v48, 0.0 }
 0x508   :  { %v7281_v62 = vpop.eup %7280 }
 0x509   :  { %4899 = vrot.lane.b32.xlu0 %v7281_v62, %s7412_s16  ;;  %v7283_v29 = vpop.eup %7282 }
 0x50a   :  { %v7285_v37 = vpop.eup %7284 }
 0x50b   :  { %v4775_v6 = vadd.f32 1.0, %v7285_v37  ;;  %v5025_v37 = vsel %vm5024_vm13, 1, %v7418_v63 }
 0x50d   :  { %4781 = vrot.lane.b32.xlu0 %v7283_v29, %s7419_s3  ;;  %7286 = vrcp.f32 %v4775_v6 }
 0x51a   :  { %v7287_v32 = vpop.eup %7286 }
 0x51b   :  { %v4779_v53 = vmul.f32 0.0, %v7287_v32 }
 0x57b   :  { %v4900_v38 = vpop.permute.xlu0 %4899 }
 0x57c   :  { %v4902_v18 = vmul.f32 %v7279_v26, %v4900_v38 }
 0x57e   :  { %v9189_v24 = vsel %vm4908_vm7, %v4902_v18, 0.0 }
 0x57f   :  { %4918 = vrot.lane.b32.xlu1 %v9189_v24, %s7410_s26  ;;  %v4782_v5 = vpop.permute.xlu0 %4781 }
 0x580   :  { %v4784_v59 = vmul.f32 %v7287_v32, %v4782_v5 }
 0x582   :  { %4786 = vrot.lane.b32.xlu0 %v4784_v59, %s7410_s26  ;;  %v5158_v59 = vld [vmem:[#allocation2 + $0xa] sm:$0x3] }
 0x586   :  { %4799 = vperm.xlu0 %7273, %v4797_v12  }
 0x5f1   :  { %v4919_v7 = vpop.permute.xlu1 %4918 }
 0x5f2   :  { %4922 = vst.msk [vmem:[#allocation4 + $0xe] sm:$0x3] %vm4915_vm9, %v4919_v7  ;;  %7160 = vmatmul.mubr.msk.f32.vlgmr.msra.gmra.mxu1 %vm438_vm5, %v4919_v7 }
 0x5f3   :  { %7170 = vmatpush3.msra.mxu1 %v9138_v13  ;;  %7173 = vmatprep.mubr.msk.f32.mxu1 %vm7416_vm2, %v7415_v58 }
 0x5f4   :  { %7171 = vmatprep.subr.mxu1 %v7415_v58  ;;  %v4787_v56 = vpop.permute.xlu0 %4786 }
 0x5f5   :  { %7172 = vmatpush3.msra.mxu1 %v9145_v35  ;;  %v9204_v57 = vadd.f32 %v4787_v56, %v4779_v53  ;;  %v4688_v56 = vld [vmem:[%s9729_s2 + $0xa] sm:$0x3] }
 0x5f6   :  { %7183 = vmatprep.subr.mxu1 %v7415_v58  ;;  %vm5372_vm15 = vcmp.gt.f32.partialorder %v4688_v56, 0.0 }
 0x601   :  { %v9212_v0 = vpop.permute.xlu0 %4799 }
 0x602   :  { %vm4801_vm11 = vcmp.eq.s32.totalorder %v9212_v0, 1 }
 0x603   :  { %v9271_v38 = vsel %vm4801_vm11, %v9204_v57, 0.0 }
 0x6b2   :  { %v5101_v46 = vpop.f32.mrf.mxu1 }
 0x6b3   :  { %5106 = vrot.lane.b32.xlu1 %v5101_v46, %s7417_s19 }
 0x6b4   :  { %v7161_v9 = vpop.f32.mrf.mxu1 }
 0x725   :  { %v5107_v49 = vpop.permute.xlu1 %5106 }
 0x726   :  { %v5109_v45 = vadd.f32 %v5107_v49, %v4926_v19 }
 0x728   :  { %7288 = vtanh.f32 %v5109_v45  ;;  %v6865_v11 = vmul.f32 -1.442695, %v5109_v45  ;;  %v5373_v45 = vsel %vm5372_vm15, 1, %v7418_v63 }
 0x729   :  { %7290 = vtanh.f32 %v9204_v57 }
 0x72a   :  { %7292 = vpow2.f32 %v6865_v11 }
 0x735   :  { %v7289_v22 = vpop.eup %7288 }
 0x736   :  { %5119 = vrot.lane.b32.xlu1 %v7289_v22, %s7419_s3  ;;  %v7291_v33 = vpop.eup %7290 }
 0x737   :  { %v7293_v23 = vpop.eup %7292 }
 0x738   :  { %v5113_v1 = vadd.f32 1.0, %v7293_v23 }
 0x73a   :  { %4792 = vrot.lane.b32.xlu1 %v7291_v33, %s7412_s16  ;;  %7294 = vrcp.f32 %v5113_v1 }
 0x747   :  { %v7295_v51 = vpop.eup %7294 }
 0x748   :  { %v5117_v17 = vmul.f32 %v7295_v51, %v9226_v54 }
 0x7a8   :  { %v5120_v44 = vpop.permute.xlu1 %5119 }
 0x7a9   :  { %v5122_v52 = vmul.f32 %v7295_v51, %v5120_v44 }
 0x7ab   :  { %5124 = vrot.lane.b32.xlu1 %v5122_v52, %s7410_s26 }
 0x7ac   :  { %v4793_v41 = vpop.permute.xlu1 %4792 }
 0x7ad   :  { %v4795_v40 = vmul.f32 %v7287_v32, %v4793_v41 }
 0x7af   :  { %v9219_v61 = vsel %vm4801_vm11, %v4795_v40, 0.0  ;;  %5137 = vperm.xlu1 %7272, %v5135_v50   ;;  %v5156_v40 = vld [vmem:[#allocation2 + $0x4] sm:$0x3] }
 0x7b0   :  { %4912 = vrot.lane.b32.xlu0 %v9219_v61, %s7420_s24 }
 0x81d   :  { %v5125_v2 = vpop.permute.xlu1 %5124 }
 0x81e   :  { %v9229_v43 = vadd.f32 %v5125_v2, %v5117_v17 }
 0x820   :  { %7296 = vtanh.f32 %v9229_v43 }
 0x822   :  { %v4913_v16 = vpop.permute.xlu0 %4912 }
 0x823   :  { %4916 = vst.msk [vmem:[#allocation3] sm:$0x3] %vm4915_vm9, %v4913_v16  ;;  %7153 = vmatmul.mubr.msk.f32.vlgmr.msra.gmra.mxu0 %vm438_vm5, %v4913_v16 }
 0x824   :  { %7163 = vmatpush3.msra.mxu0 %v9078_v47  ;;  %7166 = vmatprep.mubr.msk.f32.mxu0 %vm7416_vm2, %v7415_v58 }
 0x825   :  { %7164 = vmatprep.subr.mxu0 %v7415_v58 }
 0x826   :  { %7165 = vmatpush3.msra.mxu0 %v9083_v4 }
 0x827   :  { %7176 = vmatprep.subr.mxu0 %v7415_v58 }
 0x82a   :  { %v9241_v31 = vpop.permute.xlu1 %5137 }
 0x82b   :  { %vm5139_vm12 = vcmp.eq.s32.totalorder %v9241_v31, 1 }
 0x82d   :  { %v7297_v14 = vpop.eup %7296 }
 0x82e   :  { %5130 = vrot.lane.b32.xlu0 %v7297_v14, %s7412_s16 }
 0x8a0   :  { %v5131_v42 = vpop.permute.xlu0 %5130 }
 0x8a1   :  { %v9243_v60 = vmul.f32 %v7295_v51, %v5131_v42  ;;  %v9308_v51 = vsel %vm5139_vm12, %v9229_v43, %v9226_v54  ;;  %v4685_v54 = vld [vmem:[%s9729_s2 + $0x4] sm:$0x3] }
 0x8a2   :  { %vm5259_vm0 = vcmp.gt.f32.partialorder %v4685_v54, 0.0 }
 0x8a3   :  { %v9250_v55 = vsel %vm5139_vm12, %v9243_v60, %v9189_v24  ;;  %v5260_v16 = vsel %vm5259_vm0, 1, %v7418_v63 }
 0x8a4   :  { %5269 = vrot.lane.b32.xlu1 %v9250_v55, %s7410_s26 }
 0x8e3   :  { %v4995_v20 = vpop.f32.mrf.mxu0 }
 0x8e4   :  { %v4999_v26 = vadd.f32 %v4995_v20, %v4924_v27 }
 0x8e5   :  { %v7154_v8 = vpop.f32.mrf.mxu0 }
 0x8e6   :  { %7298 = vtanh.f32 %v4999_v26  ;;  %v6863_v30 = vmul.f32 -1.442695, %v4999_v26 }
 0x8e8   :  { %7300 = vpow2.f32 %v6863_v30 }
 0x8f3   :  { %v7299_v28 = vpop.eup %7298 }
 0x8f4   :  { %5009 = vrot.lane.b32.xlu0 %v7299_v28, %s7419_s3 }
 0x8f5   :  { %v7301_v3 = vpop.eup %7300 }
 0x8f6   :  { %v5003_v15 = vadd.f32 1.0, %v7301_v3 }
 0x8f8   :  { %7302 = vrcp.f32 %v5003_v15 }
 0x905   :  { %v7303_v62 = vpop.eup %7302 }
 0x906   :  { %v5007_v25 = vmul.f32 %v7303_v62, %v9271_v38 }
 0x916   :  { %v5270_v39 = vpop.permute.xlu1 %5269 }
 0x917   :  { %7174 = vmatmul.mubr.msk.f32.vlgmr.msra.gmra.mxu1 %vm438_vm5, %v5270_v39 }
 0x918   :  { %7184 = vmatpush3.msra.mxu1 %v9138_v13  ;;  %7187 = vmatprep.mubr.msk.f32.mxu1 %vm7416_vm2, %v7415_v58 }
 0x919   :  { %7185 = vmatprep.subr.mxu1 %v7415_v58 }
 0x91a   :  { %7186 = vmatpush3.msra.mxu1 %v9145_v35 }
 0x91b   :  { %7197 = vmatprep.subr.mxu1 %v7415_v58 }
 0x966   :  { %v5010_v29 = vpop.permute.xlu0 %5009 }
 0x967   :  { %v5012_v21 = vmul.f32 %v7303_v62, %v5010_v29 }
 0x969   :  { %5014 = vrot.lane.b32.xlu1 %v5012_v21, %s7410_s26 }
 0x96d   :  { %5027 = vperm.xlu1 %7272, %v5025_v37  }
 0x9d7   :  { %v5339_v6 = vpop.f32.mrf.mxu1 }
 0x9d8   :  { %5344 = vrot.lane.b32.xlu0 %v5339_v6, %s7417_s19 }
 0x9d9   :  { %v7175_v18 = vpop.f32.mrf.mxu1 }
 0x9db   :  { %v5015_v24 = vpop.permute.xlu1 %5014 }
 0x9dc   :  { %v9274_v32 = vadd.f32 %v5015_v24, %v5007_v25 }
 0x9de   :  { %7304 = vtanh.f32 %v9274_v32 }
 0x9e8   :  { %v9279_v9 = vpop.permute.xlu1 %5027 }
 0x9e9   :  { %vm5029_vm14 = vcmp.eq.s32.totalorder %v9279_v9, 1 }
 0x9eb   :  { %v7305_v5 = vpop.eup %7304 }
 0x9ec   :  { %5020 = vrot.lane.b32.xlu0 %v7305_v5, %s7412_s16 }
 0xa4a   :  { %v5345_v12 = vpop.permute.xlu0 %5344 }
 0xa4b   :  { %v5347_v7 = vadd.f32 %v5345_v12, %v5158_v59  ;;  %v4687_v12 = vld [vmem:[%s9729_s2 + $0x8] sm:$0x3] }
 0xa4c   :  { %vm5610_vm4 = vcmp.gt.f32.partialorder %v4687_v12, 0.0 }
 0xa4d   :  { %7306 = vtanh.f32 %v5347_v7  ;;  %v6869_v57 = vmul.f32 -1.442695, %v5347_v7 }
 0xa4f   :  { %7308 = vpow2.f32 %v6869_v57 }
 0xa5a   :  { %v7307_v46 = vpop.eup %7306 }
 0xa5b   :  { %5357 = vrot.lane.b32.xlu1 %v7307_v46, %s7419_s3  ;;  %v5611_v46 = vsel %vm5610_vm4, 1, %v7418_v63 }
 0xa5c   :  { %v7309_v22 = vpop.eup %7308 }
 0xa5d   :  { %v5351_v33 = vadd.f32 1.0, %v7309_v22 }
 0xa5e   :  { %v5021_v19 = vpop.permute.xlu0 %5020 }
 0xa5f   :  { %v9284_v49 = vmul.f32 %v7303_v62, %v5021_v19  ;;  %7310 = vrcp.f32 %v5351_v33 }
 0xa61   :  { %v9291_v53 = vsel %vm5029_vm14, %v9284_v49, %v9219_v61 }
 0xa62   :  { %5160 = vrot.lane.b32.xlu0 %v9291_v53, %s7420_s24 }
 0xa66   :  { %5375 = vperm.xlu0 %7273, %v5373_v45  }
 0xa6c   :  { %v7311_v11 = vpop.eup %7310 }
 0xa6d   :  { %v5355_v44 = vmul.f32 %v7311_v11, %v9308_v51 }
 0xacd   :  { %v5358_v23 = vpop.permute.xlu1 %5357 }
 0xace   :  { %v5360_v1 = vmul.f32 %v7311_v11, %v5358_v23 }
 0xad0   :  { %5362 = vrot.lane.b32.xlu1 %v5360_v1, %s7410_s26 }
 0xad4   :  { %v5161_v34 = vpop.permute.xlu0 %5160 }
 0xad5   :  { %7167 = vmatmul.mubr.msk.f32.vlgmr.msra.gmra.mxu0 %vm438_vm5, %v5161_v34 }
 0xad6   :  { %7177 = vmatpush3.msra.mxu0 %v9078_v47  ;;  %7180 = vmatprep.mubr.msk.f32.mxu0 %vm7416_vm2, %v7415_v58 }
 0xad7   :  { %7178 = vmatprep.subr.mxu0 %v7415_v58 }
 0xad8   :  { %7179 = vmatpush3.msra.mxu0 %v9083_v4 }
 0xad9   :  { %7190 = vmatprep.subr.mxu0 %v7415_v58 }
 0xae1   :  { %v9320_v14 = vpop.permute.xlu0 %5375 }
 0xae2   :  { %vm5377_vm1 = vcmp.eq.s32.totalorder %v9320_v14, 1  ;;  %v6540_v14 = vld [vmem:[%s9730_s12] sm:$0xff] }
 0xb42   :  { %v5363_v52 = vpop.permute.xlu1 %5362 }
 0xb43   :  { %v9311_v41 = vadd.f32 %v5363_v52, %v5355_v44 }
 0xb45   :  { %7312 = vtanh.f32 %v9311_v41  ;;  %v9383_v1 = vsel %vm5377_vm1, %v9311_v41, %v9308_v51 }
 0xb52   :  { %v7313_v50 = vpop.eup %7312 }
 0xb53   :  { %5368 = vrot.lane.b32.xlu1 %v7313_v50, %s7412_s16  ;;  %v5394_v50 = vld [vmem:[#allocation2 + $0x6] sm:$0x3] }
 0xb95   :  { %v5230_v61 = vpop.f32.mrf.mxu0 }
 0xb96   :  { %v5234_v17 = vadd.f32 %v5230_v61, %v5156_v40 }
 0xb97   :  { %v7168_v2 = vpop.f32.mrf.mxu0 }
 0xb98   :  { %7314 = vtanh.f32 %v5234_v17  ;;  %v6867_v26 = vmul.f32 -1.442695, %v5234_v17  ;;  %v4686_v17 = vld [vmem:[%s9729_s2 + $0x6] sm:$0x3] }
 0xb99   :  { %vm5497_vm6 = vcmp.gt.f32.partialorder %v4686_v17, 0.0 }
 0xb9a   :  { %7316 = vpow2.f32 %v6867_v26  ;;  %v5498_v41 = vsel %vm5497_vm6, 1, %v7418_v63 }
 0xba5   :  { %v7315_v43 = vpop.eup %7314 }
 0xba6   :  { %5244 = vrot.lane.b32.xlu1 %v7315_v43, %s7419_s3 }
 0xba7   :  { %v7317_v8 = vpop.eup %7316 }
 0xba8   :  { %v5238_v28 = vadd.f32 1.0, %v7317_v8 }
 0xbaa   :  { %5262 = vperm.xlu1 %7272, %v5260_v16   ;;  %7318 = vrcp.f32 %v5238_v28 }
 0xbb7   :  { %v7319_v39 = vpop.eup %7318 }
 0xbc5   :  { %v5369_v42 = vpop.permute.xlu1 %5368 }
 0xbc6   :  { %v9322_v27 = vmul.f32 %v7311_v11, %v5369_v42 }
 0xbc8   :  { %v9329_v20 = vsel %vm5377_vm1, %v9322_v27, %v9250_v55  ;;  %v9345_v55 = vsel %vm5029_vm14, %v9274_v32, %v9271_v38  ;;  %v5396_v32 = vld [vmem:[#allocation2 + $0x8] sm:$0x3] }
 0xbc9   :  { %5507 = vrot.lane.b32.xlu0 %v9329_v20, %s7410_s26  ;;  %v5242_v48 = vmul.f32 %v7319_v39, %v9345_v55 }
 0xc18   :  { %v5245_v30 = vpop.permute.xlu1 %5244 }
 0xc19   :  { %v5247_v3 = vmul.f32 %v7319_v39, %v5245_v30 }
 0xc1b   :  { %5249 = vrot.lane.b32.xlu0 %v5247_v3, %s7410_s26 }
 0xc25   :  { %v9353_v18 = vpop.permute.xlu1 %5262 }
 0xc26   :  { %vm5264_vm3 = vcmp.eq.s32.totalorder %v9353_v18, 1  ;;  %v6541_v18 = vld [vmem:[%s9730_s12 + $0x8] sm:$0xff] }
 0xc3b   :  { %v5508_v15 = vpop.permute.xlu0 %5507 }
 0xc3c   :  { %7188 = vmatmul.mubr.msk.f32.vlgmr.msra.gmra.mxu1 %vm438_vm5, %v5508_v15 }
 0xc3d   :  { %7198 = vmatpush3.msra.mxu1 %v9138_v13  ;;  %7201 = vmatprep.mubr.msk.f32.mxu1 %vm7416_vm2, %v7415_v58 }
 0xc3e   :  { %7199 = vmatprep.subr.mxu1 %v7415_v58 }
 0xc3f   :  { %7200 = vmatpush3.msra.mxu1 %v9145_v35 }
 0xc40   :  { %7211 = vmatprep.subr.mxu1 %v7415_v58 }
 0xc8d   :  { %v5250_v62 = vpop.permute.xlu0 %5249 }
 0xc8e   :  { %v9348_v29 = vadd.f32 %v5250_v62, %v5242_v48 }
 0xc90   :  { %7320 = vtanh.f32 %v9348_v29  ;;  %v9414_v3 = vsel %vm5264_vm3, %v9348_v29, %v9345_v55 }
 0xc9d   :  { %v7321_v21 = vpop.eup %7320 }
 0xc9e   :  { %5255 = vrot.lane.b32.xlu0 %v7321_v21, %s7412_s16 }
 0xcfc   :  { %v5577_v37 = vpop.f32.mrf.mxu1 }
 0xcfd   :  { %5582 = vrot.lane.b32.xlu1 %v5577_v37, %s7417_s19 }
 0xcfe   :  { %v7189_v6 = vpop.f32.mrf.mxu1 }
 0xd10   :  { %v5256_v25 = vpop.permute.xlu0 %5255 }
 0xd11   :  { %v9355_v24 = vmul.f32 %v7319_v39, %v5256_v25 }
 0xd13   :  { %v9362_v38 = vsel %vm5264_vm3, %v9355_v24, %v9291_v53 }
 0xd14   :  { %5398 = vrot.lane.b32.xlu0 %v9362_v38, %s7420_s24 }
 0xd6f   :  { %v5583_v5 = vpop.permute.xlu1 %5582 }
 0xd70   :  { %v5585_v59 = vadd.f32 %v5583_v5, %v5396_v32 }
 0xd72   :  { %7322 = vtanh.f32 %v5585_v59  ;;  %v6873_v19 = vmul.f32 -1.442695, %v5585_v59 }
 0xd74   :  { %7324 = vpow2.f32 %v6873_v19 }
 0xd7f   :  { %v7323_v7 = vpop.eup %7322 }
 0xd80   :  { %5595 = vrot.lane.b32.xlu1 %v7323_v7, %s7419_s3 }
 0xd81   :  { %v7325_v53 = vpop.eup %7324 }
 0xd82   :  { %v5589_v45 = vadd.f32 1.0, %v7325_v53 }
 0xd84   :  { %5613 = vperm.xlu1 %7272, %v5611_v46   ;;  %7326 = vrcp.f32 %v5589_v45 }
 0xd86   :  { %v5399_v56 = vpop.permute.xlu0 %5398 }
 0xd87   :  { %7181 = vmatmul.mubr.msk.f32.vlgmr.msra.gmra.mxu0 %vm438_vm5, %v5399_v56 }
 0xd88   :  { %7191 = vmatpush3.msra.mxu0 %v9078_v47  ;;  %7194 = vmatprep.mubr.msk.f32.mxu0 %vm7416_vm2, %v7415_v58 }
 0xd89   :  { %7192 = vmatprep.subr.mxu0 %v7415_v58 }
 0xd8a   :  { %7193 = vmatpush3.msra.mxu0 %v9083_v4 }
 0xd8b   :  { %7204 = vmatprep.subr.mxu0 %v7415_v58 }
 0xd91   :  { %v7327_v57 = vpop.eup %7326 }
 0xd92   :  { %v5593_v34 = vmul.f32 %v7327_v57, %v9383_v1 }
 0xdf2   :  { %v5596_v22 = vpop.permute.xlu1 %5595 }
 0xdf3   :  { %v5598_v33 = vmul.f32 %v7327_v57, %v5596_v22 }
 0xdf5   :  { %5600 = vrot.lane.b32.xlu0 %v5598_v33, %s7410_s26 }
 0xdff   :  { %v9395_v16 = vpop.permute.xlu1 %5613 }
 0xe00   :  { %vm5615_vm8 = vcmp.eq.s32.totalorder %v9395_v16, 1 }
 0xe47   :  { %v5468_v11 = vpop.f32.mrf.mxu0 }
 0xe48   :  { %v5472_v40 = vadd.f32 %v5468_v11, %v5394_v50 }
 0xe49   :  { %v7182_v23 = vpop.f32.mrf.mxu0 }
 0xe4a   :  { %v6871_v2 = vmul.f32 -1.442695, %v5472_v40 }
 0xe67   :  { %v5601_v44 = vpop.permute.xlu0 %5600 }
 0xe68   :  { %v9386_v52 = vadd.f32 %v5601_v44, %v5593_v34 }
 0xe6a   :  { %7328 = vtanh.f32 %v9386_v52  ;;  %v9455_v44 = vsel %vm5615_vm8, %v9386_v52, %v9383_v1 }
 0xe6b   :  { %7330 = vtanh.f32 %v5472_v40 }
 0xe6c   :  { %7332 = vpow2.f32 %v6871_v2 }
 0xe77   :  { %v7329_v61 = vpop.eup %7328 }
 0xe78   :  { %5606 = vrot.lane.b32.xlu0 %v7329_v61, %s7412_s16  ;;  %v7331_v51 = vpop.eup %7330 }
 0xe79   :  { %v7333_v54 = vpop.eup %7332 }
 0xe7a   :  { %v5476_v43 = vadd.f32 1.0, %v7333_v54 }
 0xe7c   :  { %5482 = vrot.lane.b32.xlu0 %v7331_v51, %s7419_s3  ;;  %7334 = vrcp.f32 %v5476_v43 }
 0xe80   :  { %5500 = vperm.xlu0 %7273, %v5498_v41  }
 0xe89   :  { %v7335_v63 = vpop.eup %7334 }
 0xeea   :  { %v5607_v42 = vpop.permute.xlu0 %5606 }
 0xeeb   :  { %v9397_v26 = vmul.f32 %v7327_v57, %v5607_v42  ;;  %v5631_v57 = vld [vmem:[#allocation2 + $0x8] sm:$0x3] }
 0xeed   :  { %v9404_v8 = vsel %vm5615_vm8, %v9397_v26, %v9329_v20  ;;  %v5480_v20 = vmul.f32 %v7335_v63, %v9414_v3 }
 0xeee   :  { %5737 = vrot.lane.b32.xlu1 %v9404_v8, %s7410_s26  ;;  %v5483_v28 = vpop.permute.xlu0 %5482 }
 0xeef   :  { %v5485_v39 = vmul.f32 %v7335_v63, %v5483_v28 }
 0xef2   :  { %5487 = vrot.lane.b32.xlu1 %v5485_v39, %s7410_s26 }
 0xefb   :  { %v9427_v62 = vpop.permute.xlu0 %5500 }
 0xefc   :  { %vm5502_vm10 = vcmp.eq.s32.totalorder %v9427_v62, 1 }
 0xf60   :  { %v5738_v30 = vpop.permute.xlu1 %5737 }
 0xf61   :  { %7202 = vmatmul.mubr.msk.f32.vlgmr.msra.gmra.mxu1 %vm438_vm5, %v5738_v30 }
 0xf62   :  { %7212 = vmatpush3.msra.mxu1 %v9138_v13  ;;  %7215 = vmatprep.mubr.msk.f32.mxu1 %vm7416_vm2, %v7415_v58 }
 0xf63   :  { %7213 = vmatprep.subr.mxu1 %v7415_v58 }
 0xf64   :  { %v5488_v15 = vpop.permute.xlu1 %5487  ;;  %7214 = vmatpush3.msra.mxu1 %v9145_v35 }
 0xf65   :  { %v9422_v48 = vadd.f32 %v5488_v15, %v5480_v20  ;;  %7225 = vmatprep.subr.mxu1 %v7415_v58 }
 0xf67   :  { %7336 = vtanh.f32 %v9422_v48 }
 0xf74   :  { %v7337_v55 = vpop.eup %7336 }
 0xf75   :  { %5493 = vrot.lane.b32.xlu1 %v7337_v55, %s7412_s16 }
 0xfe7   :  { %v5494_v29 = vpop.permute.xlu1 %5493 }
 0xfe8   :  { %v9429_v21 = vmul.f32 %v7335_v63, %v5494_v29  ;;  %v9477_v63 = vsel %vm5502_vm10, %v9422_v48, %v9414_v3 }
 0xfea   :  { %v9436_v37 = vsel %vm5502_vm10, %v9429_v21, %v9362_v38  ;;  %v5632_v38 = vld [vmem:[#allocation2 + $0x6] sm:$0x3] }
 0xfeb   :  { %5634 = vrot.lane.b32.xlu0 %v9436_v37, %s7420_s24 }
0x1021   :  { %v5807_v6 = vpop.f32.mrf.mxu1 }
0x1022   :  { %5812 = vrot.lane.b32.xlu1 %v5807_v6, %s7417_s19  ;;  %v5856_v6 = vld [vmem:[#allocation2 + $0x4] sm:$0x3] }
0x1023   :  { %v7203_v25 = vpop.f32.mrf.mxu1 }
0x105d   :  { %v5635_v32 = vpop.permute.xlu0 %5634 }
0x105e   :  { %7195 = vmatmul.mubr.msk.f32.vlgmr.msra.gmra.mxu0 %vm438_vm5, %v5635_v32 }
0x105f   :  { %7205 = vmatpush3.msra.mxu0 %v9078_v47  ;;  %7208 = vmatprep.mubr.msk.f32.mxu0 %vm7416_vm2, %v7415_v58 }
0x1060   :  { %7206 = vmatprep.subr.mxu0 %v7415_v58 }
0x1061   :  { %7207 = vmatpush3.msra.mxu0 %v9083_v4 }
0x1062   :  { %7218 = vmatprep.subr.mxu0 %v7415_v58 }
0x1094   :  { %v5813_v5 = vpop.permute.xlu1 %5812 }
0x1095   :  { %v5815_v59 = vadd.f32 %v5813_v5, %v5632_v38 }
0x1097   :  { %7338 = vtanh.f32 %v5815_v59  ;;  %v6877_v7 = vmul.f32 -1.442695, %v5815_v59 }
0x1099   :  { %7340 = vpow2.f32 %v6877_v7 }
0x10a4   :  { %v7339_v12 = vpop.eup %7338 }
0x10a5   :  { %5825 = vrot.lane.b32.xlu0 %v7339_v12, %s7419_s3 }
0x10a6   :  { %v7341_v46 = vpop.eup %7340 }
0x10a7   :  { %v5819_v56 = vadd.f32 1.0, %v7341_v46 }
0x10a9   :  { %7342 = vrcp.f32 %v5819_v56 }
0x10b6   :  { %v7343_v19 = vpop.eup %7342 }
0x10b7   :  { %v5823_v50 = vmul.f32 %v7343_v19, %v9455_v44 }
0x1117   :  { %v5826_v53 = vpop.permute.xlu0 %5825 }
0x1118   :  { %v5828_v45 = vmul.f32 %v7343_v19, %v5826_v53 }
0x111a   :  { %5830 = vrot.lane.b32.xlu1 %v5828_v45, %s7410_s26 }
0x111e   :  { %v5704_v22 = vpop.f32.mrf.mxu0 }
0x111f   :  { %v5708_v33 = vadd.f32 %v5704_v22, %v5631_v57 }
0x1120   :  { %v7196_v11 = vpop.f32.mrf.mxu0 }
0x1121   :  { %7344 = vtanh.f32 %v5708_v33  ;;  %v6875_v34 = vmul.f32 -1.442695, %v5708_v33 }
0x1123   :  { %7346 = vpow2.f32 %v6875_v34 }
0x112e   :  { %v7345_v23 = vpop.eup %7344 }
0x112f   :  { %5718 = vrot.lane.b32.xlu1 %v7345_v23, %s7419_s3 }
0x1130   :  { %v7347_v61 = vpop.eup %7346 }
0x1131   :  { %v5712_v51 = vadd.f32 1.0, %v7347_v61 }
0x118c   :  { %v5831_v40 = vpop.permute.xlu1 %5830 }
0x118d   :  { %v9458_v17 = vadd.f32 %v5831_v40, %v5823_v50 }
0x118f   :  { %7348 = vtanh.f32 %v9458_v17  ;;  %v9517_v50 = vsel %vm5502_vm10, %v9458_v17, %v9455_v44 }
0x1190   :  { %7350 = vrcp.f32 %v5712_v51 }
0x119c   :  { %v7349_v41 = vpop.eup %7348 }
0x119d   :  { %5836 = vrot.lane.b32.xlu0 %v7349_v41, %s7412_s16  ;;  %v7351_v2 = vpop.eup %7350 }
0x119e   :  { %v5716_v28 = vmul.f32 %v7351_v2, %v9477_v63 }
0x11a1   :  { %v5719_v54 = vpop.permute.xlu1 %5718 }
0x11a2   :  { %v5721_v43 = vmul.f32 %v7351_v2, %v5719_v54 }
0x11a4   :  { %5723 = vrot.lane.b32.xlu1 %v5721_v43, %s7410_s26 }
0x120f   :  { %v5837_v1 = vpop.permute.xlu0 %5836 }
0x1210   :  { %v9463_v52 = vmul.f32 %v7343_v19, %v5837_v1 }
0x1212   :  { %v9469_v42 = vsel %vm5502_vm10, %v9463_v52, %v9404_v8 }
0x1213   :  { %5961 = vrot.lane.b32.xlu0 %v9469_v42, %s7410_s26 }
0x1216   :  { %v5724_v39 = vpop.permute.xlu1 %5723 }
0x1217   :  { %v9480_v30 = vadd.f32 %v5724_v39, %v5716_v28 }
0x1219   :  { %7352 = vtanh.f32 %v9480_v30 }
0x1226   :  { %v7353_v20 = vpop.eup %7352 }
0x1227   :  { %5729 = vrot.lane.b32.xlu0 %v7353_v20, %s7412_s16 }
0x1285   :  { %v5962_v8 = vpop.permute.xlu0 %5961 }
0x1286   :  { %7216 = vmatmul.mubr.msk.f32.vlgmr.msra.gmra.mxu1 %vm438_vm5, %v5962_v8 }
0x1287   :  { %7226 = vmatpush3.msra.mxu1 %v9138_v13  ;;  %7229 = vmatprep.mubr.msk.f32.mxu1 %vm7416_vm2, %v7415_v58 }
0x1288   :  { %7227 = vmatprep.subr.mxu1 %v7415_v58 }
0x1289   :  { %7228 = vmatpush3.msra.mxu1 %v9145_v35 }
0x128a   :  { %7239 = vmatprep.subr.mxu1 %v7415_v58 }
0x1299   :  { %v5730_v3 = vpop.permute.xlu0 %5729 }
0x129a   :  { %v9491_v15 = vmul.f32 %v7351_v2, %v5730_v3  ;;  %v9528_v2 = vsel %vm5615_vm8, %v9480_v30, %v9477_v63  ;;  %v7407_v3 = vld [vmem:[%s9725_s9 + $0x8] sm:$0xff] }
0x129c   :  { %v9497_v48 = vsel %vm5615_vm8, %v9491_v15, %v9436_v37  ;;  %v5735_v62 = vsel %vm5615_vm8, %v9491_v15, 0.0 }
0x129d   :  { %5858 = vrot.lane.b32.xlu1 %v9497_v48, %s7420_s24 }
0x130f   :  { %v5859_v55 = vpop.permute.xlu1 %5858 }
0x1310   :  { %7209 = vmatmul.mubr.msk.f32.vlgmr.msra.gmra.mxu0 %vm438_vm5, %v5859_v55  ;;  %v6079_v55 = vld [vmem:[#allocation2 + $0xc] sm:$0x3] }
0x1311   :  { %7219 = vmatpush3.msra.mxu0 %v9078_v47  ;;  %7222 = vmatprep.mubr.msk.f32.mxu0 %vm7416_vm2, %v7415_v58  ;;  %v5855_v47 = vld [vmem:[#allocation2 + $0xa] sm:$0x3] }
0x1312   :  { %7220 = vmatprep.subr.mxu0 %v7415_v58 }
0x1313   :  { %7221 = vmatpush3.msra.mxu0 %v9083_v4 }
0x1314   :  { %7232 = vmatprep.subr.mxu0 %v7415_v58 }
0x1346   :  { %v6031_v29 = vpop.f32.mrf.mxu1 }
0x1347   :  { %6036 = vrot.lane.b32.xlu0 %v6031_v29, %s7417_s19 }
0x1348   :  { %v7217_v37 = vpop.f32.mrf.mxu1 }
0x13b9   :  { %v6037_v25 = vpop.permute.xlu0 %6036 }
0x13ba   :  { %v6039_v32 = vadd.f32 %v6037_v25, %v5856_v6 }
0x13bc   :  { %7354 = vtanh.f32 %v6039_v32  ;;  %v6881_v4 = vmul.f32 -1.442695, %v6039_v32  ;;  %v6080_v32 = vld [vmem:[#allocation2 + $0x2] sm:$0x3] }
0x13c9   :  { %v7355_v38 = vpop.eup %7354 }
0x13ca   :  { %6049 = vrot.lane.b32.xlu1 %v7355_v38, %s7419_s3 }
0x13d0   :  { %v5928_v5 = vpop.f32.mrf.mxu0 }
0x13d1   :  { %v5932_v59 = vadd.f32 %v5928_v5, %v5855_v47 }
0x13d2   :  { %v7210_v12 = vpop.f32.mrf.mxu0 }
0x13d3   :  { %7356 = vtanh.f32 %v5932_v59  ;;  %v6879_v19 = vmul.f32 -1.442695, %v5932_v59 }
0x13d4   :  { %7358 = vpow2.f32 %v6881_v4 }
0x13e0   :  { %v7357_v7 = vpop.eup %7356 }
0x13e1   :  { %5942 = vrot.lane.b32.xlu1 %v7357_v7, %s7419_s3  ;;  %v7359_v46 = vpop.eup %7358 }
0x13e2   :  { %v6043_v56 = vadd.f32 1.0, %v7359_v46 }
0x13e4   :  { %7360 = vrcp.f32 %v6043_v56 }
0x13e5   :  { %7362 = vpow2.f32 %v6879_v19 }
0x13f1   :  { %v7361_v53 = vpop.eup %7360 }
0x13f2   :  { %v7363_v22 = vpop.eup %7362  ;;  %v6047_v40 = vmul.f32 %v7361_v53, %v9517_v50 }
0x13f3   :  { %v5936_v33 = vadd.f32 1.0, %v7363_v22 }
0x13f5   :  { %7364 = vrcp.f32 %v5936_v33 }
0x1402   :  { %v7365_v11 = vpop.eup %7364 }
0x1403   :  { %v5940_v54 = vmul.f32 %v7365_v11, %v9528_v2 }
0x143c   :  { %v6050_v45 = vpop.permute.xlu1 %6049 }
0x143d   :  { %v6052_v57 = vmul.f32 %v7361_v53, %v6050_v45 }
0x143f   :  { %6054 = vrot.lane.b32.xlu0 %v6052_v57, %s7410_s26 }
0x1453   :  { %v5943_v23 = vpop.permute.xlu1 %5942 }
0x1454   :  { %v5945_v34 = vmul.f32 %v7365_v11, %v5943_v23 }
0x1456   :  { %5947 = vrot.lane.b32.xlu1 %v5945_v34, %s7410_s26 }
0x14b1   :  { %v6055_v61 = vpop.permute.xlu0 %6054 }
0x14b2   :  { %v9520_v51 = vadd.f32 %v6055_v61, %v6047_v40 }
0x14b4   :  { %7366 = vtanh.f32 %v9520_v51  ;;  %v9581_v61 = vsel %vm5264_vm3, %v9520_v51, %v9517_v50 }
0x14c1   :  { %v7367_v41 = vpop.eup %7366 }
0x14c2   :  { %6060 = vrot.lane.b32.xlu0 %v7367_v41, %s7412_s16 }
0x14c8   :  { %v5948_v44 = vpop.permute.xlu1 %5947 }
0x14c9   :  { %v5950_v17 = vadd.f32 %v5948_v44, %v5940_v54 }
0x14cb   :  { %7368 = vtanh.f32 %v5950_v17  ;;  %v5958_v33 = vsel %vm5377_vm1, %v5950_v17, %v9528_v2 }
0x14d8   :  { %v7369_v43 = vpop.eup %7368 }
0x14d9   :  { %5953 = vrot.lane.b32.xlu1 %v7369_v43, %s7412_s16 }
0x1534   :  { %v6061_v1 = vpop.permute.xlu0 %6060 }
0x1535   :  { %v9532_v28 = vmul.f32 %v7361_v53, %v6061_v1 }
0x1537   :  { %v9538_v39 = vsel %vm5264_vm3, %v9532_v28, %v9469_v42 }
0x1538   :  { %6185 = vrot.lane.b32.xlu0 %v9538_v39, %s7410_s26 }
0x154b   :  { %v5954_v63 = vpop.permute.xlu1 %5953 }
0x154c   :  { %v9542_v30 = vmul.f32 %v7365_v11, %v5954_v63 }
0x154e   :  { %v9548_v20 = vsel %vm5377_vm1, %v9542_v30, %v9497_v48 }
0x154f   :  { %6082 = vrot.lane.b32.xlu0 %v9548_v20, %s7420_s24 }
0x15aa   :  { %v6186_v8 = vpop.permute.xlu0 %6185 }
0x15ab   :  { %7230 = vmatmul.mubr.msk.f32.vlgmr.msra.gmra.mxu1 %vm438_vm5, %v6186_v8 }
0x15ac   :  { %7240 = vmatpush3.msra.mxu1 %v9138_v13  ;;  %7243 = vmatprep.mubr.msk.f32.mxu1 %vm7416_vm2, %v7415_v58  ;;  %v7408_v13 = vld [vmem:[%s9725_s9] sm:$0xff] }
0x15ad   :  { %7241 = vmatprep.subr.mxu1 %v7415_v58 }
0x15ae   :  { %7242 = vmatpush3.msra.mxu1 %v9145_v35 }
0x15c1   :  { %v6083_v42 = vpop.permute.xlu0 %6082 }
0x15c2   :  { %7223 = vmatmul.mubr.msk.f32.vlgmr.msra.gmra.mxu0 %vm438_vm5, %v6083_v42 }
0x15c3   :  { %7233 = vmatpush3.msra.mxu0 %v7407_v3  ;;  %7236 = vmatprep.mubr.msk.f32.mxu0 %vm7416_vm2, %v7415_v58 }
0x15c4   :  { %7234 = vmatprep.subr.mxu0 %v7415_v58 }
0x15c5   :  { %7235 = vmatpush3.msra.mxu0 %v7408_v13 }
0x15c6   :  { %7246 = vmatprep.subr.mxu0 %v6541_v18 }
0x166b   :  { %v6255_v48 = vpop.f32.mrf.mxu1 }
0x166c   :  { %6260 = vrot.lane.b32.xlu1 %v6255_v48, %s7417_s19  ;;  %v6303_v48 = vld [vmem:[#allocation2 + $0xe] sm:$0x3] }
0x166d   :  { %v7231_v35 = vpop.f32.mrf.mxu1 }
0x1682   :  { %v6152_v29 = vpop.f32.mrf.mxu0 }
0x1683   :  { %v6156_v37 = vadd.f32 %v6152_v29, %v6079_v55 }
0x1684   :  { %v7224_v6 = vpop.f32.mrf.mxu0 }
0x1685   :  { %7370 = vtanh.f32 %v6156_v37  ;;  %v6883_v47 = vmul.f32 -1.442695, %v6156_v37 }
0x1692   :  { %v7371_v25 = vpop.eup %7370 }
0x1693   :  { %6166 = vrot.lane.b32.xlu1 %v7371_v25, %s7419_s3  ;;  %v6304_v25 = vld [vmem:[#allocation2] sm:$0x3] }
0x16de   :  { %v6261_v38 = vpop.permute.xlu1 %6260 }
0x16df   :  { %v6263_v58 = vadd.f32 %v6261_v38, %v6080_v32 }
0x16e1   :  { %7372 = vtanh.f32 %v6263_v58  ;;  %v6885_v56 = vmul.f32 -1.442695, %v6263_v58 }
0x16e2   :  { %7374 = vpow2.f32 %v6883_v47 }
0x16ee   :  { %v7373_v5 = vpop.eup %7372 }
0x16ef   :  { %6273 = vrot.lane.b32.xlu0 %v7373_v5, %s7419_s3  ;;  %v7375_v59 = vpop.eup %7374 }
0x16f0   :  { %v6160_v12 = vadd.f32 1.0, %v7375_v59 }
0x16f2   :  { %7376 = vrcp.f32 %v6160_v12 }
0x16f3   :  { %7378 = vpow2.f32 %v6885_v56 }
0x16ff   :  { %v7377_v7 = vpop.eup %7376 }
0x1700   :  { %v7379_v19 = vpop.eup %7378  ;;  %v6164_v11 = vmul.f32 %v7377_v7, %v5958_v33 }
0x1701   :  { %v6267_v53 = vadd.f32 1.0, %v7379_v19 }
0x1703   :  { %7380 = vrcp.f32 %v6267_v53 }
0x1705   :  { %v6167_v4 = vpop.permute.xlu1 %6166 }
0x1706   :  { %v6169_v46 = vmul.f32 %v7377_v7, %v6167_v4 }
0x1708   :  { %6171 = vrot.lane.b32.xlu1 %v6169_v46, %s7410_s26 }
0x1710   :  { %v7381_v45 = vpop.eup %7380 }
0x1711   :  { %v6271_v41 = vmul.f32 %v7381_v45, %v9581_v61 }
0x1761   :  { %v6274_v57 = vpop.permute.xlu0 %6273 }
0x1762   :  { %v6276_v22 = vmul.f32 %v7381_v45, %v6274_v57 }
0x1764   :  { %6278 = vrot.lane.b32.xlu0 %v6276_v22, %s7410_s26 }
0x177a   :  { %v6172_v23 = vpop.permute.xlu1 %6171 }
0x177b   :  { %v6174_v34 = vadd.f32 %v6172_v23, %v6164_v11  ;;  %v5267_v23 = vsel %vm5264_vm3, %v9355_v24, 0.0  ;;  %v5618_v24 = vsel %vm5615_vm8, %v9397_v26, 0.0 }
0x177d   :  { %7382 = vtanh.f32 %v6174_v34  ;;  %v6182_v46 = vsel %vm5139_vm12, %v6174_v34, %v5958_v33  ;;  %v5842_v33 = vsel %vm5502_vm10, %v9463_v52, 0.0  ;;  %v5959_v52 = vsel %vm5377_vm1, %v9542_v30, 0.0 }
0x178a   :  { %v7383_v40 = vpop.eup %7382 }
0x178b   :  { %6177 = vrot.lane.b32.xlu1 %v7383_v40, %s7412_s16  ;;  %v5142_v40 = vsel %vm5139_vm12, %v9243_v60, 0.0 }
0x17d6   :  { %v6279_v54 = vpop.permute.xlu0 %6278 }
0x17d7   :  { %v9584_v44 = vadd.f32 %v6279_v54, %v6271_v41 }
0x17d9   :  { %7384 = vtanh.f32 %v9584_v44  ;;  %v6289_v41 = vsel %vm5029_vm14, %v9584_v44, %v9581_v61  ;;  %v5032_v44 = vsel %vm5029_vm14, %v9284_v49, 0.0  ;;  %v5380_v49 = vsel %vm5377_vm1, %v9322_v27, 0.0  ;;  %v6539_v27 = vld [vmem:[%s9731_s11 + $0x8] sm:$0xff] }
0x17da   :  { %7253 = vmatprep.subr.mxu1 %v6539_v27 }
0x17e6   :  { %v7385_v2 = vpop.eup %7384 }
0x17e7   :  { %6284 = vrot.lane.b32.xlu0 %v7385_v2, %s7412_s16 }
0x17fd   :  { %v6178_v17 = vpop.permute.xlu1 %6177 }
0x17fe   :  { %v9588_v43 = vmul.f32 %v7377_v7, %v6178_v17 }
0x1800   :  { %v6181_v1 = vsel %vm5139_vm12, %v9588_v43, %v9548_v20 }
0x1801   :  { %6306 = vrot.lane.b32.xlu1 %v6181_v1, %s7420_s24 }
0x1859   :  { %v6285_v50 = vpop.permute.xlu0 %6284 }
0x185a   :  { %v6287_v51 = vmul.f32 %v7381_v45, %v6285_v50 }
0x185c   :  { %v6288_v63 = vsel %vm5029_vm14, %v6287_v51, %v9538_v39  ;;  %v6290_v34 = vsel %vm5029_vm14, %v6287_v51, 0.0 }
0x185d   :  { %6407 = vrot.lane.b32.xlu0 %v6288_v63, %s7410_s26  ;;  %v5505_v63 = vsel %vm5502_vm10, %v9429_v21, 0.0 }
0x1873   :  { %v6307_v8 = vpop.permute.xlu1 %6306 }
0x1874   :  { %7237 = vmatmul.mubr.msk.f32.vlgmr.msra.gmra.mxu0 %vm438_vm5, %v6307_v8 }
0x1875   :  { %7247 = vmatpush3.msra.mxu0 %v6541_v18 }
0x1876   :  { %7248 = vmatprep.subr.mxu0 %v6540_v14 }
0x1877   :  { %7249 = vmatpush3.msra.mxu0 %v6540_v14 }
0x18cf   :  { %v6408_v42 = vpop.permute.xlu0 %6407 }
0x18d0   :  { %7244 = vmatmul.mubr.msk.f32.vlgmr.msra.gmra.mxu1 %vm438_vm5, %v6408_v42  ;;  %v6066_v42 = vsel %vm5264_vm3, %v9532_v28, 0.0 }
0x18d1   :  { %7254 = vmatpush3.msra.mxu1 %v6539_v27 }
0x1934   :  { %v6376_v3 = vpop.f32.mrf.mxu0 }
0x1935   :  { %v6380_v20 = vadd.f32 %v6376_v3, %v6303_v48  ;;  %v6183_v48 = vsel %vm5139_vm12, %v9588_v43, 0.0 }
0x1936   :  { %v7238_v13 = vpop.f32.mrf.mxu0 }
0x1937   :  { %7386 = vtanh.f32 %v6380_v20  ;;  %v6887_v39 = vmul.f32 -1.442695, %v6380_v20  ;;  %v6538_v13 = vld [vmem:[%s9731_s11] sm:$0xff] }
0x1938   :  { %7255 = vmatprep.subr.mxu1 %v6538_v13 }
0x1939   :  { %7388 = vpow2.f32 %v6887_v39  ;;  %7256 = vmatpush3.msra.mxu1 %v6538_v13 }
0x1944   :  { %v7387_v29 = vpop.eup %7386 }
0x1946   :  { %v7389_v37 = vpop.eup %7388 }
0x1947   :  { %v6384_v6 = vadd.f32 1.0, %v7389_v37 }
0x1949   :  { %7390 = vrcp.f32 %v6384_v6 }
0x1956   :  { %v7391_v58 = vpop.eup %7390 }
0x1957   :  { %v6388_v56 = vmul.f32 %v7391_v58, %v6182_v46 }
0x1990   :  { %v6477_v35 = vpop.f32.mrf.mxu1 }
0x1991   :  { %6482 = vrot.lane.b32.xlu0 %v6477_v35, %s7417_s19 }
0x1992   :  { %v7245_v55 = vpop.f32.mrf.mxu1 }
0x1993   :  { %v6522_v55 = vld [vmem:[#allocation3] sm:$0x3] }
0x1995   :  { %6390 = vrot.lane.b32.xlu0 %v7387_v29, %s7419_s3 }
0x1a03   :  { %v6483_v32 = vpop.permute.xlu0 %6482 }
0x1a04   :  { %v6485_v38 = vadd.f32 %v6483_v32, %v6304_v25 }
0x1a06   :  { %7392 = vtanh.f32 %v6485_v38  ;;  %v6889_v12 = vmul.f32 -1.442695, %v6485_v38 }
0x1a07   :  { %v6391_v47 = vpop.permute.xlu0 %6390 }
0x1a08   :  { %v6393_v5 = vmul.f32 %v7391_v58, %v6391_v47  ;;  %7394 = vpow2.f32 %v6889_v12 }
0x1a0a   :  { %6395 = vrot.lane.b32.xlu0 %v6393_v5, %s7410_s26 }
0x1a13   :  { %v7393_v59 = vpop.eup %7392 }
0x1a14   :  { %6495 = vrot.lane.b32.xlu1 %v7393_v59, %s7419_s3 }
0x1a15   :  { %v7395_v7 = vpop.eup %7394 }
0x1a16   :  { %v6489_v4 = vadd.f32 1.0, %v7395_v7 }
0x1a18   :  { %7396 = vrcp.f32 %v6489_v4 }
0x1a25   :  { %v9607_v45 = vpop.eup %7396 }
0x1a26   :  { %v6493_v60 = vmul.f32 %v9607_v45, %v6289_v41 }
0x1a7c   :  { %v6396_v19 = vpop.permute.xlu0 %6395 }
0x1a7d   :  { %v6398_v53 = vadd.f32 %v6396_v19, %v6388_v56  ;;  %v6537_v19 = vld [vmem:[#allocation4 + $0xe] sm:$0x3] }
0x1a7f   :  { %7398 = vtanh.f32 %v6398_v53 }
0x1a86   :  { %v6496_v57 = vpop.permute.xlu1 %6495 }
0x1a87   :  { %v6498_v22 = vmul.f32 %v9607_v45, %v6496_v57 }
0x1a89   :  { %6500 = vrot.lane.b32.xlu1 %v6498_v22, %s7410_s26 }
0x1a8c   :  { %v7399_v11 = vpop.eup %7398 }
0x1a8d   :  { %6401 = vrot.lane.b32.xlu0 %v7399_v11, %s7412_s16 }
0x1a91   :  { %5382 = vrot.lane.b32.xlu0 %v5267_v23, %s7420_s24 }
0x1a95   :  { %5850 = vrot.lane.b32.xlu0 %v5842_v33, %s7410_s26 }
0x1a99   :  { %6298 = vrot.lane.b32.xlu0 %v6290_v34, %s7410_s26 }
0x1a9d   :  { %5150 = vrot.lane.b32.xlu0 %v5142_v40, %s7410_s26 }
0x1aa1   :  { %5626 = vrot.lane.b32.xlu0 %v5618_v24, %s7410_s26 }
0x1aa5   :  { %6068 = vrot.lane.b32.xlu0 %v5959_v52, %s7420_s24 }
0x1afb   :  { %v6501_v54 = vpop.permute.xlu1 %6500 }
0x1afc   :  { %v6503_v2 = vadd.f32 %v6501_v54, %v6493_v60 }
0x1afe   :  { %7400 = vtanh.f32 %v6503_v2 }
0x1aff   :  { %v6402_v17 = vpop.permute.xlu0 %6401 }
0x1b00   :  { %v6404_v26 = vmul.f32 %v7391_v58, %v6402_v17 }
0x1b02   :  { %v6405_v1 = vsel %vm4908_vm7, %v6404_v26, 0.0 }
0x1b03   :  { %6512 = vrot.lane.b32.xlu0 %v6405_v1, %s7420_s24  ;;  %v5383_v30 = vpop.permute.xlu0 %5382 }
0x1b04   :  { %5386 = vst.msk [vmem:[#allocation3 + $0x4] sm:$0x3] %vm4915_vm9, %v5383_v30 }
0x1b07   :  { %v5851_v50 = vpop.permute.xlu0 %5850 }
0x1b08   :  { %5854 = vst.msk [vmem:[#allocation4 + $0x6] sm:$0x3] %vm4915_vm9, %v5851_v50 }
0x1b0b   :  { %v7401_v51 = vpop.eup %7400  ;;  %v6299_v61 = vpop.permute.xlu0 %6298  ;;  %v6524_v37 = vld [vmem:[#allocation3 + $0x4] sm:$0x3] }
0x1b0c   :  { %6302 = vst.msk [vmem:[#allocation4 + $0x2] sm:$0x3] %vm4915_vm9, %v6299_v61  ;;  %6506 = vrot.lane.b32.xlu1 %v7401_v51, %s7412_s16  ;;  %v6894_v61 = vld [vmem:[%s9732_s13] ss:$0 sm:$0xff] }
0x1b0f   :  { %v5151_v10 = vpop.permute.xlu0 %5150  ;;  %v6533_v4 = vld [vmem:[#allocation4 + $0x6] sm:$0x3] }
0x1b10   :  { %5154 = vst.msk [vmem:[#allocation4 + $0xc] sm:$0x3] %vm4915_vm9, %v5151_v10  ;;  %5144 = vrot.lane.b32.xlu1 %v5032_v44, %s7420_s24 }
0x1b13   :  { %v5627_v8 = vpop.permute.xlu0 %5626 }
0x1b14   :  { %5630 = vst.msk [vmem:[#allocation4 + $0x8] sm:$0x3] %vm4915_vm9, %v5627_v8  ;;  %5620 = vrot.lane.b32.xlu1 %v5505_v63, %s7420_s24 }
0x1b17   :  { %v6069_v9 = vpop.permute.xlu0 %6068  ;;  %v6536_v7 = vld [vmem:[#allocation4 + $0xc] sm:$0x3] }
0x1b18   :  { %6072 = vst.msk [vmem:[#allocation3 + $0xa] sm:$0x3] %vm4915_vm9, %v6069_v9  ;;  %6074 = vrot.lane.b32.xlu1 %v6066_v42, %s7410_s26  ;;  %v6568_v57 = vcombine.low %v6536_v7, %v6537_v19 }
0x1b1a   :  { %v6582_v52 = vrot.slane %v6568_v57, %v7799_v36 }
0x1b1b   :  { %v6534_v12 = vld [vmem:[#allocation4 + $0x8] sm:$0x3] }
0x1b1c   :  { %5388 = vrot.lane.b32.xlu1 %v5380_v49, %s7410_s26 }
0x1b1f   :  { %v6527_v33 = vld [vmem:[#allocation3 + $0xa] sm:$0x3] }
0x1b20   :  { %5844 = vrot.lane.b32.xlu1 %v5735_v62, %s7420_s24 }
0x1b75   :  { %v6513_v21 = vpop.permute.xlu0 %6512 }
0x1b76   :  { %6516 = vst.msk [vmem:[#allocation3 + $0xe] sm:$0x3] %vm4915_vm9, %v6513_v21 }
0x1b7d   :  { %v6529_v60 = vld [vmem:[#allocation3 + $0xe] sm:$0x3] }
0x1b7e   :  { %v6507_v16 = vpop.permute.xlu1 %6506 }
0x1b7f   :  { %v6509_v15 = vmul.f32 %v9607_v45, %v6507_v16  ;;  %v6531_v45 = vld [vmem:[#allocation4 + $0x2] sm:$0x3] }
0x1b81   :  { %v6510_v28 = vsel %vm4801_vm11, %v6509_v15, 0.0 }
0x1b82   :  { %6518 = vrot.lane.b32.xlu1 %v6510_v28, %s7410_s26  ;;  %v5145_v3 = vpop.permute.xlu1 %5144 }
0x1b83   :  { %5148 = vst.msk [vmem:[#allocation3 + $0x2] sm:$0x3] %vm4915_vm9, %v5145_v3 }
0x1b86   :  { %6292 = vrot.lane.b32.xlu1 %v6183_v48, %s7420_s24  ;;  %v5621_v20 = vpop.permute.xlu1 %5620 }
0x1b87   :  { %5624 = vst.msk [vmem:[#allocation3 + $0x6] sm:$0x3] %vm4915_vm9, %v5621_v20 }
0x1b8a   :  { %v6075_v0 = vpop.permute.xlu1 %6074  ;;  %v6523_v35 = vld [vmem:[#allocation3 + $0x2] sm:$0x3] }
0x1b8b   :  { %6078 = vst.msk [vmem:[#allocation4 + $0x4] sm:$0x3] %vm4915_vm9, %v6075_v0  ;;  %v6671_v29 = vcombine.low %v6522_v55, %v6523_v35 }
0x1b8d   :  { %v6679_v43 = vrot.slane %v6671_v29, %v7799_v36 }
0x1b8e   :  { %v5389_v39 = vpop.permute.xlu1 %5388  ;;  %v6525_v6 = vld [vmem:[#allocation3 + $0x6] sm:$0x3] }
0x1b8f   :  { %5392 = vst.msk [vmem:[#allocation4 + $0xa] sm:$0x3] %vm4915_vm9, %v5389_v39  ;;  %v6672_v31 = vcombine.low %v6524_v37, %v6525_v6 }
0x1b91   :  { %v6686_v25 = vrot.slane %v6672_v31, %v7799_v36 }
0x1b92   :  { %v5845_v32 = vpop.permute.xlu1 %5844  ;;  %v6532_v59 = vld [vmem:[#allocation4 + $0x4] sm:$0x3] }
0x1b93   :  { %5848 = vst.msk [vmem:[#allocation3 + $0x8] sm:$0x3] %vm4915_vm9, %v5845_v32  ;;  %v6687_v38 = vcombine.low %v6679_v43, %v6686_v25  ;;  %v6551_v56 = vcombine.low %v6532_v59, %v6533_v4 }
0x1b95   :  { %7257 = vmatprep.mubr.msk.f32.mxu1 %vm438_vm5, %v6687_v38  ;;  %v6565_v40 = vrot.slane %v6551_v56, %v7799_v36 }
0x1b96   :  { %v6535_v47 = vld [vmem:[#allocation4 + $0xa] sm:$0x3] }
0x1b97   :  { %v6567_v46 = vcombine.low %v6534_v12, %v6535_v47 }
0x1b99   :  { %v6575_v23 = vrot.slane %v6567_v46, %v7799_v36 }
0x1b9a   :  { %v6526_v22 = vld [vmem:[#allocation3 + $0x8] sm:$0x3] }
0x1b9b   :  { %v6688_v24 = vcombine.low %v6526_v22, %v6527_v33  ;;  %v6583_v17 = vcombine.low %v6575_v23, %v6582_v52 }
0x1b9d   :  { %v6696_v26 = vrot.slane %v6688_v24, %v7799_v36 }
0x1bf4   :  { %v6519_v58 = vpop.permute.xlu1 %6518 }
0x1bf5   :  { %6521 = vst.msk [vmem:[#allocation4] sm:$0x3] %vm4915_vm9, %v6519_v58 }
0x1bf8   :  { %v6293_v5 = vpop.permute.xlu1 %6292 }
0x1bf9   :  { %6296 = vst.msk [vmem:[#allocation3 + $0xc] sm:$0x3] %vm4915_vm9, %v6293_v5 }
0x1bfc   :  { %v6530_v53 = vld [vmem:[#allocation4] sm:$0x3] }
0x1bfd   :  { %v6550_v11 = vcombine.low %v6530_v53, %v6531_v45 }
0x1bff   :  { %v6558_v34 = vrot.slane %v6550_v11, %v7799_v36 }
0x1c00   :  { %v6528_v41 = vld [vmem:[#allocation3 + $0xc] sm:$0x3] }
0x1c01   :  { %v6566_v54 = vcombine.low %v6558_v34, %v6565_v40  ;;  %v6689_v2 = vcombine.low %v6528_v41, %v6529_v60 }
0x1c03   :  { %7250 = vmatprep.mubr.msk.f32.mxu0 %vm438_vm5, %v6566_v54  ;;  %v6703_v1 = vrot.slane %v6689_v2, %v7799_v36 }
0x1c04   :  { %7251 = vmatmul.mubr.msk.f32.vlgmr.msra.gmra.mxu0 %vm438_vm5, %v6583_v17 }
0x1c05   :  { %v6704_v30 = vcombine.low %v6696_v26, %v6703_v1 }
0x1c07   :  { %7258 = vmatmul.mubr.msk.f32.vlgmr.msra.gmra.mxu1 %vm438_vm5, %v6704_v30 }
0x1cc4   :  { %v7252_v50 = vpop.f32.mrf.mxu0 }
0x1cc6   :  { %v6654_v10 = vpop.f32.mrf.mxu0 }
0x1cc7   :  { %v7259_v51 = vpop.f32.mrf.mxu1 }
0x1cc8   :  { %v6781_v44 = vadd.f32 %v7259_v51, %v7252_v50 }
0x1cc9   :  { %v6775_v63 = vpop.f32.mrf.mxu1 }
0x1cca   :  { %v6792_v8 = vadd.f32 %v6894_v61, %v6781_v44  ;;  %v6776_v42 = vadd.f32 %v6775_v63, %v6654_v10 }
0x1ccc   :  { %6794 = vst [vmem:[%s9733_s14 + $0x8] sm:$0xff] %v6792_v8  ;;  %v6791_v36 = vadd.f32 %v6894_v61, %v6776_v42 }
0x1cce   :  { %6793 = vst [vmem:[%s9733_s14] sm:$0xff] %v6791_v36 }

</bundles_post_ra>
